<compile_context>
chip_gen: v5e
topology: v5e:2x2
jax: 0.10.0
libtpu: 0.0.40
codegen_flags: <defaults>
</compile_context>

<pallas_src>
import functools

import jax
import jax.numpy as jnp
from jax.experimental import pallas as pl
from jax.experimental.pallas import tpu as pltpu

# ----- small, module-consistent shapes -----
B = 2            # batch
C_IN = 1         # input channels (x.view flattens them anyway)
H = W = 16       # spatial (stand-in for 224)
HIDDEN = 256     # stand-in for 1024
OUT_C = 32       # same as module
D_IN = C_IN * H * W          # 256
D_OUT = OUT_C * H * W        # 8192

B_PAD = 8        # pad batch to one full sublane -> unmasked vregs/stores
TN = 4096        # output-column tile: grid = 2, W2 tile = 256x4096 bf16 = 2 MiB


def _fused_kernel(x_ref, w1_ref, b1_ref, w2_ref, b2_ref, o_ref):
    """out_tile = relu(x @ W1 + b1) @ W2_tile + b2_tile.

    x / W1 / b1 are resident (constant index_map); the tiny layer-1 dot is
    recomputed per grid step and hides under the W2-tile DMA.  All matmuls
    take bf16 inputs on the MXU with f32 accumulation.
    """
    h = jnp.dot(x_ref[...], w1_ref[...],
                preferred_element_type=jnp.float32) + b1_ref[...]
    h = jnp.maximum(h, 0.0).astype(jnp.bfloat16)
    acc = jnp.dot(h, w2_ref[...], preferred_element_type=jnp.float32)
    o_ref[...] = (acc + b2_ref[...]).astype(o_ref.dtype)


def prepare_params(w1, b1, w2, b2):
    """One-time param prep (hoisted out of the forward path): bf16 weights,
    2-D f32 biases."""
    return (w1.astype(jnp.bfloat16),
            b1.reshape(1, HIDDEN).astype(jnp.float32),
            w2.astype(jnp.bfloat16),
            b2.reshape(1, D_OUT).astype(jnp.float32))


@functools.partial(jax.jit, static_argnames=())
def xray2model_forward(x_nchw, w1_bf16, b1_2d, w2_bf16, b2_2d):
    """x_nchw: (B, C_IN, H, W) float32 -> (B, OUT_C, H, W) float32."""
    b = x_nchw.shape[0]
    x_flat = x_nchw.reshape(b, -1).astype(jnp.bfloat16)            # (B, D_IN)
    x_pad = jnp.zeros((B_PAD, D_IN), jnp.bfloat16).at[:b].set(x_flat)

    n_tiles = D_OUT // TN   # = 2 -> keeps both v7x TensorCores busy
    out_pad = pl.pallas_call(
        _fused_kernel,
        out_shape=jax.ShapeDtypeStruct((B_PAD, D_OUT), jnp.float32),
        grid_spec=pltpu.PrefetchScalarGridSpec(
            num_scalar_prefetch=0,
            grid=(n_tiles,),
            in_specs=[
                pl.BlockSpec((B_PAD, D_IN), lambda j: (0, 0)),     # x (padded, bf16)
                pl.BlockSpec((D_IN, HIDDEN), lambda j: (0, 0)),    # W1 (bf16, resident)
                pl.BlockSpec((1, HIDDEN), lambda j: (0, 0)),       # b1 (f32, resident)
                pl.BlockSpec((HIDDEN, TN), lambda j: (0, j)),      # W2 tile (bf16)
                pl.BlockSpec((1, TN), lambda j: (0, j)),           # b2 tile (f32)
            ],
            out_specs=pl.BlockSpec((B_PAD, TN), lambda j: (0, j)),
        ),
        compiler_params=pltpu.CompilerParams(
            dimension_semantics=("parallel",)),
    )(x_pad, w1_bf16, b1_2d, w2_bf16, b2_2d)

    return out_pad[:b].reshape(b, OUT_C, H, W)


def _init_params(key):
    """Deterministic init, mirroring nn.Linear default (U[-1/sqrt(fan_in), ...])."""
    k1, k2, k3, k4 = jax.random.split(key, 4)
    bound1 = 1.0 / jnp.sqrt(D_IN)
    bound2 = 1.0 / jnp.sqrt(HIDDEN)
    w1 = jax.random.uniform(k1, (D_IN, HIDDEN), jnp.float32, -bound1, bound1)
    b1 = jax.random.uniform(k2, (HIDDEN,), jnp.float32, -bound1, bound1)
    w2 = jax.random.uniform(k3, (HIDDEN, D_OUT), jnp.float32, -bound2, bound2)
    b2 = jax.random.uniform(k4, (D_OUT,), jnp.float32, -bound2, bound2)
    return w1, b1, w2, b2


if __name__ == "__main__":
    key = jax.random.PRNGKey(0)
    k_x, k_p = jax.random.split(key)
    x = jax.random.normal(k_x, (B, C_IN, H, W), jnp.float32)
    w1, b1, w2, b2 = _init_params(k_p)

    params = prepare_params(w1, b1, w2, b2)   # one-time cast, outside forward
    out = xray2model_forward(x, *params)
    out = jax.block_until_ready(out)
    assert out.shape == (B, OUT_C, H, W), out.shape

    # full-precision reference in plain JAX (tolerance loosened for bf16 weights/acts)
    ref = jnp.maximum(x.reshape(B, -1) @ w1 + b1, 0.0) @ w2 + b2
    ref = ref.reshape(B, OUT_C, H, W)
    assert jnp.allclose(out, ref, atol=5e-2, rtol=5e-2)

    # bf16-consistent reference (same quantization as the kernel) -> tight check
    x_bf = x.reshape(B, -1).astype(jnp.bfloat16)
    h_ref = jnp.maximum(
        jnp.dot(x_bf, w1.astype(jnp.bfloat16),
                preferred_element_type=jnp.float32) + b1, 0.0).astype(jnp.bfloat16)
    ref_bf = jnp.dot(h_ref, w2.astype(jnp.bfloat16),
                     preferred_element_type=jnp.float32) + b2
    assert jnp.allclose(out.reshape(B, -1), ref_bf, atol=1e-2, rtol=1e-2)

    print("KERNEL_OK")
</pallas_src>

<mosaic_0001>
module attributes {stable_mosaic.version = 11 : i64} {
  func.func @_fused_kernel(%arg0: i32, %arg1: memref<8x256xbf16, #tpu.memory_space<vmem>>, %arg2: memref<256x256xbf16, #tpu.memory_space<vmem>>, %arg3: memref<1x256xf32, #tpu.memory_space<vmem>>, %arg4: memref<256x4096xbf16, #tpu.memory_space<vmem>>, %arg5: memref<1x4096xf32, #tpu.memory_space<vmem>>, %arg6: memref<8x4096xf32, #tpu.memory_space<vmem>>) attributes {dimension_semantics = [#tpu.dimension_semantics<parallel>], iteration_bounds = array<i64: 2>, scalar_prefetch = 0 : i64, scratch_operands = 0 : i64, tpu.core_type = #tpu.core_type<tc>, window_params = [{pipeline_mode = #tpu.pipeline_mode<synchronous>, transform_indices = @transform_0, window_bounds = array<i64: 8, 256>}, {pipeline_mode = #tpu.pipeline_mode<synchronous>, transform_indices = @transform_1, window_bounds = array<i64: 256, 256>}, {pipeline_mode = #tpu.pipeline_mode<synchronous>, transform_indices = @transform_2, window_bounds = array<i64: 1, 256>}, {transform_indices = @transform_3, window_bounds = array<i64: 256, 4096>}, {transform_indices = @transform_4, window_bounds = array<i64: 1, 4096>}, {transform_indices = @transform_5, window_bounds = array<i64: 8, 4096>}]} {
    %c0 = arith.constant 0 : index
    %c0_0 = arith.constant 0 : index
    %0 = vector.load %arg1[%c0, %c0_0] : memref<8x256xbf16, #tpu.memory_space<vmem>>, vector<8x256xbf16>
    %c0_1 = arith.constant 0 : index
    %c0_2 = arith.constant 0 : index
    %1 = vector.load %arg2[%c0_1, %c0_2] : memref<256x256xbf16, #tpu.memory_space<vmem>>, vector<256x256xbf16>
    %cst = arith.constant dense<0.000000e+00> : vector<8x256xf32>
    %2 = tpu.matmul %0, %1, %cst {dimension_numbers = #tpu.dot_dimension_numbers<[1], [0], [0], [1], [0, 0, 1, 1], [], []>} : vector<8x256xbf16>, vector<256x256xbf16>, vector<8x256xf32> -> vector<8x256xf32>
    %c0_3 = arith.constant 0 : index
    %c0_4 = arith.constant 0 : index
    %3 = vector.load %arg3[%c0_3, %c0_4] : memref<1x256xf32, #tpu.memory_space<vmem>>, vector<1x256xf32>
    %4 = vector.broadcast %3 : vector<1x256xf32> to vector<8x256xf32>
    %5 = arith.addf %2, %4 : vector<8x256xf32>
    %cst_5 = arith.constant 0.000000e+00 : f32
    %6 = vector.broadcast %cst_5 : f32 to vector<8x256xf32>
    %7 = arith.maximumf %5, %6 : vector<8x256xf32>
    %8 = arith.truncf %7 : vector<8x256xf32> to vector<8x256xbf16>
    %c0_6 = arith.constant 0 : index
    %c0_7 = arith.constant 0 : index
    %9 = vector.load %arg4[%c0_6, %c0_7] : memref<256x4096xbf16, #tpu.memory_space<vmem>>, vector<256x4096xbf16>
    %cst_8 = arith.constant dense<0.000000e+00> : vector<8x4096xf32>
    %10 = tpu.matmul %8, %9, %cst_8 {dimension_numbers = #tpu.dot_dimension_numbers<[1], [0], [0], [1], [0, 0, 1, 1], [], []>} : vector<8x256xbf16>, vector<256x4096xbf16>, vector<8x4096xf32> -> vector<8x4096xf32>
    %c0_9 = arith.constant 0 : index
    %c0_10 = arith.constant 0 : index
    %11 = vector.load %arg5[%c0_9, %c0_10] : memref<1x4096xf32, #tpu.memory_space<vmem>>, vector<1x4096xf32>
    %12 = vector.broadcast %11 : vector<1x4096xf32> to vector<8x4096xf32>
    %13 = arith.addf %10, %12 : vector<8x4096xf32>
    %c0_11 = arith.constant 0 : index
    %c0_12 = arith.constant 0 : index
    %14 = vector.load %arg6[%c0_11, %c0_12] : memref<8x4096xf32, #tpu.memory_space<vmem>>, vector<8x4096xf32>
    tpu.vector_store %arg6[%c0_11, %c0_12], %13 {strides = array<i32>} : memref<8x4096xf32, #tpu.memory_space<vmem>>, vector<8x4096xf32>,
    return
  }
  func.func @transform_0(%arg0: i32) -> (i32, i32) {
    %c0_i32 = arith.constant 0 : i32
    %c0_i32_0 = arith.constant 0 : i32
    %c0_i32_1 = arith.constant 0 : i32
    return %c0_i32, %c0_i32_0 : i32, i32
  }
  func.func @transform_1(%arg0: i32) -> (i32, i32) {
    %c0_i32 = arith.constant 0 : i32
    %c0_i32_0 = arith.constant 0 : i32
    %c0_i32_1 = arith.constant 0 : i32
    return %c0_i32, %c0_i32_0 : i32, i32
  }
  func.func @transform_2(%arg0: i32) -> (i32, i32) {
    %c0_i32 = arith.constant 0 : i32
    %c0_i32_0 = arith.constant 0 : i32
    %c0_i32_1 = arith.constant 0 : i32
    return %c0_i32, %c0_i32_0 : i32, i32
  }
  func.func @transform_3(%arg0: i32) -> (i32, i32) {
    %c0_i32 = arith.constant 0 : i32
    %c0_i32_0 = arith.constant 0 : i32
    return %c0_i32, %arg0 : i32, i32
  }
  func.func @transform_4(%arg0: i32) -> (i32, i32) {
    %c0_i32 = arith.constant 0 : i32
    %c0_i32_0 = arith.constant 0 : i32
    return %c0_i32, %arg0 : i32, i32
  }
  func.func @transform_5(%arg0: i32) -> (i32, i32) {
    %c0_i32 = arith.constant 0 : i32
    %c0_i32_0 = arith.constant 0 : i32
    return %c0_i32, %arg0 : i32, i32
  }
}

</mosaic_0001>

<bundles_post_ra>
// kernel: xray2model_forward.1
= control target key start
LH: loop header
LB: loop body
LE: loop exit
PB: predicated region body
PF: predicated region fallthrough
CT: control target
= control target key end

     0   :  { %s9042_s0 = inlined_call_operand.vmem [shape: bf16[8,256], index: 0, kind: input, shape index: {}]   ;;  %s9043_s1 = inlined_call_operand.hbm [shape: bf16[256,256], index: 1, kind: input, shape index: {}]   ;;  %s9044_s2 = inlined_call_operand.hbm [shape: f32[1,256], index: 2, kind: input, shape index: {}]   ;;  %s9045_s3 = inlined_call_operand.hbm [shape: bf16[256,8192], index: 3, kind: input, shape index: {}]   ;;  %s9046_s4 = inlined_call_operand.hbm [shape: f32[1,8192], index: 4, kind: input, shape index: {}]   ;;  %s9047_s5 = inlined_call_operand.vmem [shape: f32[8,8192], index: 5, kind: output, shape index: {}]  }
   0x1   :  { %9048 = sst [smem:[#allocation12_spill]] %s9043_s1 }
   0x2   :  { %9049 = sst [smem:[#allocation13_spill]] %s9045_s3 }
   0x3   :  { %10 = vsyncpa [#allocation3], 0 }
   0x4   :  { %11 = vsyncpa [#allocation5], 0  ;;  %s7701_s18 = smov 0   ;;  %s7703_s19 = smov 0  }
   0x5   :  { %s7705_s20 = smov 0   ;;  %s7707_s21 = smov 0  }
   0x6 LB: > { %s7720_s22 = sadd.s32 4294967295, %s7663_s21   ;;  %s7723_s23 = sadd.s32 1, %s7663_s21   ;;  %s7663_s21 = sphi %s7707_s21, %s9063_s21   ;;  %s7659_s20 = sphi %s7705_s20, %s9062_s20   ;;  %s7655_s19 = sphi %s7703_s19, %s9061_s19   ;;  %s7651_s18 = sphi %s7701_s18, %s9060_s18  }
   0x7   : > { %s84_s24 = ssub.s32 %s7663_s21, %s7723_s23  ;;  %s87_s25 = sadd.s32 1, %s7659_s20 }
   0x8   : > { %p85_p0 = scmp.eq.s32.totalorder %s84_s24, 0  ;;  %p94_p1 = scmp.ne.s32.totalorder %s7659_s20, %s7655_s19 }
   0x9   : > { %p95_p2 = scmp.eq.s32.totalorder %s7663_s21, 0  ;;  %p100_p3 = scmp.ne.s32.totalorder %s7655_s19, %s7651_s18 }
   0xa   : > { %s7733_s26 = scalar_select %p85_p0, %s7659_s20, %s87_s25  }
   0xb   : > { %p7735_p4 = por %p95_p2, %p94_p1  ;;  %p101_p5 = scmp.eq.s32.totalorder %s7720_s22, 0 }
   0xc   : > { %9050 = sst [smem:[#allocation11_spill]] %s7733_s26  ;;  %p4693_p6 = scmp.ge.s32.totalorder %s7663_s21, 1 }
   0xd   : > { %p163_p7 = scmp.lt.s32.totalorder %s7663_s21, 3  ;;  %p7744_p8 = por %p101_p5, %p100_p3 }
   0xe   : > { %s9054_s1 = sld [smem:[#allocation12_spill]]  ;;  %s7665_s8 = smov [#allocation2]  }
   0xf   : > { %p7748_p9 = pnand %p4693_p6, %p163_p7  ;;  %s179_s9 = sshll.u32 %s7665_s8, 4  ;;  %s180_s9 = int_to_ptr.vmem [resolvable:$true] %s179_s9 }
  0x10   : > { %p7460_p12 = scmp.lt.s32.totalorder %s7663_s21, 2  ;;  %s205_s11 = sand.u32 1, %s7663_s21  }
  0x11   : > { %p7444_p10 = pneg %p7748_p9  ;;  %s7666_s12 = smov 128  }
  0x12   : > { %s7667_s13 = smov 8   ;;  %p7771_p13 = pnand %p7460_p12, %p7735_p4 }
  0x13   : > { %p7759_p11 = pnand %p7444_p10, %p101_p5  ;;  %s207_s15 = sand.u32 1, %s7659_s20  }
  0x14   : > { %s177_s7 = sshll.u32 %s9054_s1, 4  ;;  %s6887_s16 = sshll.u32 %s7663_s21, 7  ;;  %s178_s7 = int_to_ptr.hbm [resolvable:$true] %s177_s7 }
  0x15   : > { %7447 = dma.hbm_to_vmem [thread:$0]  (!%p7759_p11), %s178_s7, 4096, %s180_s9, [#allocation3], %s7666_s12, %s7666_s12, %s7667_s13  }
  0x16   : > { %s4697_s17 = sshll.u32 %s207_s15, 12  ;;  %s9057_s3 = sld [smem:[#allocation13_spill]] }
  0x17   : > { %s209_s6 = scalar_lea.vmem [#allocation6], %s4697_s17  ;;  %s7782_s27 = scalar_lea.sflag [#allocation3], %s205_s11 }
  0x18   : > { %s217_s8 = sshll.u32 %s209_s6, 4  ;;  %p7535_p1 = pneg %p7771_p13  ;;  %s218_s8 = int_to_ptr.vmem [resolvable:$true] %s217_s8 }
  0x1c   : > { %s214_s25 = scalar_lea.hbm %s9057_s3, %s6887_s16  ;;  %s7538_s16 = scalar_lea.hbm %s9057_s3, 8192 }
  0x1d   : > { %s215_s30 = sshll.u32 %s214_s25, 4  ;;  %s216_s30 = int_to_ptr.hbm [resolvable:$true] %s215_s30 }
  0x1e   : > { %s7531_s7 = sshra.s32 %s216_s30, 4  ;;  %s7532_s7 = int_to_ptr.hbm [resolvable:$true] %s7531_s7 }
  0x1f   : > { %s7533_s9 = scalar_lea.hbm %s7532_s7, 4096  ;;  %p7539_p4 = scmp.lt.s32.totalorder %s7532_s7, %s9057_s3 }
  0x20   : > { %p7534_p0 = scmp.ne.s32.totalorder %s7532_s7, %s7533_s9  ;;  %p7540_p6 = scmp.lt.s32.totalorder %s7538_s16, %s7533_s9 }
  0x22   : > { %p7536_p2 = pnand %p7535_p1, %p7534_p0  ;;  %p7541_p7 = por %p7540_p6, %p7539_p4 }
  0x24   : > { %p7537_p3 = pneg %p7536_p2 }
  0x26   : > { %p7542_p10 = pnand %p7541_p7, %p7537_p3 }
  0x28   : > { %7545 = shalt.err (!%p7542_p10)
}
  0x29   : > { %s7668_s11 = smov 4096   ;;  %s7669_s25 = smov 2048  }
  0x2a   : > { %7454 = dma.hbm_to_vmem [thread:$0]  (!%p7771_p13), %s216_s30, 65536, %s218_s8, %s7782_s27, %s7668_s11, %s7669_s25, %s7666_s12  }
  0x2b   : > { %s192_s18 = sshll.u32 %s9044_s2, 4  ;;  %s7670_s7 = smov [#allocation4]   ;;  %s193_s18 = int_to_ptr.hbm [resolvable:$true] %s192_s18 }
  0x2c   : > { %s194_s9 = sshll.u32 %s7670_s7, 4  ;;  %s4700_s16 = sshll.u32 %s207_s15, 5  ;;  %s195_s9 = int_to_ptr.vmem [resolvable:$true] %s194_s9 }
  0x2d   : > { %7450 = dma.hbm_to_vmem [thread:$0]  (!%p7759_p11), %s193_s18, 32, %s195_s9, [#allocation5]  }
  0x2e   : > { %s4701_s17 = sshll.u32 %s7663_s21, 5  ;;  %s231_s26 = scalar_lea.vmem [#allocation7], %s4700_s16 }
  0x2f   : > { %s235_s3 = scalar_lea.hbm %s9046_s4, %s4701_s17  ;;  %s239_s12 = sshll.u32 %s231_s26, 4  ;;  %s240_s12 = int_to_ptr.vmem [resolvable:$true] %s239_s12 }
  0x30   : > { %s237_s30 = sshll.u32 %s235_s3, 4  ;;  %s7598_s21 = scalar_lea.hbm %s9046_s4, 64  ;;  %s238_s30 = int_to_ptr.hbm [resolvable:$true] %s237_s30 }
  0x31   : > { %s7591_s8 = sshra.s32 %s238_s30, 4  ;;  %s7592_s8 = int_to_ptr.hbm [resolvable:$true] %s7591_s8 }
  0x32   : > { %s7593_s11 = scalar_lea.hbm %s7592_s8, 32  ;;  %p7599_p11 = scmp.lt.s32.totalorder %s7592_s8, %s9046_s4 }
  0x33   : > { %p7594_p12 = scmp.ne.s32.totalorder %s7592_s8, %s7593_s11  ;;  %p7600_p3 = scmp.lt.s32.totalorder %s7598_s21, %s7593_s11 }
  0x35   : > { %p7596_p0 = pnand %p7594_p12, %p7535_p1  ;;  %p7601_p4 = por %p7600_p3, %p7599_p11 }
  0x37   : > { %p7597_p2 = pneg %p7596_p0 }
  0x39   : > { %p7602_p6 = pnand %p7601_p4, %p7597_p2 }
  0x3b   : > { %7605 = shalt.err (!%p7602_p6)
}
  0x3c   : > { %7457 = dma.hbm_to_vmem [thread:$0]  (!%p7771_p13), %s238_s30, 512, %s240_s12, %s7782_s27  }
  0x3d   : > { %248 = sbr.rel (%p7748_p9) target bundleno = 837 (0x345), region = 40 }
  0x42   : > { %7638 = dma.done.wait (%p101_p5), [#allocation3], 4096  }
  0x43   : > { %7640 = vsyncadd (%p101_p5), [#allocation3], 4294963200 }
  0x44   : > { %7642 = dma.done.wait (%p101_p5), [#allocation5], 32  }
  0x45   : > { %7644 = vsyncadd (%p101_p5), [#allocation5], 4294967264  ;;  %s260_s3 = sand.u32 1, %s7720_s22   ;;  %s262_s26 = sand.u32 1, %s7655_s19  }
  0x46   : > { %s4705_s29 = sshll.u32 %s262_s26, 12  ;;  %s261_s14 = scalar_lea.sflag [#allocation3], %s260_s3 }
  0x47   : > { %s7836_s27 = scalar_lea.vmem [#allocation6], %s4705_s29 }
  0x48   : > { %7646 = dma.done.wait (%p7744_p8), %s261_s14, 66048  }
  0x49   : > { %7648 = vsyncadd (%p7744_p8), %s261_s14, 4294901248  ;;  %v4767_v0 = vld [vmem:[#allocation2 + $0x70] sm:$0xf]  ;;  %v6903_v1 = vld [vmem:[#allocation2 + $0x74] sm:$0xf0]  ;;  %s8243_s13 = sshll.u32 %s262_s26, 5 }
  0x4a   : > { %v4831_v2 = vld [vmem:[#allocation2 + $0xf0] sm:$0xf]  ;;  %v4768_v3 = vor.u32 %v6903_v1, %v4767_v0  ;;  %v6919_v4 = vld [vmem:[#allocation2 + $0xf4] sm:$0xf0]  ;;  %v6902_v5 = vld [vmem:[#allocation2 + $0x74] sm:$0xf] }
  0x4b   : > { %v4769_v6 = vld [vmem:[#allocation2 + $0x78] sm:$0xf0]  ;;  %v4832_v7 = vor.u32 %v6919_v4, %v4831_v2  ;;  %v6918_v9 = vld [vmem:[#allocation2 + $0xf4] sm:$0xf]  ;;  %v4759_v11 = vld [vmem:[#allocation2 + $0x60] sm:$0xf] }
  0x4c   : > { %v4772_v8 = vor.u32 %v6902_v5, %v4769_v6  ;;  %v4833_v10 = vld [vmem:[#allocation2 + $0xf8] sm:$0xf0]  ;;  %521 = vmatpush.bf16.msra.mxu0 %v4768_v3  ;;  %v6901_v13 = vld [vmem:[#allocation2 + $0x64] sm:$0xf0]  ;;  %v4823_v14 = vld [vmem:[#allocation2 + $0xe0] sm:$0xf] }
  0x4d   : > { %v4836_v12 = vor.u32 %v6918_v9, %v4833_v10  ;;  %v6917_v15 = vld [vmem:[#allocation2 + $0xe4] sm:$0xf0]  ;;  %534 = vmatpush.bf16.msra.mxu1 %v4832_v7  ;;  %v4760_v16 = vor.u32 %v6901_v13, %v4759_v11  ;;  %v6900_v18 = vld [vmem:[#allocation2 + $0x64] sm:$0xf]  ;;  %v4761_v19 = vld [vmem:[#allocation2 + $0x68] sm:$0xf0] }
  0x4e   : > { %547 = vmatpush.bf16.msra.mxu2 %v4772_v8  ;;  %v4824_v17 = vor.u32 %v6917_v15, %v4823_v14  ;;  %v6916_v20 = vld [vmem:[#allocation2 + $0xe4] sm:$0xf]  ;;  %v4764_v21 = vor.u32 %v6900_v18, %v4761_v19  ;;  %v4825_v22 = vld [vmem:[#allocation2 + $0xe8] sm:$0xf0]  ;;  %v4751_v23 = vld [vmem:[#allocation2 + $0x50] sm:$0xf] }
  0x4f   : > { %560 = vmatpush.bf16.msra.mxu3 %v4836_v12  ;;  %v6899_v24 = vld [vmem:[#allocation2 + $0x54] sm:$0xf0]  ;;  %v4828_v25 = vor.u32 %v6916_v20, %v4825_v22  ;;  %v4815_v26 = vld [vmem:[#allocation2 + $0xd0] sm:$0xf]  ;;  %v6898_v28 = vld [vmem:[#allocation2 + $0x54] sm:$0xf] }
  0x50   : > { %v6915_v27 = vld [vmem:[#allocation2 + $0xd4] sm:$0xf0]  ;;  %522 = vmatpush.bf16.msra.mxu0 %v4760_v16  ;;  %v4752_v29 = vor.u32 %v6899_v24, %v4751_v23  ;;  %v4753_v30 = vld [vmem:[#allocation2 + $0x58] sm:$0xf0]  ;;  %v6914_v31 = vld [vmem:[#allocation2 + $0xd4] sm:$0xf] }
  0x51   : > { %v4817_v32 = vld [vmem:[#allocation2 + $0xd8] sm:$0xf0]  ;;  %535 = vmatpush.bf16.msra.mxu1 %v4824_v17  ;;  %v4816_v33 = vor.u32 %v6915_v27, %v4815_v26  ;;  %v4756_v34 = vor.u32 %v6898_v28, %v4753_v30  ;;  %v4743_v35 = vld [vmem:[#allocation2 + $0x40] sm:$0xf]  ;;  %v6897_v36 = vld [vmem:[#allocation2 + $0x44] sm:$0xf0] }
  0x52   : > { %548 = vmatpush.bf16.msra.mxu2 %v4764_v21  ;;  %v4807_v37 = vld [vmem:[#allocation2 + $0xc0] sm:$0xf]  ;;  %v4820_v38 = vor.u32 %v6914_v31, %v4817_v32  ;;  %v6913_v39 = vld [vmem:[#allocation2 + $0xc4] sm:$0xf0]  ;;  %v6896_v40 = vld [vmem:[#allocation2 + $0x44] sm:$0xf]  ;;  %v4744_v44 = vor.u32 %v6897_v36, %v4743_v35 }
  0x53   : > { %561 = vmatpush.bf16.msra.mxu3 %v4828_v25  ;;  %v4745_v41 = vld [vmem:[#allocation2 + $0x48] sm:$0xf0]  ;;  %v6912_v42 = vld [vmem:[#allocation2 + $0xc4] sm:$0xf]  ;;  %v4808_v45 = vor.u32 %v6913_v39, %v4807_v37  ;;  %v4735_v47 = vld [vmem:[#allocation2 + $0x30] sm:$0xf] }
  0x54   : > { %v4809_v43 = vld [vmem:[#allocation2 + $0xc8] sm:$0xf0]  ;;  %523 = vmatpush.bf16.msra.mxu0 %v4752_v29  ;;  %v4748_v46 = vor.u32 %v6896_v40, %v4745_v41  ;;  %v6895_v48 = vld [vmem:[#allocation2 + $0x34] sm:$0xf0]  ;;  %v4799_v49 = vld [vmem:[#allocation2 + $0xb0] sm:$0xf] }
  0x55   : > { %536 = vmatpush.bf16.msra.mxu1 %v4816_v33  ;;  %v4812_v50 = vor.u32 %v6912_v42, %v4809_v43  ;;  %v6911_v51 = vld [vmem:[#allocation2 + $0xb4] sm:$0xf0]  ;;  %v6894_v52 = vld [vmem:[#allocation2 + $0x34] sm:$0xf]  ;;  %v4737_v53 = vld [vmem:[#allocation2 + $0x38] sm:$0xf0]  ;;  %v4736_v56 = vor.u32 %v6895_v48, %v4735_v47 }
  0x56   : > { %549 = vmatpush.bf16.msra.mxu2 %v4756_v34  ;;  %v6910_v54 = vld [vmem:[#allocation2 + $0xb4] sm:$0xf]  ;;  %v4801_v55 = vld [vmem:[#allocation2 + $0xb8] sm:$0xf0]  ;;  %v4800_v57 = vor.u32 %v6911_v51, %v4799_v49  ;;  %v4740_v58 = vor.u32 %v6894_v52, %v4737_v53  ;;  %v4727_v59 = vld [vmem:[#allocation2 + $0x20] sm:$0xf] }
  0x57   : > { %562 = vmatpush.bf16.msra.mxu3 %v4820_v38  ;;  %v6893_v60 = vld [vmem:[#allocation2 + $0x24] sm:$0xf0]  ;;  %v4791_v61 = vld [vmem:[#allocation2 + $0xa0] sm:$0xf]  ;;  %v4804_v62 = vor.u32 %v6910_v54, %v4801_v55  ;;  %v6892_v0 = vld [vmem:[#allocation2 + $0x24] sm:$0xf] }
  0x58   : > { %524 = vmatpush.bf16.msra.mxu0 %v4744_v44  ;;  %v6909_v63 = vld [vmem:[#allocation2 + $0xa4] sm:$0xf0]  ;;  %v4729_v1 = vld [vmem:[#allocation2 + $0x28] sm:$0xf0]  ;;  %v6908_v2 = vld [vmem:[#allocation2 + $0xa4] sm:$0xf]  ;;  %v4728_v4 = vor.u32 %v6893_v60, %v4727_v59 }
  0x59   : > { %537 = vmatpush.bf16.msra.mxu1 %v4808_v45  ;;  %v4793_v3 = vld [vmem:[#allocation2 + $0xa8] sm:$0xf0]  ;;  %v4792_v5 = vor.u32 %v6909_v63, %v4791_v61  ;;  %v4732_v6 = vor.u32 %v6892_v0, %v4729_v1  ;;  %v4719_v7 = vld [vmem:[#allocation2 + $0x10] sm:$0xf]  ;;  %v6891_v8 = vld [vmem:[#allocation2 + $0x14] sm:$0xf0] }
  0x5a   : > { %550 = vmatpush.bf16.msra.mxu2 %v4748_v46  ;;  %v4783_v9 = vld [vmem:[#allocation2 + $0x90] sm:$0xf]  ;;  %v4796_v10 = vor.u32 %v6908_v2, %v4793_v3  ;;  %v6907_v11 = vld [vmem:[#allocation2 + $0x94] sm:$0xf0]  ;;  %v6890_v12 = vld [vmem:[#allocation2 + $0x14] sm:$0xf]  ;;  %v4720_v16 = vor.u32 %v6891_v8, %v4719_v7 }
  0x5b   : > { %563 = vmatpush.bf16.msra.mxu3 %v4812_v50  ;;  %v4721_v13 = vld [vmem:[#allocation2 + $0x18] sm:$0xf0]  ;;  %v6906_v14 = vld [vmem:[#allocation2 + $0x94] sm:$0xf]  ;;  %v4711_v17 = vld [vmem:[#allocation2] sm:$0xf]  ;;  %v4784_v19 = vor.u32 %v6907_v11, %v4783_v9 }
  0x5c   : > { %525 = vmatpush.bf16.msra.mxu0 %v4736_v56  ;;  %v4785_v15 = vld [vmem:[#allocation2 + $0x98] sm:$0xf0]  ;;  %v315_v18 = vld [vmem:[%s9042_s0] sm:$0xff]  ;;  %v4724_v20 = vor.u32 %v6890_v12, %v4721_v13  ;;  %v6889_v21 = vld [vmem:[#allocation2 + $0x4] sm:$0xf0]  ;;  %s4707_s18 = sshll.u32 %s7720_s22, 5 }
  0x5d   : > { %538 = vmatpush.bf16.msra.mxu1 %v4800_v57  ;;  %v4775_v22 = vld [vmem:[#allocation2 + $0x80] sm:$0xf]  ;;  %v6905_v23 = vld [vmem:[#allocation2 + $0x84] sm:$0xf0]  ;;  %v4788_v24 = vor.u32 %v6906_v14, %v4785_v15  ;;  %v6888_v25 = vld [vmem:[#allocation2 + $0x4] sm:$0xf]  ;;  %v355_v29 = vunpack.c.l.b16 %v315_v18  ;;  %v4712_v32 = vor.u32 %v6889_v21, %v4711_v17  ;;  %v356_v33 = vunpack.c.h.b16 %v315_v18 }
  0x5e   : > { %551 = vmatpush.bf16.msra.mxu2 %v4740_v58  ;;  %v4713_v26 = vld [vmem:[#allocation2 + $0x8] sm:$0xf0]  ;;  %v6904_v27 = vld [vmem:[#allocation2 + $0x84] sm:$0xf]  ;;  %v4776_v36 = vor.u32 %v6905_v23, %v4775_v22  ;;  %p8272_p5 = scmp.lt.s32.totalorder %s4707_s18, 63  ;;  %s8283_s9 = scalar_lea.vmem [#allocation7], %s8243_s13 }
  0x5f   : > { %564 = vmatpush.bf16.msra.mxu3 %v4804_v62  ;;  %v4777_v28 = vld [vmem:[#allocation2 + $0x88] sm:$0xf0]  ;;  %v5735_v30 = vld [vmem:[%s7836_s27 + $0x700] sm:$0xf]  ;;  %v7144_v34 = vld [vmem:[%s7836_s27 + $0x704] sm:$0xf]  ;;  %v4716_v37 = vor.u32 %v6888_v25, %v4713_v26  ;;  %v357_v43 = vpack.c.b16 %v355_v29, %v355_v29  ;;  %v358_v48 = vpack.c.b16 %v356_v33, %v356_v33 }
  0x60   : > { %526 = vmatpush.bf16.msra.mxu0 %v4728_v4  ;;  %v7160_v31 = vld [vmem:[%s7836_s27 + $0x77c] sm:$0xf0]  ;;  %v5737_v35 = vld [vmem:[%s7836_s27 + $0x780] sm:$0xf0]  ;;  %v4780_v38 = vor.u32 %v6904_v27, %v4777_v28  ;;  %s9065_s18 = smov (!%p8272_p5, %s4707_s18), 63 }
  0x61   : > { %539 = vmatpush.bf16.msra.mxu1 %v4792_v5  ;;  %v5736_v39 = vor.u32 %v7160_v31, %v5735_v30  ;;  %v5607_v40 = vld [vmem:[%s7836_s27 + $0x600] sm:$0xf]  ;;  %v5740_v44 = vor.u32 %v7144_v34, %v5737_v35  ;;  %v7400_v46 = vld [vmem:[%s7836_s27 + $0xf04] sm:$0xf]  ;;  %s4708_s22 = sshll.u32 %s9065_s18, 3 }
  0x62   : > { %552 = vmatpush.bf16.msra.mxu2 %v4732_v6  ;;  %v6759_v41 = vld [vmem:[%s7836_s27 + $0xf00] sm:$0xf]  ;;  %v6761_v47 = vld [vmem:[%s7836_s27 + $0xf80] sm:$0xf0]  ;;  %s8322_s24 = scalar_lea.vmem %s9047_s5, %s4708_s22 }
  0x63   : > { %565 = vmatpush.bf16.msra.mxu3 %v4796_v10  ;;  %v7416_v42 = vld [vmem:[%s7836_s27 + $0xf7c] sm:$0xf0]  ;;  %v7112_v49 = vld [vmem:[%s7836_s27 + $0x604] sm:$0xf]  ;;  %v6764_v53 = vor.u32 %v7400_v46, %v6761_v47 }
  0x64   : > { %527 = vmatpush.bf16.msra.mxu0 %v4720_v16  ;;  %v7128_v45 = vld [vmem:[%s7836_s27 + $0x67c] sm:$0xf0]  ;;  %v5609_v50 = vld [vmem:[%s7836_s27 + $0x680] sm:$0xf0]  ;;  %v6760_v51 = vor.u32 %v7416_v42, %v6759_v41 }
  0x65   : > { %540 = vmatpush.bf16.msra.mxu1 %v4784_v19  ;;  %v5608_v52 = vor.u32 %v7128_v45, %v5607_v40  ;;  %v5479_v54 = vld [vmem:[%s7836_s27 + $0x500] sm:$0xf]  ;;  %v5612_v57 = vor.u32 %v7112_v49, %v5609_v50  ;;  %v7368_v59 = vld [vmem:[%s7836_s27 + $0xe04] sm:$0xf] }
  0x66   : > { %553 = vmatpush.bf16.msra.mxu2 %v4724_v20  ;;  %v6631_v55 = vld [vmem:[%s7836_s27 + $0xe00] sm:$0xf]  ;;  %v6633_v60 = vld [vmem:[%s7836_s27 + $0xe80] sm:$0xf0] }
  0x67   : > { %566 = vmatpush.bf16.msra.mxu3 %v4788_v24  ;;  %v7384_v56 = vld [vmem:[%s7836_s27 + $0xe7c] sm:$0xf0]  ;;  %v7080_v61 = vld [vmem:[%s7836_s27 + $0x504] sm:$0xf]  ;;  %v6636_v1 = vor.u32 %v7368_v59, %v6633_v60  ;;  %v5743_v59 = vld [vmem:[%s7836_s27 + $0x708] sm:$0xf] }
  0x68   : > { %528 = vmatpush.bf16.msra.mxu0 %v4712_v32  ;;  %v7096_v58 = vld [vmem:[%s7836_s27 + $0x57c] sm:$0xf0]  ;;  %v5481_v62 = vld [vmem:[%s7836_s27 + $0x580] sm:$0xf0]  ;;  %v6632_v63 = vor.u32 %v7384_v56, %v6631_v55  ;;  %v7161_v60 = vld [vmem:[%s7836_s27 + $0x784] sm:$0xf0] }
  0x69   : > { %541 = vmatpush.bf16.msra.mxu1 %v4776_v36  ;;  %v5480_v0 = vor.u32 %v7096_v58, %v5479_v54  ;;  %v5351_v2 = vld [vmem:[%s7836_s27 + $0x400] sm:$0xf]  ;;  %v5484_v5 = vor.u32 %v7080_v61, %v5481_v62  ;;  %v7336_v7 = vld [vmem:[%s7836_s27 + $0xd04] sm:$0xf]  ;;  %v7145_v61 = vld [vmem:[%s7836_s27 + $0x70c] sm:$0xf] }
  0x6a   : > { %554 = vmatpush.bf16.msra.mxu2 %v4716_v37  ;;  %v6503_v3 = vld [vmem:[%s7836_s27 + $0xd00] sm:$0xf]  ;;  %v6505_v8 = vld [vmem:[%s7836_s27 + $0xd80] sm:$0xf0]  ;;  %v5745_v62 = vld [vmem:[%s7836_s27 + $0x788] sm:$0xf0] }
  0x6b   : > { %567 = vmatpush.bf16.msra.mxu3 %v4780_v38  ;;  %529 = vmatmul.bf16.vlgmr.msra.gmra.mxu0 %v357_v43  ;;  %v7352_v4 = vld [vmem:[%s7836_s27 + $0xd7c] sm:$0xf0]  ;;  %v7048_v9 = vld [vmem:[%s7836_s27 + $0x404] sm:$0xf]  ;;  %v6508_v13 = vor.u32 %v7336_v7, %v6505_v8  ;;  %v5744_v7 = vor.u32 %v7161_v60, %v5743_v59  ;;  %v5103_v59 = vld [vmem:[%s7836_s27 + $0x208] sm:$0xf] }
  0x6c   : > { %3721 = vmatpush.bf16.msrb.mxu0 %v5736_v39  ;;  %542 = vmatmul.bf16.vlgmr.msra.gmra.mxu1 %v358_v48  ;;  %v7064_v6 = vld [vmem:[%s7836_s27 + $0x47c] sm:$0xf0]  ;;  %v5353_v10 = vld [vmem:[%s7836_s27 + $0x480] sm:$0xf0]  ;;  %v6504_v11 = vor.u32 %v7352_v4, %v6503_v3  ;;  %v7001_v60 = vld [vmem:[%s7836_s27 + $0x284] sm:$0xf0] }
  0x6d   : > { %555 = vmatmul.bf16.vlgmr.msra.gmra.mxu2 %v357_v43  ;;  %3734 = vmatpush.bf16.msrb.mxu1 %v6760_v51  ;;  %v5352_v12 = vor.u32 %v7064_v6, %v5351_v2  ;;  %v5223_v14 = vld [vmem:[%s7836_s27 + $0x300] sm:$0xf]  ;;  %v5356_v17 = vor.u32 %v7048_v9, %v5353_v10  ;;  %v7304_v19 = vld [vmem:[%s7836_s27 + $0xc04] sm:$0xf]  ;;  %v5615_v2 = vld [vmem:[%s7836_s27 + $0x608] sm:$0xf] }
  0x6e   : > { %3747 = vmatpush.bf16.msrb.mxu2 %v5740_v44  ;;  %568 = vmatmul.bf16.vlgmr.msra.gmra.mxu3 %v358_v48  ;;  %v6375_v15 = vld [vmem:[%s7836_s27 + $0xc00] sm:$0xf]  ;;  %v6377_v20 = vld [vmem:[%s7836_s27 + $0xc80] sm:$0xf0]  ;;  %v6767_v9 = vld [vmem:[%s7836_s27 + $0xf08] sm:$0xf] }
  0x6f   : > { %3760 = vmatpush.bf16.msrb.mxu3 %v6764_v53  ;;  %v7320_v16 = vld [vmem:[%s7836_s27 + $0xc7c] sm:$0xf0]  ;;  %v7016_v21 = vld [vmem:[%s7836_s27 + $0x304] sm:$0xf]  ;;  %v6380_v25 = vor.u32 %v7304_v19, %v6377_v20  ;;  %v7417_v10 = vld [vmem:[%s7836_s27 + $0xf84] sm:$0xf0] }
  0x70   : > { %3722 = vmatpush.bf16.msrb.mxu0 %v5608_v52  ;;  %v7032_v18 = vld [vmem:[%s7836_s27 + $0x37c] sm:$0xf0]  ;;  %v5225_v22 = vld [vmem:[%s7836_s27 + $0x380] sm:$0xf0]  ;;  %v6376_v23 = vor.u32 %v7320_v16, %v6375_v15  ;;  %v7113_v15 = vld [vmem:[%s7836_s27 + $0x60c] sm:$0xf]  ;;  %v6768_v19 = vor.u32 %v7417_v10, %v6767_v9 }
  0x71   : > { %3735 = vmatpush.bf16.msrb.mxu1 %v6632_v63  ;;  %v5224_v24 = vor.u32 %v7032_v18, %v5223_v14  ;;  %v5095_v26 = vld [vmem:[%s7836_s27 + $0x200] sm:$0xf]  ;;  %v5228_v29 = vor.u32 %v7016_v21, %v5225_v22  ;;  %v7272_v31 = vld [vmem:[%s7836_s27 + $0xb04] sm:$0xf]  ;;  %v6769_v14 = vld [vmem:[%s7836_s27 + $0xf88] sm:$0xf0] }
  0x72   : > { %3748 = vmatpush.bf16.msrb.mxu2 %v5612_v57  ;;  %v6247_v27 = vld [vmem:[%s7836_s27 + $0xb00] sm:$0xf]  ;;  %v6249_v32 = vld [vmem:[%s7836_s27 + $0xb80] sm:$0xf0]  ;;  %v5617_v16 = vld [vmem:[%s7836_s27 + $0x688] sm:$0xf0] }
  0x73   : > { %3761 = vmatpush.bf16.msrb.mxu3 %v6636_v1  ;;  %v7288_v28 = vld [vmem:[%s7836_s27 + $0xb7c] sm:$0xf0]  ;;  %v6984_v33 = vld [vmem:[%s7836_s27 + $0x204] sm:$0xf]  ;;  %v6252_v37 = vor.u32 %v7272_v31, %v6249_v32  ;;  %v5487_v22 = vld [vmem:[%s7836_s27 + $0x508] sm:$0xf] }
  0x74   : > { %3723 = vmatpush.bf16.msrb.mxu0 %v5480_v0  ;;  %v7000_v30 = vld [vmem:[%s7836_s27 + $0x27c] sm:$0xf0]  ;;  %v5097_v34 = vld [vmem:[%s7836_s27 + $0x280] sm:$0xf0]  ;;  %v6248_v35 = vor.u32 %v7288_v28, %v6247_v27  ;;  %v7369_v27 = vld [vmem:[%s7836_s27 + $0xe0c] sm:$0xf] }
  0x75   : > { %3736 = vmatpush.bf16.msrb.mxu1 %v6504_v11  ;;  %v5096_v36 = vor.u32 %v7000_v30, %v5095_v26  ;;  %v4967_v38 = vld [vmem:[%s7836_s27 + $0x100] sm:$0xf]  ;;  %v5100_v41 = vor.u32 %v6984_v33, %v5097_v34  ;;  %v7240_v43 = vld [vmem:[%s7836_s27 + $0xa04] sm:$0xf]  ;;  %v5748_v11 = vor.u32 %v7145_v61, %v5745_v62  ;;  %v7097_v26 = vld [vmem:[%s7836_s27 + $0x584] sm:$0xf0]  ;;  %v5104_v62 = vor.u32 %v7001_v60, %v5103_v59 }
  0x76   : > { %3749 = vmatpush.bf16.msrb.mxu2 %v5484_v5  ;;  %v6119_v39 = vld [vmem:[%s7836_s27 + $0xa00] sm:$0xf]  ;;  %v6121_v44 = vld [vmem:[%s7836_s27 + $0xa80] sm:$0xf0]  ;;  %v6641_v28 = vld [vmem:[%s7836_s27 + $0xe88] sm:$0xf0]  ;;  %v5488_v32 = vor.u32 %v7097_v26, %v5487_v22 }
  0x77   : > { %3762 = vmatpush.bf16.msrb.mxu3 %v6508_v13  ;;  %v7256_v40 = vld [vmem:[%s7836_s27 + $0xa7c] sm:$0xf0]  ;;  %v6952_v45 = vld [vmem:[%s7836_s27 + $0x104] sm:$0xf]  ;;  %v6124_v50 = vor.u32 %v7240_v43, %v6121_v44  ;;  %v7401_v13 = vld [vmem:[%s7836_s27 + $0xf0c] sm:$0xf]  ;;  %v6644_v33 = vor.u32 %v7369_v27, %v6641_v28 }
  0x78   : > { %3724 = vmatpush.bf16.msrb.mxu0 %v5352_v12  ;;  %v6968_v42 = vld [vmem:[%s7836_s27 + $0x17c] sm:$0xf0]  ;;  %v4969_v46 = vld [vmem:[%s7836_s27 + $0x180] sm:$0xf0]  ;;  %v6120_v47 = vor.u32 %v7256_v40, %v6119_v39  ;;  %v7129_v12 = vld [vmem:[%s7836_s27 + $0x684] sm:$0xf0]  ;;  %v6772_v21 = vor.u32 %v7401_v13, %v6769_v14 }
  0x79   : > { %3737 = vmatpush.bf16.msrb.mxu1 %v6376_v23  ;;  %v4839_v48 = vld [vmem:[%s7836_s27] sm:$0xf]  ;;  %v4968_v49 = vor.u32 %v6968_v42, %v4967_v38  ;;  %v4972_v54 = vor.u32 %v6952_v45, %v4969_v46  ;;  %v6920_v55 = vld [vmem:[%s7836_s27 + $0x4] sm:$0xf]  ;;  %v5616_v20 = vor.u32 %v7129_v12, %v5615_v2  ;;  %v6639_v23 = vld [vmem:[%s7836_s27 + $0xe08] sm:$0xf] }
  0x7a   : > { %3750 = vmatpush.bf16.msrb.mxu2 %v5356_v17  ;;  %v6936_v51 = vld [vmem:[%s7836_s27 + $0x7c] sm:$0xf0]  ;;  %v7208_v56 = vld [vmem:[%s7836_s27 + $0x904] sm:$0xf]  ;;  %v5489_v30 = vld [vmem:[%s7836_s27 + $0x588] sm:$0xf0] }
  0x7b   : > { %3763 = vmatpush.bf16.msrb.mxu3 %v6380_v25  ;;  %v5991_v52 = vld [vmem:[%s7836_s27 + $0x900] sm:$0xf]  ;;  %v5993_v57 = vld [vmem:[%s7836_s27 + $0x980] sm:$0xf0]  ;;  %v4840_v0 = vor.u32 %v6936_v51, %v4839_v48  ;;  %v5620_v25 = vor.u32 %v7113_v15, %v5617_v16  ;;  %v5359_v34 = vld [vmem:[%s7836_s27 + $0x408] sm:$0xf] }
  0x7c   : > { %3725 = vmatpush.bf16.msrb.mxu0 %v5224_v24  ;;  %v7224_v53 = vld [vmem:[%s7836_s27 + $0x97c] sm:$0xf0]  ;;  %v4841_v58 = vld [vmem:[%s7836_s27 + $0x80] sm:$0xf0]  ;;  %v5996_v1 = vor.u32 %v7208_v56, %v5993_v57  ;;  %v7385_v24 = vld [vmem:[%s7836_s27 + $0xe84] sm:$0xf0] }
  0x7d   : > { %3738 = vmatpush.bf16.msrb.mxu1 %v6248_v35  ;;  %v5992_v63 = vor.u32 %v7224_v53, %v5991_v52  ;;  %v5863_v3 = vld [vmem:[%s7836_s27 + $0x800] sm:$0xf]  ;;  %v7176_v5 = vld [vmem:[%s7836_s27 + $0x804] sm:$0xf]  ;;  %v4844_v6 = vor.u32 %v6920_v55, %v4841_v58  ;;  %v6640_v31 = vor.u32 %v7385_v24, %v6639_v23  ;;  %v6511_v35 = vld [vmem:[%s7836_s27 + $0xd08] sm:$0xf] }
  0x7e   : > { %3751 = vmatpush.bf16.msrb.mxu2 %v5228_v29  ;;  %v7192_v4 = vld [vmem:[%s7836_s27 + $0x87c] sm:$0xf0]  ;;  %v5865_v8 = vld [vmem:[%s7836_s27 + $0x880] sm:$0xf0]  ;;  %v7081_v29 = vld [vmem:[%s7836_s27 + $0x50c] sm:$0xf] }
  0x7f   : > { %3764 = vmatpush.bf16.msrb.mxu3 %v6252_v37  ;;  %v5864_v17 = vor.u32 %v7192_v4, %v5863_v3  ;;  %v5868_v18 = vor.u32 %v7176_v5, %v5865_v8  ;;  %v5492_v37 = vor.u32 %v7081_v29, %v5489_v30  ;;  %v7065_v38 = vld [vmem:[%s7836_s27 + $0x484] sm:$0xf0]  ;;  %v7337_v39 = vld [vmem:[%s7836_s27 + $0xd0c] sm:$0xf] }
  0x80   : > { %3726 = vmatpush.bf16.msrb.mxu0 %v5096_v36  ;;  %v7353_v36 = vld [vmem:[%s7836_s27 + $0xd84] sm:$0xf0]  ;;  %v6513_v40 = vld [vmem:[%s7836_s27 + $0xd88] sm:$0xf0]  ;;  %v5360_v44 = vor.u32 %v7065_v38, %v5359_v34 }
  0x81   : > { %3739 = vmatpush.bf16.msrb.mxu1 %v6120_v47  ;;  %v5361_v42 = vld [vmem:[%s7836_s27 + $0x488] sm:$0xf0]  ;;  %v6512_v43 = vor.u32 %v7353_v36, %v6511_v35  ;;  %v6516_v45 = vor.u32 %v7337_v39, %v6513_v40  ;;  %v5231_v46 = vld [vmem:[%s7836_s27 + $0x308] sm:$0xf] }
  0x82   : > { %3752 = vmatpush.bf16.msrb.mxu2 %v5100_v41  ;;  %v7049_v41 = vld [vmem:[%s7836_s27 + $0x40c] sm:$0xf]  ;;  %v6383_v47 = vld [vmem:[%s7836_s27 + $0xc08] sm:$0xf] }
  0x83   : > { %3765 = vmatpush.bf16.msrb.mxu3 %v6124_v50  ;;  %v7321_v48 = vld [vmem:[%s7836_s27 + $0xc84] sm:$0xf0]  ;;  %v7305_v51 = vld [vmem:[%s7836_s27 + $0xc0c] sm:$0xf] }
  0x84   : > { %3727 = vmatpush.bf16.msrb.mxu0 %v4968_v49  ;;  %v5364_v49 = vor.u32 %v7049_v41, %v5361_v42  ;;  %v7033_v50 = vld [vmem:[%s7836_s27 + $0x384] sm:$0xf0]  ;;  %v6385_v52 = vld [vmem:[%s7836_s27 + $0xc88] sm:$0xf0]  ;;  %v6384_v55 = vor.u32 %v7321_v48, %v6383_v47  ;;  %v5751_v42 = vld [vmem:[%s7836_s27 + $0x710] sm:$0xf] }
  0x85   : > { %3740 = vmatpush.bf16.msrb.mxu1 %v5992_v63  ;;  %v7017_v53 = vld [vmem:[%s7836_s27 + $0x30c] sm:$0xf]  ;;  %v5232_v56 = vor.u32 %v7033_v50, %v5231_v46  ;;  %v6388_v57 = vor.u32 %v7305_v51, %v6385_v52  ;;  %v7289_v2 = vld [vmem:[%s7836_s27 + $0xb84] sm:$0xf0]  ;;  %v5753_v46 = vld [vmem:[%s7836_s27 + $0x790] sm:$0xf0] }
  0x86   : > { %3753 = vmatpush.bf16.msrb.mxu2 %v4972_v54  ;;  %v5233_v54 = vld [vmem:[%s7836_s27 + $0x388] sm:$0xf0]  ;;  %v6969_v8 = vld [vmem:[%s7836_s27 + $0x184] sm:$0xf0]  ;;  %v5623_v51 = vld [vmem:[%s7836_s27 + $0x610] sm:$0xf] }
  0x87   : > { %3766 = vmatpush.bf16.msrb.mxu3 %v5996_v1  ;;  %v5236_v58 = vor.u32 %v7017_v53, %v5233_v54  ;;  %v6985_v61 = vld [vmem:[%s7836_s27 + $0x20c] sm:$0xf]  ;;  %v6255_v1 = vld [vmem:[%s7836_s27 + $0xb08] sm:$0xf]  ;;  %v7130_v54 = vld [vmem:[%s7836_s27 + $0x68c] sm:$0xf0] }
  0x88   : > { %3728 = vmatpush.bf16.msrb.mxu0 %v4840_v0  ;;  %v5105_v63 = vld [vmem:[%s7836_s27 + $0x288] sm:$0xf0]  ;;  %v6256_v4 = vor.u32 %v7289_v2, %v6255_v1  ;;  %v6127_v13 = vld [vmem:[%s7836_s27 + $0xa08] sm:$0xf]  ;;  %v7402_v2 = vld [vmem:[%s7836_s27 + $0xf14] sm:$0xf] }
  0x89   : > { %3741 = vmatpush.bf16.msrb.mxu1 %v5864_v17  ;;  %v5108_v0 = vor.u32 %v6985_v61, %v5105_v63  ;;  %v7273_v3 = vld [vmem:[%s7836_s27 + $0xb0c] sm:$0xf]  ;;  %v7257_v14 = vld [vmem:[%s7836_s27 + $0xa84] sm:$0xf0]  ;;  %v6775_v61 = vld [vmem:[%s7836_s27 + $0xf10] sm:$0xf] }
  0x8a   : > { %3754 = vmatpush.bf16.msrb.mxu2 %v4844_v6  ;;  %v6257_v5 = vld [vmem:[%s7836_s27 + $0xb88] sm:$0xf0]  ;;  %v6128_v16 = vor.u32 %v7257_v14, %v6127_v13  ;;  %v7225_v26 = vld [vmem:[%s7836_s27 + $0x984] sm:$0xf0] }
  0x8b   : > { %3767 = vmatpush.bf16.msrb.mxu3 %v5868_v18  ;;  %v6260_v6 = vor.u32 %v7273_v3, %v6257_v5  ;;  %v6953_v9 = vld [vmem:[%s7836_s27 + $0x10c] sm:$0xf]  ;;  %v6777_v3 = vld [vmem:[%s7836_s27 + $0xf90] sm:$0xf0]  ;;  %v7098_v5 = vld [vmem:[%s7836_s27 + $0x58c] sm:$0xf0] }
  0x8c   : > { %3773 = vmatpush.bf16.msra.mxu0 %v5744_v7  ;;  %v4975_v7 = vld [vmem:[%s7836_s27 + $0x108] sm:$0xf]  ;;  %v7241_v15 = vld [vmem:[%s7836_s27 + $0xa0c] sm:$0xf] }
  0x8d   : > { %3786 = vmatpush.bf16.msra.mxu1 %v6768_v19  ;;  %v4976_v10 = vor.u32 %v6969_v8, %v4975_v7  ;;  %v6129_v17 = vld [vmem:[%s7836_s27 + $0xa88] sm:$0xf0]  ;;  %v4847_v19 = vld [vmem:[%s7836_s27 + $0x8] sm:$0xf]  ;;  %v5497_v7 = vld [vmem:[%s7836_s27 + $0x590] sm:$0xf0] }
  0x8e   : > { %3799 = vmatpush.bf16.msra.mxu2 %v5748_v11  ;;  %v4977_v11 = vld [vmem:[%s7836_s27 + $0x188] sm:$0xf0]  ;;  %v6132_v18 = vor.u32 %v7241_v15, %v6129_v17  ;;  %v6649_v17 = vld [vmem:[%s7836_s27 + $0xe90] sm:$0xf0] }
  0x8f   : > { %3812 = vmatpush.bf16.msra.mxu3 %v6772_v21  ;;  %v4980_v12 = vor.u32 %v6953_v9, %v4977_v11  ;;  %v6921_v22 = vld [vmem:[%s7836_s27 + $0xc] sm:$0xf]  ;;  %v6647_v11 = vld [vmem:[%s7836_s27 + $0xe10] sm:$0xf] }
  0x90   : > { %3774 = vmatpush.bf16.msra.mxu0 %v5616_v20  ;;  %v6937_v20 = vld [vmem:[%s7836_s27 + $0x84] sm:$0xf0]  ;;  %v4849_v23 = vld [vmem:[%s7836_s27 + $0x88] sm:$0xf0] }
  0x91   : > { %3787 = vmatpush.bf16.msra.mxu1 %v6640_v31  ;;  %v4848_v21 = vor.u32 %v6937_v20, %v4847_v19  ;;  %v4852_v24 = vor.u32 %v6921_v22, %v4849_v23  ;;  %v7209_v27 = vld [vmem:[%s7836_s27 + $0x90c] sm:$0xf]  ;;  %v5871_v31 = vld [vmem:[%s7836_s27 + $0x808] sm:$0xf]  ;;  %v7066_v20 = vld [vmem:[%s7836_s27 + $0x48c] sm:$0xf0] }
  0x92   : > { %3800 = vmatpush.bf16.msra.mxu2 %v5620_v25  ;;  %v5999_v25 = vld [vmem:[%s7836_s27 + $0x908] sm:$0xf]  ;;  %v6001_v29 = vld [vmem:[%s7836_s27 + $0x988] sm:$0xf0]  ;;  %v5369_v22 = vld [vmem:[%s7836_s27 + $0x490] sm:$0xf0] }
  0x93   : > { %3813 = vmatpush.bf16.msra.mxu3 %v6644_v33  ;;  %v6000_v28 = vor.u32 %v7225_v26, %v5999_v25  ;;  %v6004_v30 = vor.u32 %v7209_v27, %v6001_v29  ;;  %v7177_v34 = vld [vmem:[%s7836_s27 + $0x80c] sm:$0xf]  ;;  %v6519_v26 = vld [vmem:[%s7836_s27 + $0xd10] sm:$0xf] }
  0x94   : > { %3775 = vmatpush.bf16.msra.mxu0 %v5488_v32  ;;  %v7193_v32 = vld [vmem:[%s7836_s27 + $0x884] sm:$0xf0]  ;;  %v5873_v35 = vld [vmem:[%s7836_s27 + $0x888] sm:$0xf0]  ;;  %v7354_v29 = vld [vmem:[%s7836_s27 + $0xd8c] sm:$0xf0] }
  0x95   : > { %3788 = vmatpush.bf16.msra.mxu1 %v6512_v43  ;;  %v5872_v33 = vor.u32 %v7193_v32, %v5871_v31  ;;  %v5876_v36 = vor.u32 %v7177_v34, %v5873_v35  ;;  %v6521_v31 = vld [vmem:[%s7836_s27 + $0xd90] sm:$0xf0]  ;;  %v5239_v32 = vld [vmem:[%s7836_s27 + $0x310] sm:$0xf] }
  0x96   : > { %3801 = vmatpush.bf16.msra.mxu2 %v5492_v37  ;;  %v348_v37 = vld [vmem:[#allocation4] sm:$0x3]  ;;  %v7018_v34 = vld [vmem:[%s7836_s27 + $0x314] sm:$0xf] }
  0x97   : > { %3814 = vmatpush.bf16.msra.mxu3 %v6516_v45  ;;  %v350_v38 = vperm.slane %v348_v37, 0  ;;  %v7146_v45 = vld [vmem:[%s7836_s27 + $0x714] sm:$0xf]  ;;  %v351_v47 = vperm.slane %v348_v37, 1 }
  0x98   : > { %3776 = vmatpush.bf16.msra.mxu0 %v5360_v44  ;;  %v7162_v44 = vld [vmem:[%s7836_s27 + $0x78c] sm:$0xf0]  ;;  %v5756_v50 = vor.u32 %v7146_v45, %v5753_v46  ;;  %v5241_v35 = vld [vmem:[%s7836_s27 + $0x390] sm:$0xf0] }
  0x99   : > { %3789 = vmatpush.bf16.msra.mxu1 %v6384_v55  ;;  %v7114_v55 = vld [vmem:[%s7836_s27 + $0x614] sm:$0xf]  ;;  %v7002_v45 = vld [vmem:[%s7836_s27 + $0x28c] sm:$0xf0] }
  0x9a   : > { %3802 = vmatpush.bf16.msra.mxu2 %v5364_v49  ;;  %v5752_v49 = vor.u32 %v7162_v44, %v5751_v42  ;;  %v5111_v44 = vld [vmem:[%s7836_s27 + $0x210] sm:$0xf]  ;;  %v6986_v46 = vld [vmem:[%s7836_s27 + $0x214] sm:$0xf] }
  0x9b   : > { %3815 = vmatpush.bf16.msra.mxu3 %v6388_v57 }
  0x9c   : > { %3777 = vmatpush.bf16.msra.mxu0 %v5232_v56  ;;  %v5625_v56 = vld [vmem:[%s7836_s27 + $0x690] sm:$0xf0] }
  0x9d   : > { %3790 = vmatpush.bf16.msra.mxu1 %v6256_v4  ;;  %v5628_v1 = vor.u32 %v7114_v55, %v5625_v56  ;;  %v5495_v4 = vld [vmem:[%s7836_s27 + $0x510] sm:$0xf]  ;;  %v5112_v55 = vor.u32 %v7002_v45, %v5111_v44  ;;  %v7083_v44 = vld [vmem:[%s7836_s27 + $0x51c] sm:$0xf] }
  0x9e   : > { %3803 = vmatpush.bf16.msra.mxu2 %v5236_v58  ;;  %v5496_v14 = vor.u32 %v7098_v5, %v5495_v4  ;;  %v4855_v5 = vld [vmem:[%s7836_s27 + $0x10] sm:$0xf]  ;;  %v5505_v45 = vld [vmem:[%s7836_s27 + $0x598] sm:$0xf0] }
  0x9f   : > { %3816 = vmatpush.bf16.msra.mxu3 %v6260_v6  ;;  %v7082_v6 = vld [vmem:[%s7836_s27 + $0x514] sm:$0xf] }
  0xa0   : > { %3778 = vmatpush.bf16.msra.mxu0 %v5104_v62  ;;  %v7418_v62 = vld [vmem:[%s7836_s27 + $0xf8c] sm:$0xf0]  ;;  %v5500_v15 = vor.u32 %v7082_v6, %v5497_v7  ;;  %v6922_v7 = vld [vmem:[%s7836_s27 + $0x14] sm:$0xf] }
  0xa1   : > { %3791 = vmatpush.bf16.msra.mxu1 %v6128_v16  ;;  %v6776_v9 = vor.u32 %v7418_v62, %v6775_v61  ;;  %v7370_v16 = vld [vmem:[%s7836_s27 + $0xe14] sm:$0xf]  ;;  %v6938_v6 = vld [vmem:[%s7836_s27 + $0x8c] sm:$0xf0] }
  0xa2   : > { %3804 = vmatpush.bf16.msra.mxu2 %v5108_v0  ;;  %v5624_v0 = vor.u32 %v7130_v54, %v5623_v51  ;;  %v6652_v25 = vor.u32 %v7370_v16, %v6649_v17  ;;  %v7290_v51 = vld [vmem:[%s7836_s27 + $0xb8c] sm:$0xf0]  ;;  %v6265_v54 = vld [vmem:[%s7836_s27 + $0xb90] sm:$0xf0] }
  0xa3   : > { %3817 = vmatpush.bf16.msra.mxu3 %v6132_v18  ;;  %v5367_v18 = vld [vmem:[%s7836_s27 + $0x410] sm:$0xf] }
  0xa4   : > { %3779 = vmatpush.bf16.msra.mxu0 %v4976_v10  ;;  %v6780_v10 = vor.u32 %v7402_v2, %v6777_v3  ;;  %v5368_v27 = vor.u32 %v7066_v20, %v5367_v18  ;;  %v6137_v2 = vld [vmem:[%s7836_s27 + $0xa90] sm:$0xf0]  ;;  %v6007_v16 = vld [vmem:[%s7836_s27 + $0x910] sm:$0xf]  ;;  %v4856_v20 = vor.u32 %v6938_v6, %v4855_v5  ;;  %v7019_v5 = vld [vmem:[%s7836_s27 + $0x31c] sm:$0xf] }
  0xa5   : > { %3792 = vmatpush.bf16.msra.mxu1 %v6000_v28  ;;  %v7226_v17 = vld [vmem:[%s7836_s27 + $0x98c] sm:$0xf0]  ;;  %v7210_v18 = vld [vmem:[%s7836_s27 + $0x914] sm:$0xf]  ;;  %v5249_v6 = vld [vmem:[%s7836_s27 + $0x398] sm:$0xf0] }
  0xa6   : > { %3805 = vmatpush.bf16.msra.mxu2 %v4980_v12  ;;  %v7386_v12 = vld [vmem:[%s7836_s27 + $0xe8c] sm:$0xf0] }
  0xa7   : > { %3818 = vmatpush.bf16.msra.mxu3 %v6004_v30  ;;  %v7338_v30 = vld [vmem:[%s7836_s27 + $0xd14] sm:$0xf] }
  0xa8   : > { %3780 = vmatpush.bf16.msra.mxu0 %v4848_v21  ;;  %v7050_v21 = vld [vmem:[%s7836_s27 + $0x414] sm:$0xf]  ;;  %v6524_v37 = vor.u32 %v7338_v30, %v6521_v31  ;;  %v5879_v30 = vld [vmem:[%s7836_s27 + $0x810] sm:$0xf] }
  0xa9   : > { %3793 = vmatpush.bf16.msra.mxu1 %v5872_v33  ;;  %v5372_v28 = vor.u32 %v7050_v21, %v5369_v22  ;;  %v7034_v33 = vld [vmem:[%s7836_s27 + $0x38c] sm:$0xf0] }
  0xaa   : > { %3806 = vmatpush.bf16.msra.mxu2 %v4852_v24  ;;  %v6648_v24 = vor.u32 %v7386_v12, %v6647_v11  ;;  %v5240_v42 = vor.u32 %v7034_v33, %v5239_v32  ;;  %v7194_v31 = vld [vmem:[%s7836_s27 + $0x88c] sm:$0xf0]  ;;  %v7178_v32 = vld [vmem:[%s7836_s27 + $0x814] sm:$0xf] }
  0xab   : > { %3819 = vmatpush.bf16.msra.mxu3 %v5876_v36  ;;  %v6520_v36 = vor.u32 %v7354_v29, %v6519_v26  ;;  %v7115_v26 = vld [vmem:[%s7836_s27 + $0x61c] sm:$0xf]  ;;  %v5881_v33 = vld [vmem:[%s7836_s27 + $0x890] sm:$0xf0] }
  0xac   : > { %v5633_v29 = vld [vmem:[%s7836_s27 + $0x698] sm:$0xf0] }
  0xe8   : > { %v530_v39 = vpop.f32.mrf.mxu0 }
  0xe9   : > { %v531_v40 = vadd.f32 %v530_v39, %v350_v38  ;;  %v543_v41 = vpop.f32.mrf.mxu1  ;;  %v6391_v38 = vld [vmem:[%s7836_s27 + $0xc10] sm:$0xf] }
  0xea   : > { %v7322_v39 = vld [vmem:[%s7836_s27 + $0xc8c] sm:$0xf0] }
  0xeb   : > { %v544_v43 = vadd.f32 %v543_v41, %v531_v40  ;;  %v7306_v40 = vld [vmem:[%s7836_s27 + $0xc14] sm:$0xf] }
  0xec   : > { %v6393_v41 = vld [vmem:[%s7836_s27 + $0xc90] sm:$0xf0] }
  0xed   : > { %v573_v48 = vmax.f32 %v544_v43, 0.0  ;;  %v5244_v43 = vor.u32 %v7018_v34, %v5241_v35  ;;  %v6783_v34 = vld [vmem:[%s7836_s27 + $0xf18] sm:$0xf] }
  0xee   : > { %v7419_v35 = vld [vmem:[%s7836_s27 + $0xf94] sm:$0xf0] }
  0xef   : > { %v7978_v52 = vpack.c.bf16 %v573_v48, %v573_v48  ;;  %v6392_v48 = vor.u32 %v7322_v39, %v6391_v38  ;;  %v5636_v39 = vor.u32 %v7115_v26, %v5633_v29  ;;  %v6971_v29 = vld [vmem:[%s7836_s27 + $0x194] sm:$0xf0] }
  0xf0   : > { %v556_v53 = vpop.f32.mrf.mxu2  ;;  %v532_v59 = vpop.f32.mrf.mxu0 }
  0xf1   : > { %v557_v57 = vadd.f32 %v556_v53, %v351_v47  ;;  %v569_v58 = vpop.f32.mrf.mxu3  ;;  %v545_v60 = vpop.f32.mrf.mxu1  ;;  %3729 = vmatmul.bf16.vlgmr.msrb.gmra.mxu0 %v7978_v52  ;;  %3755 = vmatmul.bf16.vlgmr.msrb.gmra.mxu2 %v7978_v52  ;;  %v5113_v47 = vld [vmem:[%s7836_s27 + $0x290] sm:$0xf0] }
  0xf2   : > { %3825 = vmatpush.bf16.msrb.mxu0 %v5752_v49  ;;  %3851 = vmatpush.bf16.msrb.mxu2 %v5756_v50  ;;  %v6396_v49 = vor.u32 %v7306_v40, %v6393_v41  ;;  %v6263_v50 = vld [vmem:[%s7836_s27 + $0xb10] sm:$0xf]  ;;  %v7274_v53 = vld [vmem:[%s7836_s27 + $0xb14] sm:$0xf]  ;;  %v5116_v56 = vor.u32 %v6986_v46, %v5113_v47  ;;  %v5503_v40 = vld [vmem:[%s7836_s27 + $0x518] sm:$0xf]  ;;  %v5880_v41 = vor.u32 %v7194_v31, %v5879_v30 }
  0xf3   : > { %v570_v63 = vadd.f32 %v569_v58, %v557_v57  ;;  %v4983_v57 = vld [vmem:[%s7836_s27 + $0x110] sm:$0xf]  ;;  %v6954_v59 = vld [vmem:[%s7836_s27 + $0x114] sm:$0xf]  ;;  %v6264_v61 = vor.u32 %v7290_v51, %v6263_v50  ;;  %v6268_v62 = vor.u32 %v7274_v53, %v6265_v54  ;;  %v6784_v46 = vor.u32 %v7419_v35, %v6783_v34  ;;  %v7371_v50 = vld [vmem:[%s7836_s27 + $0xe1c] sm:$0xf] }
  0xf4   : > { %v6970_v58 = vld [vmem:[%s7836_s27 + $0x18c] sm:$0xf0]  ;;  %v4985_v60 = vld [vmem:[%s7836_s27 + $0x190] sm:$0xf0]  ;;  %v6657_v51 = vld [vmem:[%s7836_s27 + $0xe98] sm:$0xf0]  ;;  %v5508_v54 = vor.u32 %v7083_v44, %v5505_v45 }
  0xf5   : > { %v574_v8 = vmax.f32 %v570_v63, 0.0  ;;  %v6135_v63 = vld [vmem:[%s7836_s27 + $0xa10] sm:$0xf]  ;;  %v4984_v3 = vor.u32 %v6970_v58, %v4983_v57  ;;  %v4988_v4 = vor.u32 %v6954_v59, %v4985_v60  ;;  %v7051_v57 = vld [vmem:[%s7836_s27 + $0x41c] sm:$0xf]  ;;  %v6660_v60 = vor.u32 %v7371_v50, %v6657_v51 }
  0xf6   : > { %3826 = vmatpush.bf16.msrb.mxu0 %v5624_v0  ;;  %3852 = vmatpush.bf16.msrb.mxu2 %v5628_v1  ;;  %v7258_v0 = vld [vmem:[%s7836_s27 + $0xa8c] sm:$0xf0]  ;;  %v7242_v1 = vld [vmem:[%s7836_s27 + $0xa14] sm:$0xf]  ;;  %v5377_v58 = vld [vmem:[%s7836_s27 + $0x498] sm:$0xf0] }
  0xf7   : > { %v7995_v13 = vpack.c.bf16 %v574_v8, %v574_v8  ;;  %v4857_v8 = vld [vmem:[%s7836_s27 + $0x90] sm:$0xf0]  ;;  %v6136_v11 = vor.u32 %v7258_v0, %v6135_v63  ;;  %v6140_v12 = vor.u32 %v7242_v1, %v6137_v2  ;;  %v7339_v63 = vld [vmem:[%s7836_s27 + $0xd1c] sm:$0xf]  ;;  %v5380_v2 = vor.u32 %v7051_v57, %v5377_v58  ;;  %v6143_v34 = vld [vmem:[%s7836_s27 + $0xa18] sm:$0xf] }
  0xf8   : > { %v558_v19 = vpop.f32.mrf.mxu2  ;;  %v4860_v21 = vor.u32 %v6922_v7, %v4857_v8  ;;  %v6529_v0 = vld [vmem:[%s7836_s27 + $0xd98] sm:$0xf0]  ;;  %v7259_v35 = vld [vmem:[%s7836_s27 + $0xa94] sm:$0xf0]  ;;  %v5767_v44 = vld [vmem:[%s7836_s27 + $0x720] sm:$0xf] }
  0xf9   : > { %v571_v23 = vpop.f32.mrf.mxu3  ;;  %3742 = vmatmul.bf16.vlgmr.msrb.gmra.mxu1 %v7995_v13  ;;  %3768 = vmatmul.bf16.vlgmr.msrb.gmra.mxu3 %v7995_v13  ;;  %v6009_v19 = vld [vmem:[%s7836_s27 + $0x990] sm:$0xf0]  ;;  %v6532_v8 = vor.u32 %v7339_v63, %v6529_v0  ;;  %v6955_v30 = vld [vmem:[%s7836_s27 + $0x11c] sm:$0xf]  ;;  %v7164_v45 = vld [vmem:[%s7836_s27 + $0x79c] sm:$0xf0] }
  0xfa   : > { %3838 = vmatpush.bf16.msrb.mxu1 %v6776_v9  ;;  %3864 = vmatpush.bf16.msrb.mxu3 %v6780_v10  ;;  %v5759_v9 = vld [vmem:[%s7836_s27 + $0x718] sm:$0xf]  ;;  %v4993_v31 = vld [vmem:[%s7836_s27 + $0x198] sm:$0xf0]  ;;  %v5768_v57 = vor.u32 %v7164_v45, %v5767_v44  ;;  %v5641_v0 = vld [vmem:[%s7836_s27 + $0x6a0] sm:$0xf0] }
  0xfb   : > { %3827 = vmatpush.bf16.msrb.mxu0 %v5496_v14  ;;  %3853 = vmatpush.bf16.msrb.mxu2 %v5500_v15  ;;  %v7163_v10 = vld [vmem:[%s7836_s27 + $0x794] sm:$0xf0]  ;;  %v7147_v14 = vld [vmem:[%s7836_s27 + $0x71c] sm:$0xf]  ;;  %v6407_v44 = vld [vmem:[%s7836_s27 + $0xc20] sm:$0xf] }
  0xfc   : > { %v5761_v15 = vld [vmem:[%s7836_s27 + $0x798] sm:$0xf0]  ;;  %v5760_v22 = vor.u32 %v7163_v10, %v5759_v9  ;;  %v6399_v9 = vld [vmem:[%s7836_s27 + $0xc18] sm:$0xf]  ;;  %v7324_v45 = vld [vmem:[%s7836_s27 + $0xc9c] sm:$0xf0] }
  0xfd   : > { %v5764_v23 = vor.u32 %v7147_v14, %v5761_v15  ;;  %v7323_v10 = vld [vmem:[%s7836_s27 + $0xc94] sm:$0xf0]  ;;  %v5252_v15 = vor.u32 %v7019_v5, %v5249_v6  ;;  %v6791_v5 = vld [vmem:[%s7836_s27 + $0xf20] sm:$0xf] }
  0xfe   : > { %3839 = vmatpush.bf16.msrb.mxu1 %v6648_v24  ;;  %3865 = vmatpush.bf16.msrb.mxu3 %v6652_v25  ;;  %v5631_v24 = vld [vmem:[%s7836_s27 + $0x618] sm:$0xf]  ;;  %v7420_v6 = vld [vmem:[%s7836_s27 + $0xf9c] sm:$0xf0] }
  0xff   : > { %3828 = vmatpush.bf16.msrb.mxu0 %v5368_v27  ;;  %3854 = vmatpush.bf16.msrb.mxu2 %v5372_v28  ;;  %v7131_v25 = vld [vmem:[%s7836_s27 + $0x694] sm:$0xf0]  ;;  %v6008_v27 = vor.u32 %v7226_v17, %v6007_v16  ;;  %v6012_v28 = vor.u32 %v7210_v18, %v6009_v19  ;;  %v6987_v18 = vld [vmem:[%s7836_s27 + $0x21c] sm:$0xf] }
 0x100   : > { %v5632_v38 = vor.u32 %v7131_v25, %v5631_v24  ;;  %v5119_v16 = vld [vmem:[%s7836_s27 + $0x218] sm:$0xf]  ;;  %v5121_v19 = vld [vmem:[%s7836_s27 + $0x298] sm:$0xf0] }
 0x101   : > { %3781 = vmatmul.bf16.vlgmr.msra.gmra.mxu0 %v7978_v52  ;;  %3807 = vmatmul.bf16.vlgmr.msra.gmra.mxu2 %v7978_v52  ;;  %v7003_v17 = vld [vmem:[%s7836_s27 + $0x294] sm:$0xf0]  ;;  %v7275_v24 = vld [vmem:[%s7836_s27 + $0xb1c] sm:$0xf] }
 0x102   : > { %3840 = vmatpush.bf16.msrb.mxu1 %v6520_v36  ;;  %3866 = vmatpush.bf16.msrb.mxu3 %v6524_v37  ;;  %v7403_v36 = vld [vmem:[%s7836_s27 + $0xf1c] sm:$0xf]  ;;  %v5120_v26 = vor.u32 %v7003_v17, %v5119_v16  ;;  %v6015_v50 = vld [vmem:[%s7836_s27 + $0x918] sm:$0xf]  ;;  %v6792_v16 = vor.u32 %v7420_v6, %v6791_v5  ;;  %v6151_v5 = vld [vmem:[%s7836_s27 + $0xa20] sm:$0xf] }
 0x103   : > { %3829 = vmatpush.bf16.msrb.mxu0 %v5240_v42  ;;  %3855 = vmatpush.bf16.msrb.mxu2 %v5244_v43  ;;  %v6785_v37 = vld [vmem:[%s7836_s27 + $0xf98] sm:$0xf0]  ;;  %v5884_v42 = vor.u32 %v7178_v32, %v5881_v33  ;;  %v7099_v43 = vld [vmem:[%s7836_s27 + $0x594] sm:$0xf0]  ;;  %v7260_v6 = vld [vmem:[%s7836_s27 + $0xa9c] sm:$0xf0] }
 0x104   : > { %v6788_v47 = vor.u32 %v7403_v36, %v6785_v37  ;;  %v5504_v53 = vor.u32 %v7099_v43, %v5503_v40  ;;  %v6273_v25 = vld [vmem:[%s7836_s27 + $0xb98] sm:$0xf0]  ;;  %v4863_v40 = vld [vmem:[%s7836_s27 + $0x18] sm:$0xf] }
 0x105   : > { %v6276_v33 = vor.u32 %v7275_v24, %v6273_v25  ;;  %v7243_v36 = vld [vmem:[%s7836_s27 + $0xa1c] sm:$0xf]  ;;  %v7227_v51 = vld [vmem:[%s7836_s27 + $0x994] sm:$0xf0] }
 0x106   : > { %3841 = vmatpush.bf16.msrb.mxu1 %v6392_v48  ;;  %3867 = vmatpush.bf16.msrb.mxu3 %v6396_v49  ;;  %v6655_v48 = vld [vmem:[%s7836_s27 + $0xe18] sm:$0xf]  ;;  %v6145_v37 = vld [vmem:[%s7836_s27 + $0xa98] sm:$0xf0] }
 0x107   : > { %3830 = vmatpush.bf16.msrb.mxu0 %v5112_v55  ;;  %3856 = vmatpush.bf16.msrb.mxu2 %v5116_v56  ;;  %v7387_v49 = vld [vmem:[%s7836_s27 + $0xe94] sm:$0xf0]  ;;  %v4865_v43 = vld [vmem:[%s7836_s27 + $0x98] sm:$0xf0] }
 0x108   : > { %v5375_v55 = vld [vmem:[%s7836_s27 + $0x418] sm:$0xf]  ;;  %v6656_v59 = vor.u32 %v7387_v49, %v6655_v48  ;;  %v7148_v48 = vld [vmem:[%s7836_s27 + $0x724] sm:$0xf] }
 0x109   : > { %3794 = vmatmul.bf16.vlgmr.msra.gmra.mxu1 %v7995_v13  ;;  %3820 = vmatmul.bf16.vlgmr.msra.gmra.mxu3 %v7995_v13  ;;  %v7067_v56 = vld [vmem:[%s7836_s27 + $0x494] sm:$0xf0]  ;;  %v5769_v49 = vld [vmem:[%s7836_s27 + $0x7a0] sm:$0xf0] }
 0x10a   : > { %3842 = vmatpush.bf16.msrb.mxu1 %v6264_v61  ;;  %3868 = vmatpush.bf16.msrb.mxu3 %v6268_v62  ;;  %v6527_v61 = vld [vmem:[%s7836_s27 + $0xd18] sm:$0xf]  ;;  %v5376_v1 = vor.u32 %v7067_v56, %v5375_v55  ;;  %v5772_v58 = vor.u32 %v7148_v48, %v5769_v49 }
 0x10b   : > { %3831 = vmatpush.bf16.msrb.mxu0 %v4984_v3  ;;  %3857 = vmatpush.bf16.msrb.mxu2 %v4988_v4  ;;  %v7355_v62 = vld [vmem:[%s7836_s27 + $0xd94] sm:$0xf0] }
 0x10c   : > { %v5247_v3 = vld [vmem:[%s7836_s27 + $0x318] sm:$0xf]  ;;  %v6528_v7 = vor.u32 %v7355_v62, %v6527_v61  ;;  %v7116_v61 = vld [vmem:[%s7836_s27 + $0x624] sm:$0xf]  ;;  %v6016_v62 = vor.u32 %v7227_v51, %v6015_v50  ;;  %v5127_v50 = vld [vmem:[%s7836_s27 + $0x220] sm:$0xf] }
 0x10d   : > { %v7035_v4 = vld [vmem:[%s7836_s27 + $0x394] sm:$0xf0]  ;;  %v7004_v51 = vld [vmem:[%s7836_s27 + $0x29c] sm:$0xf0] }
 0x10e   : > { %3843 = vmatpush.bf16.msrb.mxu1 %v6136_v11  ;;  %3869 = vmatpush.bf16.msrb.mxu3 %v6140_v12  ;;  %v7307_v11 = vld [vmem:[%s7836_s27 + $0xc1c] sm:$0xf]  ;;  %v5248_v14 = vor.u32 %v7035_v4, %v5247_v3 }
 0x10f   : > { %3832 = vmatpush.bf16.msrb.mxu0 %v4856_v20  ;;  %3858 = vmatpush.bf16.msrb.mxu2 %v4860_v21  ;;  %v6401_v12 = vld [vmem:[%s7836_s27 + $0xc98] sm:$0xf0]  ;;  %v6400_v20 = vor.u32 %v7323_v10, %v6399_v9  ;;  %v5644_v10 = vor.u32 %v7116_v61, %v5641_v0  ;;  %v5128_v61 = vor.u32 %v7004_v51, %v5127_v50  ;;  %v6972_v0 = vld [vmem:[%s7836_s27 + $0x19c] sm:$0xf0] }
 0x110   : > { %v6404_v21 = vor.u32 %v7307_v11, %v6401_v12  ;;  %v7179_v3 = vld [vmem:[%s7836_s27 + $0x81c] sm:$0xf] }
 0x111   : > { %v5889_v4 = vld [vmem:[%s7836_s27 + $0x898] sm:$0xf0] }
 0x112   : > { %3844 = vmatpush.bf16.msrb.mxu1 %v6008_v27  ;;  %3870 = vmatpush.bf16.msrb.mxu3 %v6012_v28  ;;  %v5124_v27 = vor.u32 %v6987_v18, %v5121_v19  ;;  %v4991_v28 = vld [vmem:[%s7836_s27 + $0x118] sm:$0xf]  ;;  %v5892_v12 = vor.u32 %v7179_v3, %v5889_v4  ;;  %v7084_v18 = vld [vmem:[%s7836_s27 + $0x524] sm:$0xf] }
 0x113   : > { %3877 = vmatpush.bf16.msra.mxu0 %v5760_v22  ;;  %3903 = vmatpush.bf16.msra.mxu2 %v5764_v23  ;;  %v6271_v22 = vld [vmem:[%s7836_s27 + $0xb18] sm:$0xf]  ;;  %v5513_v19 = vld [vmem:[%s7836_s27 + $0x5a0] sm:$0xf0] }
 0x114   : > { %3833 = vmatmul.bf16.vlgmr.msrb.gmra.mxu0 %v7978_v52  ;;  %3859 = vmatmul.bf16.vlgmr.msrb.gmra.mxu2 %v7978_v52  ;;  %v7291_v23 = vld [vmem:[%s7836_s27 + $0xb94] sm:$0xf0]  ;;  %v5516_v25 = vor.u32 %v7084_v18, %v5513_v19  ;;  %v6956_v3 = vld [vmem:[%s7836_s27 + $0x124] sm:$0xf]  ;;  %v5775_v18 = vld [vmem:[%s7836_s27 + $0x728] sm:$0xf] }
 0x115   : > { %v6272_v32 = vor.u32 %v7291_v23, %v6271_v22  ;;  %v7372_v22 = vld [vmem:[%s7836_s27 + $0xe24] sm:$0xf]  ;;  %v7165_v19 = vld [vmem:[%s7836_s27 + $0x7a4] sm:$0xf0] }
 0x116   : > { %3845 = vmatpush.bf16.msrb.mxu1 %v5880_v41  ;;  %3871 = vmatpush.bf16.msrb.mxu3 %v5884_v42  ;;  %v6939_v41 = vld [vmem:[%s7836_s27 + $0x94] sm:$0xf0]  ;;  %v6923_v42 = vld [vmem:[%s7836_s27 + $0x1c] sm:$0xf]  ;;  %v6665_v23 = vld [vmem:[%s7836_s27 + $0xea0] sm:$0xf0] }
 0x117   : > { %3878 = vmatpush.bf16.msra.mxu0 %v5632_v38  ;;  %3904 = vmatpush.bf16.msra.mxu2 %v5636_v39  ;;  %v4992_v38 = vor.u32 %v6971_v29, %v4991_v28  ;;  %v4996_v39 = vor.u32 %v6955_v30, %v4993_v31  ;;  %v4864_v55 = vor.u32 %v6939_v41, %v4863_v40  ;;  %v7052_v30 = vld [vmem:[%s7836_s27 + $0x424] sm:$0xf] }
 0x118   : > { %v4868_v56 = vor.u32 %v6923_v42, %v4865_v43  ;;  %v6668_v29 = vor.u32 %v7372_v22, %v6665_v23  ;;  %v5385_v31 = vld [vmem:[%s7836_s27 + $0x4a0] sm:$0xf0]  ;;  %v6023_v22 = vld [vmem:[%s7836_s27 + $0x920] sm:$0xf] }
 0x119   : > { %3846 = vmatmul.bf16.vlgmr.msrb.gmra.mxu1 %v7995_v13  ;;  %3872 = vmatmul.bf16.vlgmr.msrb.gmra.mxu3 %v7995_v13  ;;  %v7020_v42 = vld [vmem:[%s7836_s27 + $0x324] sm:$0xf]  ;;  %v7228_v23 = vld [vmem:[%s7836_s27 + $0x99c] sm:$0xf0] }
 0x11a   : > { %3890 = vmatpush.bf16.msra.mxu1 %v6784_v46  ;;  %3916 = vmatpush.bf16.msra.mxu3 %v6788_v47  ;;  %v6144_v46 = vor.u32 %v7259_v35, %v6143_v34  ;;  %v6148_v47 = vor.u32 %v7243_v36, %v6145_v37  ;;  %v7340_v34 = vld [vmem:[%s7836_s27 + $0xd24] sm:$0xf]  ;;  %v5388_v37 = vor.u32 %v7052_v30, %v5385_v31  ;;  %v5647_v30 = vld [vmem:[%s7836_s27 + $0x628] sm:$0xf] }
 0x11b   : > { %3879 = vmatpush.bf16.msra.mxu0 %v5504_v53  ;;  %3905 = vmatpush.bf16.msra.mxu2 %v5508_v54  ;;  %v7211_v53 = vld [vmem:[%s7836_s27 + $0x91c] sm:$0xf]  ;;  %v6537_v35 = vld [vmem:[%s7836_s27 + $0xda0] sm:$0xf0]  ;;  %v7133_v31 = vld [vmem:[%s7836_s27 + $0x6a4] sm:$0xf0] }
 0x11c   : > { %v6017_v54 = vld [vmem:[%s7836_s27 + $0x998] sm:$0xf0]  ;;  %v6540_v41 = vor.u32 %v7340_v34, %v6537_v35  ;;  %v5257_v43 = vld [vmem:[%s7836_s27 + $0x3a0] sm:$0xf0]  ;;  %v5649_v35 = vld [vmem:[%s7836_s27 + $0x6a8] sm:$0xf0] }
 0x11d   : > { %v6020_v63 = vor.u32 %v7211_v53, %v6017_v54  ;;  %v5260_v49 = vor.u32 %v7020_v42, %v5257_v43  ;;  %v6408_v53 = vor.u32 %v7324_v45, %v6407_v44  ;;  %v5001_v4 = vld [vmem:[%s7836_s27 + $0x1a0] sm:$0xf0]  ;;  %v7405_v42 = vld [vmem:[%s7836_s27 + $0xf2c] sm:$0xf]  ;;  %v5648_v44 = vor.u32 %v7133_v31, %v5647_v30 }
 0x11e   : > { %3891 = vmatpush.bf16.msra.mxu1 %v6656_v59  ;;  %3917 = vmatpush.bf16.msra.mxu3 %v6660_v60  ;;  %v5639_v59 = vld [vmem:[%s7836_s27 + $0x620] sm:$0xf]  ;;  %v6801_v43 = vld [vmem:[%s7836_s27 + $0xfa8] sm:$0xf0] }
 0x11f   : > { %3880 = vmatpush.bf16.msra.mxu0 %v5376_v1  ;;  %3906 = vmatpush.bf16.msra.mxu2 %v5380_v2  ;;  %v7132_v60 = vld [vmem:[%s7836_s27 + $0x69c] sm:$0xf0]  ;;  %v5887_v1 = vld [vmem:[%s7836_s27 + $0x818] sm:$0xf]  ;;  %v6804_v51 = vor.u32 %v7405_v42, %v6801_v43  ;;  %v7277_v30 = vld [vmem:[%s7836_s27 + $0xb2c] sm:$0xf] }
 0x120   : > { %v7195_v2 = vld [vmem:[%s7836_s27 + $0x894] sm:$0xf0]  ;;  %v5640_v9 = vor.u32 %v7132_v60, %v5639_v59  ;;  %v7276_v59 = vld [vmem:[%s7836_s27 + $0xb24] sm:$0xf]  ;;  %v6289_v31 = vld [vmem:[%s7836_s27 + $0xba8] sm:$0xf0] }
 0x121   : > { %v5888_v11 = vor.u32 %v7195_v2, %v5887_v1  ;;  %v6281_v60 = vld [vmem:[%s7836_s27 + $0xba0] sm:$0xf0]  ;;  %v7245_v42 = vld [vmem:[%s7836_s27 + $0xa2c] sm:$0xf] }
 0x122   : > { %3892 = vmatpush.bf16.msra.mxu1 %v6528_v7  ;;  %3918 = vmatpush.bf16.msra.mxu3 %v6532_v8  ;;  %v7404_v7 = vld [vmem:[%s7836_s27 + $0xf24] sm:$0xf]  ;;  %v6284_v2 = vor.u32 %v7276_v59, %v6281_v60  ;;  %v6161_v43 = vld [vmem:[%s7836_s27 + $0xaa8] sm:$0xf0] }
 0x123   : > { %3881 = vmatpush.bf16.msra.mxu0 %v5248_v14  ;;  %3907 = vmatpush.bf16.msra.mxu2 %v5252_v15  ;;  %v6793_v8 = vld [vmem:[%s7836_s27 + $0xfa0] sm:$0xf0]  ;;  %v5511_v14 = vld [vmem:[%s7836_s27 + $0x520] sm:$0xf] }
 0x124   : > { %v7100_v15 = vld [vmem:[%s7836_s27 + $0x59c] sm:$0xf0]  ;;  %v6796_v17 = vor.u32 %v7404_v7, %v6793_v8  ;;  %v7244_v7 = vld [vmem:[%s7836_s27 + $0xa24] sm:$0xf] }
 0x125   : > { %v5512_v24 = vor.u32 %v7100_v15, %v5511_v14  ;;  %v6153_v8 = vld [vmem:[%s7836_s27 + $0xaa0] sm:$0xf0]  ;;  %v6152_v15 = vor.u32 %v7260_v6, %v6151_v5  ;;  %v7341_v5 = vld [vmem:[%s7836_s27 + $0xd2c] sm:$0xf] }
 0x126   : > { %3893 = vmatpush.bf16.msra.mxu1 %v6400_v20  ;;  %3919 = vmatpush.bf16.msra.mxu3 %v6404_v21  ;;  %v6663_v20 = vld [vmem:[%s7836_s27 + $0xe20] sm:$0xf]  ;;  %v6924_v14 = vld [vmem:[%s7836_s27 + $0x24] sm:$0xf]  ;;  %v6545_v6 = vld [vmem:[%s7836_s27 + $0xda8] sm:$0xf0] }
 0x127   : > { %3882 = vmatpush.bf16.msra.mxu0 %v5120_v26  ;;  %3908 = vmatpush.bf16.msra.mxu2 %v5124_v27  ;;  %v7388_v21 = vld [vmem:[%s7836_s27 + $0xe9c] sm:$0xf0] }
 0x128   : > { %v5383_v26 = vld [vmem:[%s7836_s27 + $0x420] sm:$0xf]  ;;  %v6664_v28 = vor.u32 %v7388_v21, %v6663_v20  ;;  %v7149_v20 = vld [vmem:[%s7836_s27 + $0x72c] sm:$0xf] }
 0x129   : > { %v7068_v27 = vld [vmem:[%s7836_s27 + $0x49c] sm:$0xf0]  ;;  %v5777_v21 = vld [vmem:[%s7836_s27 + $0x7a8] sm:$0xf0] }
 0x12a   : > { %3894 = vmatpush.bf16.msra.mxu1 %v6272_v32  ;;  %3920 = vmatpush.bf16.msra.mxu3 %v6276_v33  ;;  %v6535_v32 = vld [vmem:[%s7836_s27 + $0xd20] sm:$0xf]  ;;  %v5384_v36 = vor.u32 %v7068_v27, %v5383_v26 }
 0x12b   : > { %3883 = vmatpush.bf16.msra.mxu0 %v4992_v38  ;;  %3909 = vmatpush.bf16.msra.mxu2 %v4996_v39  ;;  %v7356_v33 = vld [vmem:[%s7836_s27 + $0xd9c] sm:$0xf0] }
 0x12c   : > { %v5255_v38 = vld [vmem:[%s7836_s27 + $0x320] sm:$0xf]  ;;  %v6536_v40 = vor.u32 %v7356_v33, %v6535_v32  ;;  %v7117_v32 = vld [vmem:[%s7836_s27 + $0x62c] sm:$0xf]  ;;  %v6024_v33 = vor.u32 %v7228_v23, %v6023_v22  ;;  %v5135_v22 = vld [vmem:[%s7836_s27 + $0x228] sm:$0xf] }
 0x12d   : > { %v7036_v39 = vld [vmem:[%s7836_s27 + $0x39c] sm:$0xf0]  ;;  %v5652_v45 = vor.u32 %v7117_v32, %v5649_v35  ;;  %v7005_v23 = vld [vmem:[%s7836_s27 + $0x2a4] sm:$0xf0] }
 0x12e   : > { %3895 = vmatpush.bf16.msra.mxu1 %v6144_v46  ;;  %3921 = vmatpush.bf16.msra.mxu3 %v6148_v47  ;;  %v7308_v46 = vld [vmem:[%s7836_s27 + $0xc24] sm:$0xf]  ;;  %v5256_v48 = vor.u32 %v7036_v39, %v5255_v38  ;;  %v5136_v32 = vor.u32 %v7005_v23, %v5135_v22  ;;  %v6973_v35 = vld [vmem:[%s7836_s27 + $0x1a4] sm:$0xf0]  ;;  %v7086_v22 = vld [vmem:[%s7836_s27 + $0x534] sm:$0xf] }
 0x12f   : > { %3884 = vmatpush.bf16.msra.mxu0 %v4864_v55  ;;  %3910 = vmatpush.bf16.msra.mxu2 %v4868_v56  ;;  %v6409_v47 = vld [vmem:[%s7836_s27 + $0xca0] sm:$0xf0] }
 0x130   : > { %v6412_v54 = vor.u32 %v7308_v46, %v6409_v47  ;;  %v6988_v55 = vld [vmem:[%s7836_s27 + $0x224] sm:$0xf] }
 0x131   : > { %v5129_v56 = vld [vmem:[%s7836_s27 + $0x2a0] sm:$0xf0] }
 0x132   : > { %3896 = vmatpush.bf16.msra.mxu1 %v6016_v62  ;;  %3922 = vmatpush.bf16.msra.mxu3 %v6020_v63  ;;  %v5132_v62 = vor.u32 %v6988_v55, %v5129_v56  ;;  %v4999_v63 = vld [vmem:[%s7836_s27 + $0x120] sm:$0xf]  ;;  %v7180_v38 = vld [vmem:[%s7836_s27 + $0x824] sm:$0xf]  ;;  %v6671_v55 = vld [vmem:[%s7836_s27 + $0xe28] sm:$0xf] }
 0x133   : > { %3929 = vmatpush.bf16.msrb.mxu0 %v5768_v57  ;;  %3955 = vmatpush.bf16.msrb.mxu2 %v5772_v58  ;;  %v6279_v57 = vld [vmem:[%s7836_s27 + $0xb20] sm:$0xf]  ;;  %v5897_v39 = vld [vmem:[%s7836_s27 + $0x8a0] sm:$0xf0]  ;;  %v7389_v56 = vld [vmem:[%s7836_s27 + $0xea4] sm:$0xf0] }
 0x134   : > { %3885 = vmatmul.bf16.vlgmr.msra.gmra.mxu0 %v7978_v52  ;;  %3911 = vmatmul.bf16.vlgmr.msra.gmra.mxu2 %v7978_v52  ;;  %v7292_v58 = vld [vmem:[%s7836_s27 + $0xb9c] sm:$0xf0]  ;;  %v5900_v47 = vor.u32 %v7180_v38, %v5897_v39  ;;  %v6957_v38 = vld [vmem:[%s7836_s27 + $0x12c] sm:$0xf] }
 0x135   : > { %v6280_v1 = vor.u32 %v7292_v58, %v6279_v57  ;;  %v7373_v57 = vld [vmem:[%s7836_s27 + $0xe2c] sm:$0xf] }
 0x136   : > { %3897 = vmatpush.bf16.msra.mxu1 %v5888_v11  ;;  %3923 = vmatpush.bf16.msra.mxu3 %v5892_v12  ;;  %v4871_v11 = vld [vmem:[%s7836_s27 + $0x20] sm:$0xf]  ;;  %v6673_v58 = vld [vmem:[%s7836_s27 + $0xea8] sm:$0xf0] }
 0x137   : > { %3930 = vmatpush.bf16.msrb.mxu0 %v5640_v9  ;;  %3956 = vmatpush.bf16.msrb.mxu2 %v5644_v10  ;;  %v5000_v9 = vor.u32 %v6972_v0, %v4999_v63  ;;  %v5004_v10 = vor.u32 %v6956_v3, %v5001_v4  ;;  %v6940_v12 = vld [vmem:[%s7836_s27 + $0x9c] sm:$0xf0]  ;;  %v6672_v63 = vor.u32 %v7389_v56, %v6671_v55  ;;  %v6543_v3 = vld [vmem:[%s7836_s27 + $0xd28] sm:$0xf]  ;;  %v5009_v39 = vld [vmem:[%s7836_s27 + $0x1a8] sm:$0xf0] }
 0x138   : > { %v4872_v26 = vor.u32 %v6940_v12, %v4871_v11  ;;  %v6676_v0 = vor.u32 %v7373_v57, %v6673_v58  ;;  %v7357_v4 = vld [vmem:[%s7836_s27 + $0xda4] sm:$0xf0]  ;;  %v6548_v12 = vor.u32 %v7341_v5, %v6545_v6  ;;  %v7150_v55 = vld [vmem:[%s7836_s27 + $0x734] sm:$0xf] }
 0x139   : > { %3898 = vmatmul.bf16.vlgmr.msra.gmra.mxu1 %v7995_v13  ;;  %3924 = vmatmul.bf16.vlgmr.msra.gmra.mxu3 %v7995_v13  ;;  %v6544_v11 = vor.u32 %v7357_v4, %v6543_v3  ;;  %v5785_v56 = vld [vmem:[%s7836_s27 + $0x7b0] sm:$0xf0]  ;;  %v6031_v57 = vld [vmem:[%s7836_s27 + $0x928] sm:$0xf] }
 0x13a   : > { %3942 = vmatpush.bf16.msrb.mxu1 %v6792_v16  ;;  %3968 = vmatpush.bf16.msrb.mxu3 %v6796_v17  ;;  %v6156_v16 = vor.u32 %v7244_v7, %v6153_v8  ;;  %v4873_v17 = vld [vmem:[%s7836_s27 + $0xa0] sm:$0xf0]  ;;  %v7229_v58 = vld [vmem:[%s7836_s27 + $0x9a4] sm:$0xf0]  ;;  %v7118_v3 = vld [vmem:[%s7836_s27 + $0x634] sm:$0xf] }
 0x13b   : > { %3931 = vmatpush.bf16.msrb.mxu0 %v5512_v24  ;;  %3957 = vmatpush.bf16.msrb.mxu2 %v5516_v25  ;;  %v7212_v24 = vld [vmem:[%s7836_s27 + $0x924] sm:$0xf]  ;;  %v4876_v27 = vor.u32 %v6924_v14, %v4873_v17  ;;  %v7021_v14 = vld [vmem:[%s7836_s27 + $0x32c] sm:$0xf]  ;;  %v7325_v17 = vld [vmem:[%s7836_s27 + $0xca4] sm:$0xf0]  ;;  %v6032_v4 = vor.u32 %v7229_v58, %v6031_v57 }
 0x13c   : > { %v6025_v25 = vld [vmem:[%s7836_s27 + $0x9a0] sm:$0xf0]  ;;  %v5657_v6 = vld [vmem:[%s7836_s27 + $0x6b0] sm:$0xf0]  ;;  %v7326_v58 = vld [vmem:[%s7836_s27 + $0xcac] sm:$0xf0] }
 0x13d   : > { %v6028_v34 = vor.u32 %v7212_v24, %v6025_v25 }
 0x13e   : > { %3943 = vmatpush.bf16.msrb.mxu1 %v6664_v28  ;;  %3969 = vmatpush.bf16.msrb.mxu3 %v6668_v29  ;;  %v5776_v28 = vor.u32 %v7165_v19, %v5775_v18  ;;  %v5780_v29 = vor.u32 %v7149_v20, %v5777_v21  ;;  %v7309_v18 = vld [vmem:[%s7836_s27 + $0xc2c] sm:$0xf] }
 0x13f   : > { %3932 = vmatpush.bf16.msrb.mxu0 %v5384_v36  ;;  %3958 = vmatpush.bf16.msrb.mxu2 %v5388_v37  ;;  %v5895_v36 = vld [vmem:[%s7836_s27 + $0x820] sm:$0xf]  ;;  %v6417_v19 = vld [vmem:[%s7836_s27 + $0xca8] sm:$0xf0] }
 0x140   : > { %v7196_v37 = vld [vmem:[%s7836_s27 + $0x89c] sm:$0xf0]  ;;  %v6420_v25 = vor.u32 %v7309_v18, %v6417_v19 }
 0x141   : > { %v5896_v46 = vor.u32 %v7196_v37, %v5895_v36  ;;  %v6292_v37 = vor.u32 %v7277_v30, %v6289_v31  ;;  %v6681_v30 = vld [vmem:[%s7836_s27 + $0xeb0] sm:$0xf0] }
 0x142   : > { %3944 = vmatpush.bf16.msrb.mxu1 %v6536_v40  ;;  %3970 = vmatpush.bf16.msrb.mxu3 %v6540_v41  ;;  %v6799_v40 = vld [vmem:[%s7836_s27 + $0xf28] sm:$0xf] }
 0x143   : > { %3933 = vmatpush.bf16.msrb.mxu0 %v5256_v48  ;;  %3959 = vmatpush.bf16.msrb.mxu2 %v5260_v49  ;;  %v7421_v41 = vld [vmem:[%s7836_s27 + $0xfa4] sm:$0xf0] }
 0x144   : > { %v5519_v48 = vld [vmem:[%s7836_s27 + $0x528] sm:$0xf]  ;;  %v6800_v50 = vor.u32 %v7421_v41, %v6799_v40 }
 0x145   : > { %v7101_v49 = vld [vmem:[%s7836_s27 + $0x5a4] sm:$0xf0] }
 0x146   : > { %3945 = vmatpush.bf16.msrb.mxu1 %v6408_v53  ;;  %3971 = vmatpush.bf16.msrb.mxu3 %v6412_v54  ;;  %v7085_v53 = vld [vmem:[%s7836_s27 + $0x52c] sm:$0xf]  ;;  %v5520_v59 = vor.u32 %v7101_v49, %v5519_v48  ;;  %v6159_v40 = vld [vmem:[%s7836_s27 + $0xa28] sm:$0xf] }
 0x147   : > { %3934 = vmatpush.bf16.msrb.mxu0 %v5128_v61  ;;  %3960 = vmatpush.bf16.msrb.mxu2 %v5132_v62  ;;  %v5521_v54 = vld [vmem:[%s7836_s27 + $0x5a8] sm:$0xf0]  ;;  %v5391_v61 = vld [vmem:[%s7836_s27 + $0x428] sm:$0xf] }
 0x148   : > { %v5524_v60 = vor.u32 %v7085_v53, %v5521_v54  ;;  %v7069_v62 = vld [vmem:[%s7836_s27 + $0x4a4] sm:$0xf0]  ;;  %v6925_v48 = vld [vmem:[%s7836_s27 + $0x2c] sm:$0xf]  ;;  %v5783_v53 = vld [vmem:[%s7836_s27 + $0x730] sm:$0xf] }
 0x149   : > { %v5392_v7 = vor.u32 %v7069_v62, %v5391_v61  ;;  %v7261_v41 = vld [vmem:[%s7836_s27 + $0xaa4] sm:$0xf0]  ;;  %v7166_v54 = vld [vmem:[%s7836_s27 + $0x7ac] sm:$0xf0] }
 0x14a   : > { %3946 = vmatpush.bf16.msrb.mxu1 %v6280_v1  ;;  %3972 = vmatpush.bf16.msrb.mxu3 %v6284_v2  ;;  %v7053_v1 = vld [vmem:[%s7836_s27 + $0x42c] sm:$0xf]  ;;  %v6160_v49 = vor.u32 %v7261_v41, %v6159_v40  ;;  %v5401_v40 = vld [vmem:[%s7836_s27 + $0x4b0] sm:$0xf0]  ;;  %v6551_v41 = vld [vmem:[%s7836_s27 + $0xd30] sm:$0xf] }
 0x14b   : > { %3935 = vmatpush.bf16.msrb.mxu0 %v5000_v9  ;;  %3961 = vmatpush.bf16.msrb.mxu2 %v5004_v10  ;;  %v5393_v2 = vld [vmem:[%s7836_s27 + $0x4a8] sm:$0xf0]  ;;  %v5263_v9 = vld [vmem:[%s7836_s27 + $0x328] sm:$0xf] }
 0x14c   : > { %v5396_v8 = vor.u32 %v7053_v1, %v5393_v2  ;;  %v7037_v10 = vld [vmem:[%s7836_s27 + $0x3a4] sm:$0xf0]  ;;  %v5655_v1 = vld [vmem:[%s7836_s27 + $0x630] sm:$0xf] }
 0x14d   : > { %v5264_v20 = vor.u32 %v7037_v10, %v5263_v9  ;;  %v7134_v2 = vld [vmem:[%s7836_s27 + $0x6ac] sm:$0xf0]  ;;  %v7181_v9 = vld [vmem:[%s7836_s27 + $0x82c] sm:$0xf] }
 0x14e   : > { %3947 = vmatpush.bf16.msrb.mxu1 %v6152_v15  ;;  %3973 = vmatpush.bf16.msrb.mxu3 %v6156_v16  ;;  %v5265_v15 = vld [vmem:[%s7836_s27 + $0x3a8] sm:$0xf0]  ;;  %v6415_v16 = vld [vmem:[%s7836_s27 + $0xc28] sm:$0xf] }
 0x14f   : > { %3936 = vmatpush.bf16.msrb.mxu0 %v4872_v26  ;;  %3962 = vmatpush.bf16.msrb.mxu2 %v4876_v27  ;;  %v5268_v21 = vor.u32 %v7021_v14, %v5265_v15  ;;  %v6416_v24 = vor.u32 %v7325_v17, %v6415_v16  ;;  %v6989_v26 = vld [vmem:[%s7836_s27 + $0x22c] sm:$0xf]  ;;  %v7406_v14 = vld [vmem:[%s7836_s27 + $0xf34] sm:$0xf]  ;;  %v5656_v16 = vor.u32 %v7134_v2, %v5655_v1  ;;  %v5143_v2 = vld [vmem:[%s7836_s27 + $0x230] sm:$0xf] }
 0x150   : > { %v5137_v27 = vld [vmem:[%s7836_s27 + $0x2a8] sm:$0xf0]  ;;  %v6809_v15 = vld [vmem:[%s7836_s27 + $0xfb0] sm:$0xf0]  ;;  %v5660_v17 = vor.u32 %v7118_v3, %v5657_v6  ;;  %v7006_v3 = vld [vmem:[%s7836_s27 + $0x2ac] sm:$0xf0] }
 0x151   : > { %v5905_v10 = vld [vmem:[%s7836_s27 + $0x8a8] sm:$0xf0]  ;;  %v6990_v6 = vld [vmem:[%s7836_s27 + $0x234] sm:$0xf] }
 0x152   : > { %3948 = vmatpush.bf16.msrb.mxu1 %v6024_v33  ;;  %3974 = vmatpush.bf16.msrb.mxu3 %v6028_v34  ;;  %v5140_v33 = vor.u32 %v6989_v26, %v5137_v27  ;;  %v5007_v34 = vld [vmem:[%s7836_s27 + $0x128] sm:$0xf]  ;;  %v5908_v19 = vor.u32 %v7181_v9, %v5905_v10  ;;  %v8286_v26 = vld [vmem:[%s8283_s9] sm:$0xff]  ;;  %v6679_v27 = vld [vmem:[%s7836_s27 + $0xe30] sm:$0xf] }
 0x153   : > { %3981 = vmatpush.bf16.msra.mxu0 %v5776_v28  ;;  %4007 = vmatpush.bf16.msra.mxu2 %v5780_v29  ;;  %v6287_v28 = vld [vmem:[%s7836_s27 + $0xb28] sm:$0xf]  ;;  %v7294_v10 = vld [vmem:[%s7836_s27 + $0xbac] sm:$0xf0] }
 0x154   : > { %3937 = vmatmul.bf16.vlgmr.msrb.gmra.mxu0 %v7978_v52  ;;  %3963 = vmatmul.bf16.vlgmr.msrb.gmra.mxu2 %v7978_v52  ;;  %v7293_v29 = vld [vmem:[%s7836_s27 + $0xba4] sm:$0xf0] }
 0x155   : > { %v6288_v36 = vor.u32 %v7293_v29, %v6287_v28  ;;  %v7390_v28 = vld [vmem:[%s7836_s27 + $0xeac] sm:$0xf0]  ;;  %v7374_v29 = vld [vmem:[%s7836_s27 + $0xe34] sm:$0xf] }
 0x156   : > { %3949 = vmatpush.bf16.msrb.mxu1 %v5896_v46  ;;  %3975 = vmatpush.bf16.msrb.mxu3 %v5900_v47  ;;  %v4879_v46 = vld [vmem:[%s7836_s27 + $0x28] sm:$0xf] }
 0x157   : > { %3982 = vmatpush.bf16.msra.mxu0 %v5648_v44  ;;  %4008 = vmatpush.bf16.msra.mxu2 %v5652_v45  ;;  %v5008_v44 = vor.u32 %v6973_v35, %v5007_v34  ;;  %v5012_v45 = vor.u32 %v6957_v38, %v5009_v39  ;;  %v6941_v47 = vld [vmem:[%s7836_s27 + $0xa4] sm:$0xf0]  ;;  %v5399_v35 = vld [vmem:[%s7836_s27 + $0x430] sm:$0xf]  ;;  %v6684_v38 = vor.u32 %v7374_v29, %v6681_v30  ;;  %v7054_v39 = vld [vmem:[%s7836_s27 + $0x434] sm:$0xf] }
 0x158   : > { %v4880_v61 = vor.u32 %v6941_v47, %v4879_v46  ;;  %v5404_v47 = vor.u32 %v7054_v39, %v5401_v40  ;;  %v6169_v29 = vld [vmem:[%s7836_s27 + $0xab0] sm:$0xf0] }
 0x159   : > { %3950 = vmatmul.bf16.vlgmr.msrb.gmra.mxu1 %v7995_v13  ;;  %3976 = vmatmul.bf16.vlgmr.msrb.gmra.mxu3 %v7995_v13  ;;  %v4889_v40 = vld [vmem:[%s7836_s27 + $0xb0] sm:$0xf0] }
 0x15a   : > { %3994 = vmatpush.bf16.msra.mxu1 %v6800_v50  ;;  %4020 = vmatpush.bf16.msra.mxu3 %v6804_v51  ;;  %v6164_v50 = vor.u32 %v7245_v42, %v6161_v43  ;;  %v4881_v51 = vld [vmem:[%s7836_s27 + $0xa8] sm:$0xf0]  ;;  %v7358_v42 = vld [vmem:[%s7836_s27 + $0xdac] sm:$0xf0]  ;;  %v7342_v43 = vld [vmem:[%s7836_s27 + $0xd34] sm:$0xf] }
 0x15b   : > { %3983 = vmatpush.bf16.msra.mxu0 %v5520_v59  ;;  %4009 = vmatpush.bf16.msra.mxu2 %v5524_v60  ;;  %v7213_v59 = vld [vmem:[%s7836_s27 + $0x92c] sm:$0xf]  ;;  %v4884_v62 = vor.u32 %v6925_v48, %v4881_v51  ;;  %v5271_v48 = vld [vmem:[%s7836_s27 + $0x330] sm:$0xf]  ;;  %v6552_v51 = vor.u32 %v7358_v42, %v6551_v41  ;;  %v5791_v41 = vld [vmem:[%s7836_s27 + $0x738] sm:$0xf] }
 0x15c   : > { %v6033_v60 = vld [vmem:[%s7836_s27 + $0x9a8] sm:$0xf0]  ;;  %v7167_v42 = vld [vmem:[%s7836_s27 + $0x7b4] sm:$0xf0] }
 0x15d   : > { %v6036_v5 = vor.u32 %v7213_v59, %v6033_v60  ;;  %v7310_v59 = vld [vmem:[%s7836_s27 + $0xc34] sm:$0xf] }
 0x15e   : > { %3995 = vmatpush.bf16.msra.mxu1 %v6672_v63  ;;  %4021 = vmatpush.bf16.msra.mxu3 %v6676_v0  ;;  %v5784_v63 = vor.u32 %v7166_v54, %v5783_v53  ;;  %v5788_v0 = vor.u32 %v7150_v55, %v5785_v56  ;;  %v1098_v54 = vperm.slane %v8286_v26, 1  ;;  %v5273_v55 = vld [vmem:[%s7836_s27 + $0x3b0] sm:$0xf0]  ;;  %v6423_v56 = vld [vmem:[%s7836_s27 + $0xc30] sm:$0xf] }
 0x15f   : > { %3984 = vmatpush.bf16.msra.mxu0 %v5392_v7  ;;  %4010 = vmatpush.bf16.msra.mxu2 %v5396_v8  ;;  %v5903_v7 = vld [vmem:[%s7836_s27 + $0x828] sm:$0xf]  ;;  %v6425_v60 = vld [vmem:[%s7836_s27 + $0xcb0] sm:$0xf0] }
 0x160   : > { %v7197_v8 = vld [vmem:[%s7836_s27 + $0x8a4] sm:$0xf0] }
 0x161   : > { %v5904_v18 = vor.u32 %v7197_v8, %v5903_v7  ;;  %v5145_v7 = vld [vmem:[%s7836_s27 + $0x2b0] sm:$0xf0]  ;;  %v6295_v8 = vld [vmem:[%s7836_s27 + $0xb30] sm:$0xf] }
 0x162   : > { %3996 = vmatpush.bf16.msra.mxu1 %v6544_v11  ;;  %4022 = vmatpush.bf16.msra.mxu3 %v6548_v12  ;;  %v6807_v11 = vld [vmem:[%s7836_s27 + $0xf30] sm:$0xf] }
 0x163   : > { %3985 = vmatpush.bf16.msra.mxu0 %v5264_v20  ;;  %4011 = vmatpush.bf16.msra.mxu2 %v5268_v21  ;;  %v7422_v12 = vld [vmem:[%s7836_s27 + $0xfac] sm:$0xf0] }
 0x164   : > { %v5527_v20 = vld [vmem:[%s7836_s27 + $0x530] sm:$0xf]  ;;  %v6808_v23 = vor.u32 %v7422_v12, %v6807_v11  ;;  %v7278_v11 = vld [vmem:[%s7836_s27 + $0xb34] sm:$0xf] }
 0x165   : > { %v7102_v21 = vld [vmem:[%s7836_s27 + $0x5ac] sm:$0xf0]  ;;  %v6297_v12 = vld [vmem:[%s7836_s27 + $0xbb0] sm:$0xf0] }
 0x166   : > { %3997 = vmatpush.bf16.msra.mxu1 %v6416_v24  ;;  %4023 = vmatpush.bf16.msra.mxu3 %v6420_v25  ;;  %v6812_v24 = vor.u32 %v7406_v14, %v6809_v15  ;;  %v5529_v25 = vld [vmem:[%s7836_s27 + $0x5b0] sm:$0xf0]  ;;  %v5528_v31 = vor.u32 %v7102_v21, %v5527_v20  ;;  %v5144_v14 = vor.u32 %v7006_v3, %v5143_v2 }
 0x167   : > { %3986 = vmatpush.bf16.msra.mxu0 %v5136_v32  ;;  %4012 = vmatpush.bf16.msra.mxu2 %v5140_v33  ;;  %v5532_v32 = vor.u32 %v7086_v22, %v5529_v25  ;;  %v1097_v33 = vperm.slane %v8286_v26, 0  ;;  %v5148_v15 = vor.u32 %v6990_v6, %v5145_v7  ;;  %v6300_v20 = vor.u32 %v7278_v11, %v6297_v12  ;;  %v6958_v21 = vld [vmem:[%s7836_s27 + $0x134] sm:$0xf]  ;;  %v7423_v7 = vld [vmem:[%s7836_s27 + $0xfb4] sm:$0xf0] }
 0x168   : > { %v5017_v22 = vld [vmem:[%s7836_s27 + $0x1b0] sm:$0xf0] }
 0x169   : > { %v7182_v3 = vld [vmem:[%s7836_s27 + $0x834] sm:$0xf] }
 0x16a   : > { %3998 = vmatpush.bf16.msra.mxu1 %v6288_v36  ;;  %4024 = vmatpush.bf16.msra.mxu3 %v6292_v37  ;;  %v7070_v36 = vld [vmem:[%s7836_s27 + $0x4ac] sm:$0xf0]  ;;  %v6680_v37 = vor.u32 %v7390_v28, %v6679_v27  ;;  %v7246_v28 = vld [vmem:[%s7836_s27 + $0xa34] sm:$0xf] }
 0x16b   : > { %3987 = vmatpush.bf16.msra.mxu0 %v5008_v44  ;;  %4013 = vmatpush.bf16.msra.mxu2 %v5012_v45  ;;  %v6553_v44 = vld [vmem:[%s7836_s27 + $0xdb0] sm:$0xf0]  ;;  %v5400_v46 = vor.u32 %v7070_v36, %v5399_v35  ;;  %v7262_v27 = vld [vmem:[%s7836_s27 + $0xaac] sm:$0xf0]  ;;  %v6172_v39 = vor.u32 %v7246_v28, %v6169_v29 }
 0x16c   : > { %v6556_v53 = vor.u32 %v7342_v43, %v6553_v44  ;;  %v6942_v35 = vld [vmem:[%s7836_s27 + $0xac] sm:$0xf0]  ;;  %v6926_v36 = vld [vmem:[%s7836_s27 + $0x34] sm:$0xf]  ;;  %v7151_v43 = vld [vmem:[%s7836_s27 + $0x73c] sm:$0xf] }
 0x16d   : > { %v5793_v44 = vld [vmem:[%s7836_s27 + $0x7b8] sm:$0xf0] }
 0x16e   : > { %3999 = vmatpush.bf16.msra.mxu1 %v6160_v49  ;;  %4025 = vmatpush.bf16.msra.mxu3 %v6164_v50  ;;  %v3730_v34 = vpop.f32.mrf.mxu0  ;;  %v7038_v49 = vld [vmem:[%s7836_s27 + $0x3ac] sm:$0xf0]  ;;  %v7022_v50 = vld [vmem:[%s7836_s27 + $0x334] sm:$0xf] }
 0x16f   : > { %3988 = vmatpush.bf16.msra.mxu0 %v4880_v61  ;;  %4014 = vmatpush.bf16.msra.mxu2 %v4884_v62  ;;  %v3731_v45 = vadd.f32 %v3730_v34, %v1097_v33  ;;  %v5020_v33 = vor.u32 %v6958_v21, %v5017_v22  ;;  %v1099_v34 = vperm.slane %v8286_v26, 2  ;;  %v5537_v21 = vld [vmem:[%s7836_s27 + $0x5b8] sm:$0xf0]  ;;  %v6687_v22 = vld [vmem:[%s7836_s27 + $0xe38] sm:$0xf] }
 0x172   : > { %4000 = vmatpush.bf16.msra.mxu1 %v6032_v4  ;;  %4026 = vmatpush.bf16.msra.mxu3 %v6036_v5  ;;  %v6424_v4 = vor.u32 %v7326_v58, %v6423_v56  ;;  %v6428_v5 = vor.u32 %v7310_v59, %v6425_v60  ;;  %v5663_v56 = vld [vmem:[%s7836_s27 + $0x638] sm:$0xf]  ;;  %v7119_v58 = vld [vmem:[%s7836_s27 + $0x63c] sm:$0xf] }
 0x173   : > { %4033 = vmatpush.bf16.msrb.mxu0 %v5784_v63  ;;  %4059 = vmatpush.bf16.msrb.mxu2 %v5788_v0  ;;  %v5272_v63 = vor.u32 %v7038_v49, %v5271_v48  ;;  %v5276_v0 = vor.u32 %v7022_v50, %v5273_v55  ;;  %v6041_v48 = vld [vmem:[%s7836_s27 + $0x9b0] sm:$0xf0]  ;;  %v4892_v50 = vor.u32 %v6926_v36, %v4889_v40  ;;  %v6559_v40 = vld [vmem:[%s7836_s27 + $0xd38] sm:$0xf] }
 0x174   : > { %3989 = vmatmul.bf16.vlgmr.msra.gmra.mxu0 %v7978_v52  ;;  %4015 = vmatmul.bf16.vlgmr.msra.gmra.mxu2 %v7978_v52  ;;  %v3756_v57 = vpop.f32.mrf.mxu2  ;;  %v5796_v55 = vor.u32 %v7151_v43, %v5793_v44  ;;  %v6561_v43 = vld [vmem:[%s7836_s27 + $0xdb8] sm:$0xf0] }
 0x175   : > { %v3757_v9 = vadd.f32 %v3756_v57, %v1098_v54  ;;  %v5792_v54 = vor.u32 %v7167_v42, %v5791_v41  ;;  %v7135_v57 = vld [vmem:[%s7836_s27 + $0x6b4] sm:$0xf0]  ;;  %v7343_v42 = vld [vmem:[%s7836_s27 + $0xd3c] sm:$0xf] }
 0x176   : > { %4001 = vmatpush.bf16.msra.mxu1 %v5904_v18  ;;  %4027 = vmatpush.bf16.msra.mxu3 %v5908_v19  ;;  %v3743_v61 = vpop.f32.mrf.mxu1  ;;  %v3732_v1 = vpop.f32.mrf.mxu0  ;;  %v6296_v19 = vor.u32 %v7294_v10, %v6295_v8  ;;  %v7407_v8 = vld [vmem:[%s7836_s27 + $0xf3c] sm:$0xf]  ;;  %v5664_v11 = vor.u32 %v7135_v57, %v5663_v56  ;;  %v7359_v41 = vld [vmem:[%s7836_s27 + $0xdb4] sm:$0xf0] }
 0x177   : > { %4034 = vmatpush.bf16.msrb.mxu0 %v5656_v16  ;;  %4060 = vmatpush.bf16.msrb.mxu2 %v5660_v17  ;;  %v3744_v62 = vadd.f32 %v3743_v61, %v3731_v45  ;;  %v5015_v16 = vld [vmem:[%s7836_s27 + $0x130] sm:$0xf]  ;;  %v7327_v56 = vld [vmem:[%s7836_s27 + $0xcb4] sm:$0xf0]  ;;  %v7311_v57 = vld [vmem:[%s7836_s27 + $0xc3c] sm:$0xf] }
 0x178   : > { %v6974_v17 = vld [vmem:[%s7836_s27 + $0x1ac] sm:$0xf0] }
 0x179   : > { %4002 = vmatmul.bf16.vlgmr.msra.gmra.mxu1 %v7995_v13  ;;  %4028 = vmatmul.bf16.vlgmr.msra.gmra.mxu3 %v7995_v13  ;;  %4553 = vst [vmem:[%s8322_s24] sm:$0xff] %v3744_v62  ;;  %v6039_v45 = vld [vmem:[%s7836_s27 + $0x930] sm:$0xf]  ;;  %v5665_v62 = vld [vmem:[%s7836_s27 + $0x6b8] sm:$0xf0] }
 0x17a   : > { %4046 = vmatpush.bf16.msrb.mxu1 %v6808_v23  ;;  %4072 = vmatpush.bf16.msrb.mxu3 %v6812_v24  ;;  %v6167_v23 = vld [vmem:[%s7836_s27 + $0xa30] sm:$0xf]  ;;  %v5668_v12 = vor.u32 %v7119_v58, %v5665_v62  ;;  %v6433_v58 = vld [vmem:[%s7836_s27 + $0xcb8] sm:$0xf0]  ;;  %v5151_v62 = vld [vmem:[%s7836_s27 + $0x238] sm:$0xf] }
 0x17b   : > { %4035 = vmatpush.bf16.msrb.mxu0 %v5528_v31  ;;  %4061 = vmatpush.bf16.msrb.mxu2 %v5532_v32  ;;  %v4887_v31 = vld [vmem:[%s7836_s27 + $0x30] sm:$0xf]  ;;  %v5016_v32 = vor.u32 %v6974_v17, %v5015_v16  ;;  %v5535_v16 = vld [vmem:[%s7836_s27 + $0x538] sm:$0xf] }
 0x17c   : > { %v3769_v18 = vpop.f32.mrf.mxu3  ;;  %v3758_v25 = vpop.f32.mrf.mxu2  ;;  %v4888_v49 = vor.u32 %v6942_v35, %v4887_v31  ;;  %v7103_v17 = vld [vmem:[%s7836_s27 + $0x5b4] sm:$0xf0] }
 0x17d   : > { %v3770_v24 = vadd.f32 %v3769_v18, %v3757_v9  ;;  %v6817_v9 = vld [vmem:[%s7836_s27 + $0xfb8] sm:$0xf0] }
 0x17e   : > { %4047 = vmatpush.bf16.msrb.mxu1 %v6680_v37  ;;  %4073 = vmatpush.bf16.msrb.mxu3 %v6684_v38  ;;  %v3745_v30 = vpop.f32.mrf.mxu1  ;;  %v3782_v37 = vpop.f32.mrf.mxu0  ;;  %v6168_v38 = vor.u32 %v7262_v27, %v6167_v23  ;;  %v7375_v25 = vld [vmem:[%s7836_s27 + $0xe3c] sm:$0xf] }
 0x17f   : > { %4036 = vmatpush.bf16.msrb.mxu0 %v5400_v46  ;;  %4062 = vmatpush.bf16.msrb.mxu2 %v5404_v47  ;;  %4554 = vst [vmem:[%s8322_s24 + $0x8] sm:$0xff] %v3770_v24  ;;  %v7230_v46 = vld [vmem:[%s7836_s27 + $0x9ac] sm:$0xf0]  ;;  %v7214_v47 = vld [vmem:[%s7836_s27 + $0x934] sm:$0xf]  ;;  %v3783_v59 = vadd.f32 %v3782_v37, %v1099_v34  ;;  %v5536_v30 = vor.u32 %v7103_v17, %v5535_v16 }
 0x180   : > { %v6040_v60 = vor.u32 %v7230_v46, %v6039_v45  ;;  %v6044_v61 = vor.u32 %v7214_v47, %v6041_v48  ;;  %v7391_v24 = vld [vmem:[%s7836_s27 + $0xeb4] sm:$0xf0]  ;;  %v6689_v27 = vld [vmem:[%s7836_s27 + $0xeb8] sm:$0xf0]  ;;  %v1101_v45 = vperm.slane %v8286_v26, 4 }
 0x181   : > { %v7055_v34 = vld [vmem:[%s7836_s27 + $0x43c] sm:$0xf]  ;;  %v6688_v37 = vor.u32 %v7391_v24, %v6687_v22  ;;  %v5279_v48 = vld [vmem:[%s7836_s27 + $0x338] sm:$0xf] }
 0x182   : > { %4048 = vmatpush.bf16.msrb.mxu1 %v6552_v51  ;;  %4074 = vmatpush.bf16.msrb.mxu3 %v6556_v53  ;;  %v1100_v51 = vperm.slane %v8286_v26, 3  ;;  %v5023_v17 = vld [vmem:[%s7836_s27 + $0x138] sm:$0xf]  ;;  %v5025_v22 = vld [vmem:[%s7836_s27 + $0x1b8] sm:$0xf0] }
 0x183   : > { %4037 = vmatpush.bf16.msrb.mxu0 %v5272_v63  ;;  %4063 = vmatpush.bf16.msrb.mxu2 %v5276_v0  ;;  %v5911_v63 = vld [vmem:[%s7836_s27 + $0x830] sm:$0xf]  ;;  %v7263_v24 = vld [vmem:[%s7836_s27 + $0xab4] sm:$0xf0] }
 0x184   : > { %v3771_v53 = vpop.f32.mrf.mxu3  ;;  %v7198_v0 = vld [vmem:[%s7836_s27 + $0x8ac] sm:$0xf0]  ;;  %v3808_v2 = vpop.f32.mrf.mxu2 }
 0x185   : > { %v3809_v23 = vadd.f32 %v3808_v2, %v1100_v51  ;;  %v6564_v51 = vor.u32 %v7343_v42, %v6561_v43  ;;  %v7023_v53 = vld [vmem:[%s7836_s27 + $0x33c] sm:$0xf]  ;;  %v7152_v42 = vld [vmem:[%s7836_s27 + $0x744] sm:$0xf] }
 0x186   : > { %4049 = vmatpush.bf16.msrb.mxu1 %v6424_v4  ;;  %4075 = vmatpush.bf16.msrb.mxu3 %v6428_v5  ;;  %v3795_v1 = vpop.f32.mrf.mxu1  ;;  %v5913_v4 = vld [vmem:[%s7836_s27 + $0x8b0] sm:$0xf0]  ;;  %v6815_v5 = vld [vmem:[%s7836_s27 + $0xf38] sm:$0xf]  ;;  %v3784_v10 = vpop.f32.mrf.mxu0 }
 0x187   : > { %4038 = vmatpush.bf16.msrb.mxu0 %v5144_v14  ;;  %4064 = vmatpush.bf16.msrb.mxu2 %v5148_v15  ;;  %v3796_v6 = vadd.f32 %v3795_v1, %v3783_v59  ;;  %v5912_v14 = vor.u32 %v7198_v0, %v5911_v63  ;;  %v5916_v15 = vor.u32 %v7182_v3, %v5913_v4  ;;  %v7007_v63 = vld [vmem:[%s7836_s27 + $0x2b4] sm:$0xf0]  ;;  %v6991_v4 = vld [vmem:[%s7836_s27 + $0x23c] sm:$0xf] }
 0x188   : > { %v6816_v18 = vor.u32 %v7423_v7, %v6815_v5  ;;  %v6436_v3 = vor.u32 %v7311_v57, %v6433_v58  ;;  %v5153_v5 = vld [vmem:[%s7836_s27 + $0x2b8] sm:$0xf0] }
 0x189   : > { %4555 = vst [vmem:[%s8322_s24 + $0x10] sm:$0xff] %v3796_v6  ;;  %v6303_v6 = vld [vmem:[%s7836_s27 + $0xb38] sm:$0xf]  ;;  %v6305_v10 = vld [vmem:[%s7836_s27 + $0xbb8] sm:$0xf0]  ;;  %v5156_v16 = vor.u32 %v6991_v4, %v5153_v5 }
 0x18a   : > { %4050 = vmatpush.bf16.msrb.mxu1 %v6296_v19  ;;  %4076 = vmatpush.bf16.msrb.mxu3 %v6300_v20  ;;  %v6820_v19 = vor.u32 %v7407_v8, %v6817_v9  ;;  %v7087_v20 = vld [vmem:[%s7836_s27 + $0x53c] sm:$0xf]  ;;  %v7295_v8 = vld [vmem:[%s7836_s27 + $0xbb4] sm:$0xf0]  ;;  %v6825_v4 = vld [vmem:[%s7836_s27 + $0xfc0] sm:$0xf0] }
 0x18b   : > { %4039 = vmatpush.bf16.msrb.mxu0 %v5016_v32  ;;  %4065 = vmatpush.bf16.msrb.mxu2 %v5020_v33  ;;  %v5540_v31 = vor.u32 %v7087_v20, %v5537_v21  ;;  %v5407_v32 = vld [vmem:[%s7836_s27 + $0x438] sm:$0xf]  ;;  %v7279_v9 = vld [vmem:[%s7836_s27 + $0xb3c] sm:$0xf]  ;;  %v6304_v20 = vor.u32 %v7295_v8, %v6303_v6 }
 0x18c   : > { %v3821_v28 = vpop.f32.mrf.mxu3  ;;  %v7071_v33 = vld [vmem:[%s7836_s27 + $0x4b4] sm:$0xf0]  ;;  %v3810_v36 = vpop.f32.mrf.mxu2  ;;  %v6308_v21 = vor.u32 %v7279_v9, %v6305_v10  ;;  %v5543_v9 = vld [vmem:[%s7836_s27 + $0x540] sm:$0xf] }
 0x18d   : > { %v3822_v29 = vadd.f32 %v3821_v28, %v3809_v23  ;;  %v5408_v46 = vor.u32 %v7071_v33, %v5407_v32  ;;  %v6175_v23 = vld [vmem:[%s7836_s27 + $0xa38] sm:$0xf]  ;;  %v7104_v10 = vld [vmem:[%s7836_s27 + $0x5bc] sm:$0xf0] }
 0x18e   : > { %4051 = vmatpush.bf16.msrb.mxu1 %v6168_v38  ;;  %4077 = vmatpush.bf16.msrb.mxu3 %v6172_v39  ;;  %v3797_v35 = vpop.f32.mrf.mxu1  ;;  %v6692_v38 = vor.u32 %v7375_v25, %v6689_v27  ;;  %v5409_v39 = vld [vmem:[%s7836_s27 + $0x4b8] sm:$0xf0]  ;;  %v6943_v33 = vld [vmem:[%s7836_s27 + $0xb4] sm:$0xf0] }
 0x18f   : > { %4040 = vmatpush.bf16.msrb.mxu0 %v4888_v49  ;;  %4066 = vmatpush.bf16.msrb.mxu2 %v4892_v50  ;;  %4556 = vst [vmem:[%s8322_s24 + $0x18] sm:$0xff] %v3822_v29  ;;  %v5412_v47 = vor.u32 %v7055_v34, %v5409_v39  ;;  %v7039_v49 = vld [vmem:[%s7836_s27 + $0x3b4] sm:$0xf0]  ;;  %v6560_v50 = vor.u32 %v7359_v41, %v6559_v40  ;;  %v7247_v25 = vld [vmem:[%s7836_s27 + $0xa3c] sm:$0xf] }
 0x190   : > { %v6177_v27 = vld [vmem:[%s7836_s27 + $0xab8] sm:$0xf0]  ;;  %v4895_v29 = vld [vmem:[%s7836_s27 + $0x38] sm:$0xf]  ;;  %v5799_v40 = vld [vmem:[%s7836_s27 + $0x740] sm:$0xf] }
 0x191   : > { %v3834_v44 = vpop.f32.mrf.mxu0  ;;  %v6927_v34 = vld [vmem:[%s7836_s27 + $0x3c] sm:$0xf]  ;;  %v6180_v39 = vor.u32 %v7247_v25, %v6177_v27  ;;  %v7168_v41 = vld [vmem:[%s7836_s27 + $0x7bc] sm:$0xf0]  ;;  %v7056_v27 = vld [vmem:[%s7836_s27 + $0x444] sm:$0xf] }
 0x192   : > { %4052 = vmatpush.bf16.msrb.mxu1 %v6040_v60  ;;  %4078 = vmatpush.bf16.msrb.mxu3 %v6044_v61  ;;  %v5280_v60 = vor.u32 %v7039_v49, %v5279_v48  ;;  %v3835_v0 = vadd.f32 %v3834_v44, %v1101_v45  ;;  %v4897_v35 = vld [vmem:[%s7836_s27 + $0xb8] sm:$0xf0]  ;;  %v5801_v44 = vld [vmem:[%s7836_s27 + $0x7c0] sm:$0xf0]  ;;  %v6047_v45 = vld [vmem:[%s7836_s27 + $0x938] sm:$0xf]  ;;  %v4896_v49 = vor.u32 %v6943_v33, %v4895_v29 }
 0x193   : > { %4085 = vmatpush.bf16.msra.mxu0 %v5792_v54  ;;  %4111 = vmatpush.bf16.msra.mxu2 %v5796_v55  ;;  %v5281_v54 = vld [vmem:[%s7836_s27 + $0x3b8] sm:$0xf0]  ;;  %v6431_v55 = vld [vmem:[%s7836_s27 + $0xc38] sm:$0xf]  ;;  %v6567_v29 = vld [vmem:[%s7836_s27 + $0xd40] sm:$0xf] }
 0x194   : > { %4041 = vmatmul.bf16.vlgmr.msrb.gmra.mxu0 %v7978_v52  ;;  %4067 = vmatmul.bf16.vlgmr.msrb.gmra.mxu2 %v7978_v52  ;;  %v3823_v59 = vpop.f32.mrf.mxu3  ;;  %v5284_v61 = vor.u32 %v7023_v53, %v5281_v54  ;;  %v6432_v2 = vor.u32 %v7327_v56, %v6431_v55  ;;  %v6049_v48 = vld [vmem:[%s7836_s27 + $0x9b8] sm:$0xf0]  ;;  %v5804_v53 = vor.u32 %v7152_v42, %v5801_v44  ;;  %v5671_v54 = vld [vmem:[%s7836_s27 + $0x640] sm:$0xf]  ;;  %v7120_v56 = vld [vmem:[%s7836_s27 + $0x644] sm:$0xf] }
 0x195   : > { %v7136_v55 = vld [vmem:[%s7836_s27 + $0x6bc] sm:$0xf0]  ;;  %v5673_v59 = vld [vmem:[%s7836_s27 + $0x6c0] sm:$0xf0] }
 0x196   : > { %4053 = vmatpush.bf16.msrb.mxu1 %v5912_v14  ;;  %4079 = vmatpush.bf16.msrb.mxu3 %v5916_v15  ;;  %v3847_v7 = vpop.f32.mrf.mxu1  ;;  %v5152_v15 = vor.u32 %v7007_v63, %v5151_v62  ;;  %v7183_v62 = vld [vmem:[%s7836_s27 + $0x83c] sm:$0xf]  ;;  %v5672_v5 = vor.u32 %v7136_v55, %v5671_v54  ;;  %v5676_v6 = vor.u32 %v7120_v56, %v5673_v59  ;;  %v6569_v33 = vld [vmem:[%s7836_s27 + $0xdc0] sm:$0xf0]  ;;  %v7328_v44 = vld [vmem:[%s7836_s27 + $0xcbc] sm:$0xf0] }
 0x197   : > { %4086 = vmatpush.bf16.msra.mxu0 %v5664_v11  ;;  %4112 = vmatpush.bf16.msra.mxu2 %v5668_v12  ;;  %v3860_v1 = vpop.f32.mrf.mxu2  ;;  %v3848_v11 = vadd.f32 %v3847_v7, %v3835_v0  ;;  %v1102_v12 = vperm.slane %v8286_v26, 5  ;;  %v5921_v63 = vld [vmem:[%s7836_s27 + $0x8b8] sm:$0xf0]  ;;  %v6823_v0 = vld [vmem:[%s7836_s27 + $0xf40] sm:$0xf] }
 0x198   : > { %v5924_v8 = vor.u32 %v7183_v62, %v5921_v63  ;;  %v5289_v42 = vld [vmem:[%s7836_s27 + $0x3c0] sm:$0xf0]  ;;  %v5159_v54 = vld [vmem:[%s7836_s27 + $0x240] sm:$0xf] }
 0x199   : > { %4054 = vmatmul.bf16.vlgmr.msrb.gmra.mxu1 %v7995_v13  ;;  %4080 = vmatmul.bf16.vlgmr.msrb.gmra.mxu3 %v7995_v13  ;;  %v3836_v14 = vpop.f32.mrf.mxu0  ;;  %4557 = vst [vmem:[%s8322_s24 + $0x20] sm:$0xff] %v3848_v11  ;;  %v3861_v28 = vadd.f32 %v3860_v1, %v1102_v12  ;;  %v7008_v55 = vld [vmem:[%s7836_s27 + $0x2bc] sm:$0xf0]  ;;  %v6992_v59 = vld [vmem:[%s7836_s27 + $0x244] sm:$0xf] }
 0x19a   : > { %4098 = vmatpush.bf16.msra.mxu1 %v6816_v18  ;;  %4124 = vmatpush.bf16.msra.mxu3 %v6820_v19  ;;  %v6975_v18 = vld [vmem:[%s7836_s27 + $0x1b4] sm:$0xf0]  ;;  %v6959_v19 = vld [vmem:[%s7836_s27 + $0x13c] sm:$0xf]  ;;  %v7088_v14 = vld [vmem:[%s7836_s27 + $0x544] sm:$0xf] }
 0x19b   : > { %4087 = vmatpush.bf16.msra.mxu0 %v5536_v30  ;;  %4113 = vmatpush.bf16.msra.mxu2 %v5540_v31  ;;  %v5024_v31 = vor.u32 %v6975_v18, %v5023_v17  ;;  %v5028_v32 = vor.u32 %v6959_v19, %v5025_v22  ;;  %v7392_v17 = vld [vmem:[%s7836_s27 + $0xebc] sm:$0xf0]  ;;  %v7376_v18 = vld [vmem:[%s7836_s27 + $0xe44] sm:$0xf] }
 0x19c   : > { %v3873_v30 = vpop.f32.mrf.mxu3  ;;  %v6697_v19 = vld [vmem:[%s7836_s27 + $0xec0] sm:$0xf0]  ;;  %v5415_v22 = vld [vmem:[%s7836_s27 + $0x440] sm:$0xf] }
 0x19d   : > { %v3874_v36 = vadd.f32 %v3873_v30, %v3861_v28  ;;  %v6700_v25 = vor.u32 %v7376_v18, %v6697_v19  ;;  %v5417_v28 = vld [vmem:[%s7836_s27 + $0x4c0] sm:$0xf0]  ;;  %v7296_v63 = vld [vmem:[%s7836_s27 + $0xbbc] sm:$0xf0] }
 0x19e   : > { %4099 = vmatpush.bf16.msra.mxu1 %v6688_v37  ;;  %4125 = vmatpush.bf16.msra.mxu3 %v6692_v38  ;;  %v6176_v38 = vor.u32 %v7263_v24, %v6175_v23  ;;  %v3849_v43 = vpop.f32.mrf.mxu1  ;;  %v7072_v23 = vld [vmem:[%s7836_s27 + $0x4bc] sm:$0xf0] }
 0x19f   : > { %4088 = vmatpush.bf16.msra.mxu0 %v5408_v46  ;;  %4114 = vmatpush.bf16.msra.mxu2 %v5412_v47  ;;  %v3862_v37 = vpop.f32.mrf.mxu2  ;;  %v7231_v46 = vld [vmem:[%s7836_s27 + $0x9b4] sm:$0xf0]  ;;  %4558 = vst [vmem:[%s8322_s24 + $0x28] sm:$0xff] %v3874_v36  ;;  %v7215_v47 = vld [vmem:[%s7836_s27 + $0x93c] sm:$0xf]  ;;  %v5420_v36 = vor.u32 %v7056_v27, %v5417_v28 }
 0x1a0   : > { %v6048_v57 = vor.u32 %v7231_v46, %v6047_v45  ;;  %v6052_v58 = vor.u32 %v7215_v47, %v6049_v48  ;;  %v5287_v37 = vld [vmem:[%s7836_s27 + $0x340] sm:$0xf]  ;;  %v7312_v45 = vld [vmem:[%s7836_s27 + $0xc44] sm:$0xf]  ;;  %v5807_v28 = vld [vmem:[%s7836_s27 + $0x748] sm:$0xf] }
 0x1a1   : > { %v6439_v43 = vld [vmem:[%s7836_s27 + $0xc40] sm:$0xf]  ;;  %v6441_v46 = vld [vmem:[%s7836_s27 + $0xcc0] sm:$0xf0] }
 0x1a2   : > { %4100 = vmatpush.bf16.msra.mxu1 %v6560_v50  ;;  %4126 = vmatpush.bf16.msra.mxu3 %v6564_v51  ;;  %v4900_v50 = vor.u32 %v6927_v34, %v4897_v35  ;;  %v5800_v51 = vor.u32 %v7168_v41, %v5799_v40  ;;  %v1103_v34 = vperm.slane %v8286_v26, 6  ;;  %v5416_v35 = vor.u32 %v7072_v23, %v5415_v22  ;;  %v7024_v41 = vld [vmem:[%s7836_s27 + $0x344] sm:$0xf]  ;;  %v6944_v22 = vld [vmem:[%s7836_s27 + $0xbc] sm:$0xf0] }
 0x1a3   : > { %4089 = vmatpush.bf16.msra.mxu0 %v5280_v60  ;;  %4115 = vmatpush.bf16.msra.mxu2 %v5284_v61  ;;  %v5919_v60 = vld [vmem:[%s7836_s27 + $0x838] sm:$0xf]  ;;  %v6928_v23 = vld [vmem:[%s7836_s27 + $0x44] sm:$0xf] }
 0x1a4   : > { %v7199_v61 = vld [vmem:[%s7836_s27 + $0x8b4] sm:$0xf0]  ;;  %v3875_v1 = vpop.f32.mrf.mxu3 }
 0x1a5   : > { %v5920_v7 = vor.u32 %v7199_v61, %v5919_v60  ;;  %v5161_v60 = vld [vmem:[%s7836_s27 + $0x2c0] sm:$0xf0]  ;;  %v6311_v61 = vld [vmem:[%s7836_s27 + $0xb40] sm:$0xf]  ;;  %v5160_v1 = vor.u32 %v7008_v55, %v5159_v54  ;;  %v7409_v54 = vld [vmem:[%s7836_s27 + $0xf4c] sm:$0xf] }
 0x1a6   : > { %4101 = vmatpush.bf16.msra.mxu1 %v6432_v2  ;;  %4127 = vmatpush.bf16.msra.mxu3 %v6436_v3  ;;  %v7424_v2 = vld [vmem:[%s7836_s27 + $0xfbc] sm:$0xf0]  ;;  %v7408_v3 = vld [vmem:[%s7836_s27 + $0xf44] sm:$0xf]  ;;  %v6833_v55 = vld [vmem:[%s7836_s27 + $0xfc8] sm:$0xf0] }
 0x1a7   : > { %4090 = vmatpush.bf16.msra.mxu0 %v5152_v15  ;;  %4116 = vmatpush.bf16.msra.mxu2 %v5156_v16  ;;  %v6824_v11 = vor.u32 %v7424_v2, %v6823_v0  ;;  %v6828_v12 = vor.u32 %v7408_v3, %v6825_v4  ;;  %v5545_v15 = vld [vmem:[%s7836_s27 + $0x5c0] sm:$0xf0]  ;;  %v6695_v16 = vld [vmem:[%s7836_s27 + $0xe40] sm:$0xf]  ;;  %v5164_v2 = vor.u32 %v6992_v59, %v5161_v60  ;;  %v5551_v60 = vld [vmem:[%s7836_s27 + $0x548] sm:$0xf] }
 0x1a8   : > { %v6696_v24 = vor.u32 %v7392_v17, %v6695_v16  ;;  %v7280_v0 = vld [vmem:[%s7836_s27 + $0xb44] sm:$0xf]  ;;  %v5031_v3 = vld [vmem:[%s7836_s27 + $0x140] sm:$0xf] }
 0x1a9   : > { %v6976_v4 = vld [vmem:[%s7836_s27 + $0x1bc] sm:$0xf0] }
 0x1aa   : > { %4102 = vmatpush.bf16.msra.mxu1 %v6304_v20  ;;  %4128 = vmatpush.bf16.msra.mxu3 %v6308_v21  ;;  %v5544_v20 = vor.u32 %v7104_v10, %v5543_v9  ;;  %v5548_v21 = vor.u32 %v7088_v14, %v5545_v15  ;;  %v5033_v9 = vld [vmem:[%s7836_s27 + $0x1c0] sm:$0xf0]  ;;  %v6183_v10 = vld [vmem:[%s7836_s27 + $0xa40] sm:$0xf]  ;;  %v5032_v18 = vor.u32 %v6976_v4, %v5031_v3  ;;  %v7377_v3 = vld [vmem:[%s7836_s27 + $0xe4c] sm:$0xf] }
 0x1ab   : > { %4091 = vmatpush.bf16.msra.mxu0 %v5024_v31  ;;  %4117 = vmatpush.bf16.msra.mxu2 %v5028_v32  ;;  %v7360_v31 = vld [vmem:[%s7836_s27 + $0xdbc] sm:$0xf0]  ;;  %v7344_v32 = vld [vmem:[%s7836_s27 + $0xd44] sm:$0xf]  ;;  %v6705_v4 = vld [vmem:[%s7836_s27 + $0xec8] sm:$0xf0] }
 0x1ac   : > { %v6572_v40 = vor.u32 %v7344_v32, %v6569_v33  ;;  %v7248_v14 = vld [vmem:[%s7836_s27 + $0xa44] sm:$0xf]  ;;  %v4903_v17 = vld [vmem:[%s7836_s27 + $0x40] sm:$0xf] }
 0x1ad   : > { %v6185_v15 = vld [vmem:[%s7836_s27 + $0xac0] sm:$0xf0]  ;;  %v6055_v32 = vld [vmem:[%s7836_s27 + $0x940] sm:$0xf] }
 0x1ae   : > { %4103 = vmatpush.bf16.msra.mxu1 %v6176_v38  ;;  %4129 = vmatpush.bf16.msra.mxu3 %v6180_v39  ;;  %v7040_v38 = vld [vmem:[%s7836_s27 + $0x3bc] sm:$0xf0]  ;;  %v6568_v39 = vor.u32 %v7360_v31, %v6567_v29  ;;  %v6188_v27 = vor.u32 %v7248_v14, %v6185_v15  ;;  %v7169_v29 = vld [vmem:[%s7836_s27 + $0x7c4] sm:$0xf0]  ;;  %v5809_v31 = vld [vmem:[%s7836_s27 + $0x7c8] sm:$0xf0] }
 0x1af   : > { %4092 = vmatpush.bf16.msra.mxu0 %v4896_v49  ;;  %4118 = vmatpush.bf16.msra.mxu2 %v4900_v50  ;;  %v5288_v48 = vor.u32 %v7040_v38, %v5287_v37  ;;  %v5292_v49 = vor.u32 %v7024_v41, %v5289_v42  ;;  %v7232_v33 = vld [vmem:[%s7836_s27 + $0x9bc] sm:$0xf0]  ;;  %v5808_v38 = vor.u32 %v7169_v29, %v5807_v28  ;;  %v7137_v41 = vld [vmem:[%s7836_s27 + $0x6c4] sm:$0xf0]  ;;  %v7121_v42 = vld [vmem:[%s7836_s27 + $0x64c] sm:$0xf] }
 0x1b0   : > { %v5425_v14 = vld [vmem:[%s7836_s27 + $0x4c8] sm:$0xf0]  ;;  %v6575_v15 = vld [vmem:[%s7836_s27 + $0xd48] sm:$0xf] }
 0x1b1   : > { %v3886_v30 = vpop.f32.mrf.mxu0  ;;  %v7025_v28 = vld [vmem:[%s7836_s27 + $0x34c] sm:$0xf] }
 0x1b2   : > { %4104 = vmatpush.bf16.msra.mxu1 %v6048_v57  ;;  %4130 = vmatpush.bf16.msra.mxu3 %v6052_v58  ;;  %v3887_v47 = vadd.f32 %v3886_v30, %v1103_v34  ;;  %v6440_v57 = vor.u32 %v7328_v44, %v6439_v43  ;;  %v6444_v58 = vor.u32 %v7312_v45, %v6441_v46  ;;  %v7153_v30 = vld [vmem:[%s7836_s27 + $0x74c] sm:$0xf]  ;;  %v7216_v34 = vld [vmem:[%s7836_s27 + $0x944] sm:$0xf] }
 0x1b3   : > { %4137 = vmatpush.bf16.msrb.mxu0 %v5800_v51  ;;  %4163 = vmatpush.bf16.msrb.mxu2 %v5804_v53  ;;  %v1104_v51 = vperm.slane %v8286_v26, 7  ;;  %v6313_v26 = vld [vmem:[%s7836_s27 + $0xbc0] sm:$0xf0]  ;;  %v6056_v43 = vor.u32 %v7232_v33, %v6055_v32  ;;  %v5681_v46 = vld [vmem:[%s7836_s27 + $0x6c8] sm:$0xf0] }
 0x1b4   : > { %4093 = vmatmul.bf16.vlgmr.msra.gmra.mxu0 %v7978_v52  ;;  %4119 = vmatmul.bf16.vlgmr.msra.gmra.mxu2 %v7978_v52  ;;  %v5297_v29 = vld [vmem:[%s7836_s27 + $0x3c8] sm:$0xf0] }
 0x1b5   : > { %v7313_v32 = vld [vmem:[%s7836_s27 + $0xc4c] sm:$0xf] }
 0x1b6   : > { %4105 = vmatpush.bf16.msra.mxu1 %v5920_v7  ;;  %4131 = vmatpush.bf16.msra.mxu3 %v5924_v8  ;;  %v3899_v50 = vpop.f32.mrf.mxu1  ;;  %v6316_v7 = vor.u32 %v7280_v0, %v6313_v26  ;;  %v6960_v8 = vld [vmem:[%s7836_s27 + $0x144] sm:$0xf]  ;;  %v7089_v0 = vld [vmem:[%s7836_s27 + $0x54c] sm:$0xf] }
 0x1b7   : > { %4138 = vmatpush.bf16.msrb.mxu0 %v5672_v5  ;;  %4164 = vmatpush.bf16.msrb.mxu2 %v5676_v6  ;;  %v3912_v53 = vpop.f32.mrf.mxu2  ;;  %v3900_v56 = vadd.f32 %v3899_v50, %v3887_v47  ;;  %v6312_v6 = vor.u32 %v7296_v63, %v6311_v61  ;;  %v5036_v19 = vor.u32 %v6960_v8, %v5033_v9  ;;  %v5927_v47 = vld [vmem:[%s7836_s27 + $0x840] sm:$0xf]  ;;  %v5929_v50 = vld [vmem:[%s7836_s27 + $0x8c0] sm:$0xf0]  ;;  %v7105_v61 = vld [vmem:[%s7836_s27 + $0x5c4] sm:$0xf0] }
 0x1b8   : > { %v3913_v5 = vadd.f32 %v3912_v53, %v1104_v51  ;;  %v6831_v51 = vld [vmem:[%s7836_s27 + $0xf48] sm:$0xf]  ;;  %v6836_v63 = vor.u32 %v7409_v54, %v6833_v55  ;;  %v5553_v26 = vld [vmem:[%s7836_s27 + $0x5c8] sm:$0xf0] }
 0x1b9   : > { %4106 = vmatmul.bf16.vlgmr.msra.gmra.mxu1 %v7995_v13  ;;  %4132 = vmatmul.bf16.vlgmr.msra.gmra.mxu3 %v7995_v13  ;;  %v3888_v62 = vpop.f32.mrf.mxu0  ;;  %4559 = vst [vmem:[%s8322_s24 + $0x30] sm:$0xff] %v3900_v56  ;;  %v7425_v53 = vld [vmem:[%s7836_s27 + $0xfc4] sm:$0xf0]  ;;  %v6449_v33 = vld [vmem:[%s7836_s27 + $0xcc8] sm:$0xf0] }
 0x1ba   : > { %4150 = vmatpush.bf16.msrb.mxu1 %v6824_v11  ;;  %4176 = vmatpush.bf16.msrb.mxu3 %v6828_v12  ;;  %v7264_v12 = vld [vmem:[%s7836_s27 + $0xabc] sm:$0xf0]  ;;  %v6832_v62 = vor.u32 %v7425_v53, %v6831_v51  ;;  %v5423_v8 = vld [vmem:[%s7836_s27 + $0x448] sm:$0xf]  ;;  %v6321_v51 = vld [vmem:[%s7836_s27 + $0xbc8] sm:$0xf0] }
 0x1bb   : > { %4139 = vmatpush.bf16.msrb.mxu0 %v5544_v20  ;;  %4165 = vmatpush.bf16.msrb.mxu2 %v5548_v21  ;;  %v7073_v9 = vld [vmem:[%s7836_s27 + $0x4c4] sm:$0xf0] }
 0x1bc   : > { %v3925_v11 = vpop.f32.mrf.mxu3  ;;  %v5039_v55 = vld [vmem:[%s7836_s27 + $0x148] sm:$0xf] }
 0x1bd   : > { %v3926_v16 = vadd.f32 %v3925_v11, %v3913_v5  ;;  %v5552_v5 = vor.u32 %v7105_v61, %v5551_v60  ;;  %v6708_v11 = vor.u32 %v7377_v3, %v6705_v4  ;;  %v6961_v60 = vld [vmem:[%s7836_s27 + $0x14c] sm:$0xf]  ;;  %v4911_v3 = vld [vmem:[%s7836_s27 + $0x48] sm:$0xf] }
 0x1be   : > { %4151 = vmatpush.bf16.msrb.mxu1 %v6696_v24  ;;  %4177 = vmatpush.bf16.msrb.mxu3 %v6700_v25  ;;  %v3901_v20 = vpop.f32.mrf.mxu1  ;;  %v4905_v24 = vld [vmem:[%s7836_s27 + $0xc0] sm:$0xf0]  ;;  %v6184_v25 = vor.u32 %v7264_v12, %v6183_v10  ;;  %v7057_v12 = vld [vmem:[%s7836_s27 + $0x44c] sm:$0xf] }
 0x1bf   : > { %4140 = vmatpush.bf16.msrb.mxu0 %v5416_v35  ;;  %4166 = vmatpush.bf16.msrb.mxu2 %v5420_v36  ;;  %v3914_v21 = vpop.f32.mrf.mxu2  ;;  %4560 = vst [vmem:[%s8322_s24 + $0x38] sm:$0xff] %v3926_v16  ;;  %v6057_v35 = vld [vmem:[%s7836_s27 + $0x9c0] sm:$0xf0]  ;;  %v4904_v36 = vor.u32 %v6944_v22, %v4903_v17  ;;  %v4908_v37 = vor.u32 %v6928_v23, %v4905_v24  ;;  %v7361_v17 = vld [vmem:[%s7836_s27 + $0xdc4] sm:$0xf0] }
 0x1c0   : > { %v6060_v44 = vor.u32 %v7216_v34, %v6057_v35  ;;  %v5424_v21 = vor.u32 %v7073_v9, %v5423_v8  ;;  %v5428_v22 = vor.u32 %v7057_v12, %v5425_v14  ;;  %v5295_v23 = vld [vmem:[%s7836_s27 + $0x348] sm:$0xf]  ;;  %v5041_v61 = vld [vmem:[%s7836_s27 + $0x1c8] sm:$0xf0] }
 0x1c1   : > { %v7041_v24 = vld [vmem:[%s7836_s27 + $0x3c4] sm:$0xf0] }
 0x1c2   : > { %4152 = vmatpush.bf16.msrb.mxu1 %v6568_v39  ;;  %4178 = vmatpush.bf16.msrb.mxu3 %v6572_v40  ;;  %v5812_v39 = vor.u32 %v7153_v30, %v5809_v31  ;;  %v5679_v40 = vld [vmem:[%s7836_s27 + $0x648] sm:$0xf]  ;;  %v5296_v35 = vor.u32 %v7041_v24, %v5295_v23 }
 0x1c3   : > { %4141 = vmatpush.bf16.msrb.mxu0 %v5288_v48  ;;  %4167 = vmatpush.bf16.msrb.mxu2 %v5292_v49  ;;  %v7200_v48 = vld [vmem:[%s7836_s27 + $0x8bc] sm:$0xf0]  ;;  %v7184_v49 = vld [vmem:[%s7836_s27 + $0x844] sm:$0xf]  ;;  %v5680_v56 = vor.u32 %v7137_v41, %v5679_v40  ;;  %v6447_v30 = vld [vmem:[%s7836_s27 + $0xc48] sm:$0xf] }
 0x1c4   : > { %v3927_v45 = vpop.f32.mrf.mxu3  ;;  %v5932_v59 = vor.u32 %v7184_v49, %v5929_v50  ;;  %v7329_v31 = vld [vmem:[%s7836_s27 + $0xcc4] sm:$0xf0]  ;;  %v7281_v50 = vld [vmem:[%s7836_s27 + $0xb4c] sm:$0xf] }
 0x1c5   : > { %v5167_v40 = vld [vmem:[%s7836_s27 + $0x248] sm:$0xf]  ;;  %v6993_v45 = vld [vmem:[%s7836_s27 + $0x24c] sm:$0xf] }
 0x1c6   : > { %4153 = vmatpush.bf16.msrb.mxu1 %v6440_v57  ;;  %4179 = vmatpush.bf16.msrb.mxu3 %v6444_v58  ;;  %v5684_v57 = vor.u32 %v7121_v42, %v5681_v46  ;;  %v5928_v58 = vor.u32 %v7200_v48, %v5927_v47  ;;  %v7009_v41 = vld [vmem:[%s7836_s27 + $0x2c4] sm:$0xf0]  ;;  %v5169_v46 = vld [vmem:[%s7836_s27 + $0x2c8] sm:$0xf0] }
 0x1c7   : > { %4142 = vmatpush.bf16.msrb.mxu0 %v5160_v1  ;;  %4168 = vmatpush.bf16.msrb.mxu2 %v5164_v2  ;;  %v6703_v1 = vld [vmem:[%s7836_s27 + $0xe48] sm:$0xf]  ;;  %v5168_v53 = vor.u32 %v7009_v41, %v5167_v40  ;;  %v5172_v54 = vor.u32 %v6993_v45, %v5169_v46  ;;  %v7426_v40 = vld [vmem:[%s7836_s27 + $0xfcc] sm:$0xf0]  ;;  %v7410_v41 = vld [vmem:[%s7836_s27 + $0xf54] sm:$0xf] }
 0x1c8   : > { %v7393_v2 = vld [vmem:[%s7836_s27 + $0xec4] sm:$0xf0] }
 0x1c9   : > { %v6704_v10 = vor.u32 %v7393_v2, %v6703_v1  ;;  %v6319_v47 = vld [vmem:[%s7836_s27 + $0xb48] sm:$0xf]  ;;  %v6193_v1 = vld [vmem:[%s7836_s27 + $0xac8] sm:$0xf0] }
 0x1ca   : > { %4154 = vmatpush.bf16.msrb.mxu1 %v6312_v6  ;;  %4180 = vmatpush.bf16.msrb.mxu3 %v6316_v7  ;;  %v5556_v6 = vor.u32 %v7089_v0, %v5553_v26  ;;  %v8525_v7 = vld [vmem:[%s8283_s9 + $0x8] sm:$0xff] }
 0x1cb   : > { %4143 = vmatpush.bf16.msrb.mxu0 %v5032_v18  ;;  %4169 = vmatpush.bf16.msrb.mxu2 %v5036_v19  ;;  %v7345_v18 = vld [vmem:[%s7836_s27 + $0xd4c] sm:$0xf]  ;;  %v1105_v20 = vperm.slane %v8525_v7, 0  ;;  %v7297_v49 = vld [vmem:[%s7836_s27 + $0xbc4] sm:$0xf0] }
 0x1cc   : > { %v6577_v19 = vld [vmem:[%s7836_s27 + $0xdc8] sm:$0xf0]  ;;  %v7265_v0 = vld [vmem:[%s7836_s27 + $0xac4] sm:$0xf0] }
 0x1cd   : > { %v7249_v26 = vld [vmem:[%s7836_s27 + $0xa4c] sm:$0xf]  ;;  %v6945_v9 = vld [vmem:[%s7836_s27 + $0xc4] sm:$0xf0] }
 0x1ce   : > { %4155 = vmatpush.bf16.msrb.mxu1 %v6184_v25  ;;  %4181 = vmatpush.bf16.msrb.mxu3 %v6188_v27  ;;  %v6576_v25 = vor.u32 %v7361_v17, %v6575_v15  ;;  %v6580_v27 = vor.u32 %v7345_v18, %v6577_v19  ;;  %v6196_v14 = vor.u32 %v7249_v26, %v6193_v1  ;;  %v5815_v15 = vld [vmem:[%s7836_s27 + $0x750] sm:$0xf]  ;;  %v7154_v17 = vld [vmem:[%s7836_s27 + $0x754] sm:$0xf]  ;;  %v6063_v19 = vld [vmem:[%s7836_s27 + $0x948] sm:$0xf] }
 0x1cf   : > { %4144 = vmatpush.bf16.msrb.mxu0 %v4904_v36  ;;  %4170 = vmatpush.bf16.msrb.mxu2 %v4908_v37  ;;  %v5300_v36 = vor.u32 %v7025_v28, %v5297_v29  ;;  %v5817_v18 = vld [vmem:[%s7836_s27 + $0x7d0] sm:$0xf0]  ;;  %v4912_v23 = vor.u32 %v6945_v9, %v4911_v3  ;;  %v5687_v28 = vld [vmem:[%s7836_s27 + $0x650] sm:$0xf] }
 0x1d0   : > { %v7138_v29 = vld [vmem:[%s7836_s27 + $0x6cc] sm:$0xf0]  ;;  %v5433_v26 = vld [vmem:[%s7836_s27 + $0x4d0] sm:$0xf0] }
 0x1d1   : > { %v3938_v16 = vpop.f32.mrf.mxu0  ;;  %v6583_v1 = vld [vmem:[%s7836_s27 + $0xd50] sm:$0xf] }
 0x1d2   : > { %4156 = vmatpush.bf16.msrb.mxu1 %v6056_v43  ;;  %4182 = vmatpush.bf16.msrb.mxu3 %v6060_v44  ;;  %v3939_v34 = vadd.f32 %v3938_v16, %v1105_v20  ;;  %v6448_v43 = vor.u32 %v7329_v31, %v6447_v30  ;;  %v6452_v44 = vor.u32 %v7313_v32, %v6449_v33  ;;  %v7170_v16 = vld [vmem:[%s7836_s27 + $0x7cc] sm:$0xf0]  ;;  %v7233_v20 = vld [vmem:[%s7836_s27 + $0x9c4] sm:$0xf0]  ;;  %v7122_v30 = vld [vmem:[%s7836_s27 + $0x654] sm:$0xf] }
 0x1d3   : > { %4189 = vmatpush.bf16.msra.mxu0 %v5808_v38  ;;  %4215 = vmatpush.bf16.msra.mxu2 %v5812_v39  ;;  %v1106_v38 = vperm.slane %v8525_v7, 1  ;;  %v6064_v31 = vor.u32 %v7233_v20, %v6063_v19  ;;  %v7362_v3 = vld [vmem:[%s7836_s27 + $0xdcc] sm:$0xf0]  ;;  %v7314_v19 = vld [vmem:[%s7836_s27 + $0xc54] sm:$0xf] }
 0x1d4   : > { %4145 = vmatmul.bf16.vlgmr.msrb.gmra.mxu0 %v7978_v52  ;;  %4171 = vmatmul.bf16.vlgmr.msrb.gmra.mxu2 %v7978_v52  ;;  %v6457_v20 = vld [vmem:[%s7836_s27 + $0xcd0] sm:$0xf0] }
 0x1d6   : > { %4157 = vmatpush.bf16.msrb.mxu1 %v5928_v58  ;;  %4183 = vmatpush.bf16.msrb.mxu3 %v5932_v59  ;;  %v3951_v37 = vpop.f32.mrf.mxu1  ;;  %v6320_v58 = vor.u32 %v7297_v49, %v6319_v47  ;;  %v6324_v59 = vor.u32 %v7281_v50, %v6321_v51  ;;  %v5559_v47 = vld [vmem:[%s7836_s27 + $0x550] sm:$0xf]  ;;  %v7090_v51 = vld [vmem:[%s7836_s27 + $0x554] sm:$0xf] }
 0x1d7   : > { %4190 = vmatpush.bf16.msra.mxu0 %v5680_v56  ;;  %4216 = vmatpush.bf16.msra.mxu2 %v5684_v57  ;;  %v3964_v39 = vpop.f32.mrf.mxu2  ;;  %v3952_v42 = vadd.f32 %v3951_v37, %v3939_v34  ;;  %v6977_v56 = vld [vmem:[%s7836_s27 + $0x1c4] sm:$0xf0]  ;;  %v5689_v34 = vld [vmem:[%s7836_s27 + $0x6d0] sm:$0xf0]  ;;  %v7185_v37 = vld [vmem:[%s7836_s27 + $0x84c] sm:$0xf] }
 0x1d8   : > { %v3965_v57 = vadd.f32 %v3964_v39, %v1106_v38  ;;  %v5040_v4 = vor.u32 %v6977_v56, %v5039_v55  ;;  %v5937_v38 = vld [vmem:[%s7836_s27 + $0x8c8] sm:$0xf0]  ;;  %v6839_v39 = vld [vmem:[%s7836_s27 + $0xf50] sm:$0xf]  ;;  %v7378_v56 = vld [vmem:[%s7836_s27 + $0xe54] sm:$0xf] }
 0x1d9   : > { %4158 = vmatmul.bf16.vlgmr.msrb.gmra.mxu1 %v7995_v13  ;;  %4184 = vmatmul.bf16.vlgmr.msrb.gmra.mxu3 %v7995_v13  ;;  %v3940_v48 = vpop.f32.mrf.mxu0  ;;  %4561 = vst [vmem:[%s8322_s24 + $0x40] sm:$0xff] %v3952_v42  ;;  %v6841_v42 = vld [vmem:[%s7836_s27 + $0xfd0] sm:$0xf0]  ;;  %v5940_v46 = vor.u32 %v7185_v37, %v5937_v38  ;;  %v6840_v49 = vor.u32 %v7426_v40, %v6839_v39  ;;  %v7394_v55 = vld [vmem:[%s7836_s27 + $0xecc] sm:$0xf0] }
 0x1da   : > { %4202 = vmatpush.bf16.msra.mxu1 %v6832_v62  ;;  %4228 = vmatpush.bf16.msra.mxu3 %v6836_v63  ;;  %v6191_v62 = vld [vmem:[%s7836_s27 + $0xa48] sm:$0xf]  ;;  %v7106_v48 = vld [vmem:[%s7836_s27 + $0x5cc] sm:$0xf0]  ;;  %v6844_v50 = vor.u32 %v7410_v41, %v6841_v42  ;;  %v7282_v38 = vld [vmem:[%s7836_s27 + $0xb54] sm:$0xf] }
 0x1db   : > { %4191 = vmatpush.bf16.msra.mxu0 %v5552_v5  ;;  %4217 = vmatpush.bf16.msra.mxu2 %v5556_v6  ;;  %v5044_v5 = vor.u32 %v6961_v60, %v5041_v61  ;;  %v6192_v12 = vor.u32 %v7265_v0, %v6191_v62  ;;  %v5431_v60 = vld [vmem:[%s7836_s27 + $0x450] sm:$0xf]  ;;  %v7058_v0 = vld [vmem:[%s7836_s27 + $0x454] sm:$0xf] }
 0x1dc   : > { %v3977_v63 = vpop.f32.mrf.mxu3  ;;  %v7074_v61 = vld [vmem:[%s7836_s27 + $0x4cc] sm:$0xf0]  ;;  %v5436_v9 = vor.u32 %v7058_v0, %v5433_v26  ;;  %v6329_v39 = vld [vmem:[%s7836_s27 + $0xbd0] sm:$0xf0] }
 0x1dd   : > { %v3978_v2 = vadd.f32 %v3977_v63, %v3965_v57  ;;  %v6713_v57 = vld [vmem:[%s7836_s27 + $0xed0] sm:$0xf0]  ;;  %v7298_v37 = vld [vmem:[%s7836_s27 + $0xbcc] sm:$0xf0] }
 0x1de   : > { %4203 = vmatpush.bf16.msra.mxu1 %v6704_v10  ;;  %4229 = vmatpush.bf16.msra.mxu3 %v6708_v11  ;;  %v3953_v6 = vpop.f32.mrf.mxu1  ;;  %v6929_v10 = vld [vmem:[%s7836_s27 + $0x4c] sm:$0xf]  ;;  %v6716_v63 = vor.u32 %v7378_v56, %v6713_v57  ;;  %v5047_v42 = vld [vmem:[%s7836_s27 + $0x150] sm:$0xf] }
 0x1df   : > { %4192 = vmatpush.bf16.msra.mxu0 %v5424_v21  ;;  %4218 = vmatpush.bf16.msra.mxu2 %v5428_v22  ;;  %v3966_v8 = vpop.f32.mrf.mxu2  ;;  %v4913_v11 = vld [vmem:[%s7836_s27 + $0xc8] sm:$0xf0]  ;;  %4562 = vst [vmem:[%s8322_s24 + $0x48] sm:$0xff] %v3978_v2  ;;  %v1107_v6 = vperm.slane %v8525_v7, 2  ;;  %v4919_v56 = vld [vmem:[%s7836_s27 + $0x50] sm:$0xf] }
 0x1e0   : > { %v7217_v21 = vld [vmem:[%s7836_s27 + $0x94c] sm:$0xf]  ;;  %v4916_v24 = vor.u32 %v6929_v10, %v4913_v11  ;;  %v5432_v8 = vor.u32 %v7074_v61, %v5431_v60  ;;  %v5303_v10 = vld [vmem:[%s7836_s27 + $0x350] sm:$0xf] }
 0x1e1   : > { %v6065_v22 = vld [vmem:[%s7836_s27 + $0x9c8] sm:$0xf0]  ;;  %v7042_v11 = vld [vmem:[%s7836_s27 + $0x3cc] sm:$0xf0] }
 0x1e2   : > { %4204 = vmatpush.bf16.msra.mxu1 %v6576_v25  ;;  %4230 = vmatpush.bf16.msra.mxu3 %v6580_v27  ;;  %v5816_v25 = vor.u32 %v7170_v16, %v5815_v15  ;;  %v5820_v27 = vor.u32 %v7154_v17, %v5817_v18  ;;  %v6068_v32 = vor.u32 %v7217_v21, %v6065_v22  ;;  %v7026_v15 = vld [vmem:[%s7836_s27 + $0x354] sm:$0xf]  ;;  %v6455_v17 = vld [vmem:[%s7836_s27 + $0xc50] sm:$0xf] }
 0x1e3   : > { %4193 = vmatpush.bf16.msra.mxu0 %v5296_v35  ;;  %4219 = vmatpush.bf16.msra.mxu2 %v5300_v36  ;;  %v5935_v35 = vld [vmem:[%s7836_s27 + $0x848] sm:$0xf]  ;;  %v5305_v16 = vld [vmem:[%s7836_s27 + $0x3d0] sm:$0xf0]  ;;  %v7330_v18 = vld [vmem:[%s7836_s27 + $0xccc] sm:$0xf0]  ;;  %v5304_v22 = vor.u32 %v7042_v11, %v5303_v10 }
 0x1e4   : > { %v3979_v33 = vpop.f32.mrf.mxu3  ;;  %v7201_v36 = vld [vmem:[%s7836_s27 + $0x8c4] sm:$0xf0]  ;;  %v6946_v61 = vld [vmem:[%s7836_s27 + $0xcc] sm:$0xf0] }
 0x1e5   : > { %v5936_v45 = vor.u32 %v7201_v36, %v5935_v35  ;;  %v6994_v33 = vld [vmem:[%s7836_s27 + $0x254] sm:$0xf]  ;;  %v6327_v35 = vld [vmem:[%s7836_s27 + $0xb50] sm:$0xf]  ;;  %v4920_v10 = vor.u32 %v6946_v61, %v4919_v56  ;;  %v7363_v56 = vld [vmem:[%s7836_s27 + $0xdd4] sm:$0xf0] }
 0x1e6   : > { %4205 = vmatpush.bf16.msra.mxu1 %v6448_v43  ;;  %4231 = vmatpush.bf16.msra.mxu3 %v6452_v44  ;;  %v5688_v43 = vor.u32 %v7138_v29, %v5687_v28  ;;  %v5692_v44 = vor.u32 %v7122_v30, %v5689_v34  ;;  %v5175_v28 = vld [vmem:[%s7836_s27 + $0x250] sm:$0xf]  ;;  %v5177_v34 = vld [vmem:[%s7836_s27 + $0x2d0] sm:$0xf0] }
 0x1e7   : > { %4194 = vmatpush.bf16.msra.mxu0 %v5168_v53  ;;  %4220 = vmatpush.bf16.msra.mxu2 %v5172_v54  ;;  %v5561_v53 = vld [vmem:[%s7836_s27 + $0x5d0] sm:$0xf0]  ;;  %v6711_v54 = vld [vmem:[%s7836_s27 + $0xe50] sm:$0xf]  ;;  %v5180_v41 = vor.u32 %v6994_v33, %v5177_v34 }
 0x1e8   : > { %v6712_v62 = vor.u32 %v7394_v55, %v6711_v54  ;;  %v7010_v29 = vld [vmem:[%s7836_s27 + $0x2cc] sm:$0xf0]  ;;  %v6201_v54 = vld [vmem:[%s7836_s27 + $0xad0] sm:$0xf0] }
 0x1e9   : > { %v5176_v40 = vor.u32 %v7010_v29, %v5175_v28  ;;  %v7427_v28 = vld [vmem:[%s7836_s27 + $0xfd4] sm:$0xf0]  ;;  %v7411_v29 = vld [vmem:[%s7836_s27 + $0xf5c] sm:$0xf] }
 0x1ea   : > { %4206 = vmatpush.bf16.msra.mxu1 %v6320_v58  ;;  %4232 = vmatpush.bf16.msra.mxu3 %v6324_v59  ;;  %v5560_v58 = vor.u32 %v7106_v48, %v5559_v47  ;;  %v5564_v59 = vor.u32 %v7090_v51, %v5561_v53  ;;  %v6962_v47 = vld [vmem:[%s7836_s27 + $0x154] sm:$0xf]  ;;  %v7266_v51 = vld [vmem:[%s7836_s27 + $0xacc] sm:$0xf0] }
 0x1eb   : > { %4195 = vmatpush.bf16.msra.mxu0 %v5040_v4  ;;  %4221 = vmatpush.bf16.msra.mxu2 %v5044_v5  ;;  %v7346_v4 = vld [vmem:[%s7836_s27 + $0xd54] sm:$0xf] }
 0x1ec   : > { %v6585_v5 = vld [vmem:[%s7836_s27 + $0xdd0] sm:$0xf0] }
 0x1ed   : > { %v5049_v48 = vld [vmem:[%s7836_s27 + $0x1d0] sm:$0xf0] }
 0x1ee   : > { %4207 = vmatpush.bf16.msra.mxu1 %v6192_v12  ;;  %4233 = vmatpush.bf16.msra.mxu3 %v6196_v14  ;;  %v6584_v12 = vor.u32 %v7362_v3, %v6583_v1  ;;  %v6588_v14 = vor.u32 %v7346_v4, %v6585_v5  ;;  %v7250_v53 = vld [vmem:[%s7836_s27 + $0xa54] sm:$0xf]  ;;  %v5823_v1 = vld [vmem:[%s7836_s27 + $0x758] sm:$0xf]  ;;  %v7155_v3 = vld [vmem:[%s7836_s27 + $0x75c] sm:$0xf] }
 0x1ef   : > { %4196 = vmatpush.bf16.msra.mxu0 %v4912_v23  ;;  %4222 = vmatpush.bf16.msra.mxu2 %v4916_v24  ;;  %v5308_v23 = vor.u32 %v7026_v15, %v5305_v16  ;;  %v6204_v26 = vor.u32 %v7250_v53, %v6201_v54  ;;  %v5825_v4 = vld [vmem:[%s7836_s27 + $0x7d8] sm:$0xf0]  ;;  %v6071_v5 = vld [vmem:[%s7836_s27 + $0x950] sm:$0xf]  ;;  %v5695_v15 = vld [vmem:[%s7836_s27 + $0x658] sm:$0xf] }
 0x1f0   : > { %v7139_v16 = vld [vmem:[%s7836_s27 + $0x6d4] sm:$0xf0]  ;;  %v5441_v53 = vld [vmem:[%s7836_s27 + $0x4d8] sm:$0xf0] }
 0x1f1   : > { %v3990_v2 = vpop.f32.mrf.mxu0  ;;  %v6591_v54 = vld [vmem:[%s7836_s27 + $0xd58] sm:$0xf] }
 0x1f2   : > { %4208 = vmatpush.bf16.msra.mxu1 %v6064_v31  ;;  %4234 = vmatpush.bf16.msra.mxu3 %v6068_v32  ;;  %v3991_v21 = vadd.f32 %v3990_v2, %v1107_v6  ;;  %v6456_v31 = vor.u32 %v7330_v18, %v6455_v17  ;;  %v6460_v32 = vor.u32 %v7314_v19, %v6457_v20  ;;  %v7171_v2 = vld [vmem:[%s7836_s27 + $0x7d4] sm:$0xf0]  ;;  %v7234_v6 = vld [vmem:[%s7836_s27 + $0x9cc] sm:$0xf0]  ;;  %v7123_v17 = vld [vmem:[%s7836_s27 + $0x65c] sm:$0xf] }
 0x1f3   : > { %4241 = vmatpush.bf16.msrb.mxu0 %v5816_v25  ;;  %4267 = vmatpush.bf16.msrb.mxu2 %v5820_v27  ;;  %v1108_v25 = vperm.slane %v8525_v7, 3  ;;  %v6072_v18 = vor.u32 %v7234_v6, %v6071_v5  ;;  %v7315_v5 = vld [vmem:[%s7836_s27 + $0xc5c] sm:$0xf] }
 0x1f4   : > { %4197 = vmatmul.bf16.vlgmr.msra.gmra.mxu0 %v7978_v52  ;;  %4223 = vmatmul.bf16.vlgmr.msra.gmra.mxu2 %v7978_v52  ;;  %v6465_v6 = vld [vmem:[%s7836_s27 + $0xcd8] sm:$0xf0] }
 0x1f6   : > { %4209 = vmatpush.bf16.msra.mxu1 %v5936_v45  ;;  %4235 = vmatpush.bf16.msra.mxu3 %v5940_v46  ;;  %v4003_v24 = vpop.f32.mrf.mxu1  ;;  %v6328_v45 = vor.u32 %v7298_v37, %v6327_v35  ;;  %v6332_v46 = vor.u32 %v7282_v38, %v6329_v39  ;;  %v5567_v35 = vld [vmem:[%s7836_s27 + $0x558] sm:$0xf]  ;;  %v7091_v39 = vld [vmem:[%s7836_s27 + $0x55c] sm:$0xf] }
 0x1f7   : > { %4242 = vmatpush.bf16.msrb.mxu0 %v5688_v43  ;;  %4268 = vmatpush.bf16.msrb.mxu2 %v5692_v44  ;;  %v4016_v27 = vpop.f32.mrf.mxu2  ;;  %v4004_v30 = vadd.f32 %v4003_v24, %v3991_v21  ;;  %v6978_v43 = vld [vmem:[%s7836_s27 + $0x1cc] sm:$0xf0]  ;;  %v5697_v21 = vld [vmem:[%s7836_s27 + $0x6d8] sm:$0xf0]  ;;  %v7186_v24 = vld [vmem:[%s7836_s27 + $0x854] sm:$0xf] }
 0x1f8   : > { %v4017_v44 = vadd.f32 %v4016_v27, %v1108_v25  ;;  %v5048_v57 = vor.u32 %v6978_v43, %v5047_v42  ;;  %v5945_v25 = vld [vmem:[%s7836_s27 + $0x8d0] sm:$0xf0]  ;;  %v6847_v27 = vld [vmem:[%s7836_s27 + $0xf58] sm:$0xf]  ;;  %v7379_v43 = vld [vmem:[%s7836_s27 + $0xe5c] sm:$0xf] }
 0x1f9   : > { %4210 = vmatmul.bf16.vlgmr.msra.gmra.mxu1 %v7995_v13  ;;  %4236 = vmatmul.bf16.vlgmr.msra.gmra.mxu3 %v7995_v13  ;;  %v3992_v36 = vpop.f32.mrf.mxu0  ;;  %4563 = vst [vmem:[%s8322_s24 + $0x50] sm:$0xff] %v4004_v30  ;;  %v6849_v30 = vld [vmem:[%s7836_s27 + $0xfd8] sm:$0xf0]  ;;  %v5948_v34 = vor.u32 %v7186_v24, %v5945_v25  ;;  %v6848_v37 = vor.u32 %v7427_v28, %v6847_v27  ;;  %v7395_v42 = vld [vmem:[%s7836_s27 + $0xed4] sm:$0xf0] }
 0x1fa   : > { %4254 = vmatpush.bf16.msrb.mxu1 %v6840_v49  ;;  %4280 = vmatpush.bf16.msrb.mxu3 %v6844_v50  ;;  %v6199_v49 = vld [vmem:[%s7836_s27 + $0xa50] sm:$0xf]  ;;  %v7107_v36 = vld [vmem:[%s7836_s27 + $0x5d4] sm:$0xf0]  ;;  %v6852_v38 = vor.u32 %v7411_v29, %v6849_v30  ;;  %v7283_v25 = vld [vmem:[%s7836_s27 + $0xb5c] sm:$0xf] }
 0x1fb   : > { %4243 = vmatpush.bf16.msrb.mxu0 %v5560_v58  ;;  %4269 = vmatpush.bf16.msrb.mxu2 %v5564_v59  ;;  %v5052_v58 = vor.u32 %v6962_v47, %v5049_v48  ;;  %v6200_v0 = vor.u32 %v7266_v51, %v6199_v49  ;;  %v5439_v47 = vld [vmem:[%s7836_s27 + $0x458] sm:$0xf]  ;;  %v7059_v51 = vld [vmem:[%s7836_s27 + $0x45c] sm:$0xf] }
 0x1fc   : > { %v4029_v50 = vpop.f32.mrf.mxu3  ;;  %v7075_v48 = vld [vmem:[%s7836_s27 + $0x4d4] sm:$0xf0]  ;;  %v5444_v61 = vor.u32 %v7059_v51, %v5441_v53  ;;  %v6337_v27 = vld [vmem:[%s7836_s27 + $0xbd8] sm:$0xf0] }
 0x1fd   : > { %v4030_v55 = vadd.f32 %v4029_v50, %v4017_v44  ;;  %v6721_v44 = vld [vmem:[%s7836_s27 + $0xed8] sm:$0xf0]  ;;  %v7299_v24 = vld [vmem:[%s7836_s27 + $0xbd4] sm:$0xf0] }
 0x1fe   : > { %4255 = vmatpush.bf16.msrb.mxu1 %v6712_v62  ;;  %4281 = vmatpush.bf16.msrb.mxu3 %v6716_v63  ;;  %v4005_v59 = vpop.f32.mrf.mxu1  ;;  %v6930_v62 = vld [vmem:[%s7836_s27 + $0x54] sm:$0xf]  ;;  %v6724_v50 = vor.u32 %v7379_v43, %v6721_v44  ;;  %v5055_v30 = vld [vmem:[%s7836_s27 + $0x158] sm:$0xf] }
 0x1ff   : > { %4244 = vmatpush.bf16.msrb.mxu0 %v5432_v8  ;;  %4270 = vmatpush.bf16.msrb.mxu2 %v5436_v9  ;;  %v4018_v60 = vpop.f32.mrf.mxu2  ;;  %v4921_v63 = vld [vmem:[%s7836_s27 + $0xd0] sm:$0xf0]  ;;  %4564 = vst [vmem:[%s8322_s24 + $0x58] sm:$0xff] %v4030_v55  ;;  %v1109_v59 = vperm.slane %v8525_v7, 4  ;;  %v4927_v43 = vld [vmem:[%s7836_s27 + $0x58] sm:$0xf] }
 0x200   : > { %v7218_v8 = vld [vmem:[%s7836_s27 + $0x954] sm:$0xf]  ;;  %v4924_v11 = vor.u32 %v6930_v62, %v4921_v63  ;;  %v5440_v60 = vor.u32 %v7075_v48, %v5439_v47  ;;  %v5311_v62 = vld [vmem:[%s7836_s27 + $0x358] sm:$0xf] }
 0x201   : > { %v6073_v9 = vld [vmem:[%s7836_s27 + $0x9d0] sm:$0xf0]  ;;  %v7043_v63 = vld [vmem:[%s7836_s27 + $0x3d4] sm:$0xf0] }
 0x202   : > { %4256 = vmatpush.bf16.msrb.mxu1 %v6584_v12  ;;  %4282 = vmatpush.bf16.msrb.mxu3 %v6588_v14  ;;  %v5824_v12 = vor.u32 %v7171_v2, %v5823_v1  ;;  %v5828_v14 = vor.u32 %v7155_v3, %v5825_v4  ;;  %v6076_v19 = vor.u32 %v7218_v8, %v6073_v9  ;;  %v7027_v1 = vld [vmem:[%s7836_s27 + $0x35c] sm:$0xf]  ;;  %v6463_v3 = vld [vmem:[%s7836_s27 + $0xc58] sm:$0xf] }
 0x203   : > { %4245 = vmatpush.bf16.msrb.mxu0 %v5304_v22  ;;  %4271 = vmatpush.bf16.msrb.mxu2 %v5308_v23  ;;  %v5943_v22 = vld [vmem:[%s7836_s27 + $0x850] sm:$0xf]  ;;  %v5313_v2 = vld [vmem:[%s7836_s27 + $0x3d8] sm:$0xf0]  ;;  %v7331_v4 = vld [vmem:[%s7836_s27 + $0xcd4] sm:$0xf0]  ;;  %v5312_v9 = vor.u32 %v7043_v63, %v5311_v62 }
 0x204   : > { %v4031_v20 = vpop.f32.mrf.mxu3  ;;  %v7202_v23 = vld [vmem:[%s7836_s27 + $0x8cc] sm:$0xf0]  ;;  %v6947_v48 = vld [vmem:[%s7836_s27 + $0xd4] sm:$0xf0] }
 0x205   : > { %v5944_v33 = vor.u32 %v7202_v23, %v5943_v22  ;;  %v6995_v20 = vld [vmem:[%s7836_s27 + $0x25c] sm:$0xf]  ;;  %v6335_v22 = vld [vmem:[%s7836_s27 + $0xb58] sm:$0xf]  ;;  %v4928_v62 = vor.u32 %v6947_v48, %v4927_v43  ;;  %v7364_v43 = vld [vmem:[%s7836_s27 + $0xddc] sm:$0xf0] }
 0x206   : > { %4257 = vmatpush.bf16.msrb.mxu1 %v6456_v31  ;;  %4283 = vmatpush.bf16.msrb.mxu3 %v6460_v32  ;;  %v5696_v31 = vor.u32 %v7139_v16, %v5695_v15  ;;  %v5700_v32 = vor.u32 %v7123_v17, %v5697_v21  ;;  %v5183_v15 = vld [vmem:[%s7836_s27 + $0x258] sm:$0xf]  ;;  %v5185_v21 = vld [vmem:[%s7836_s27 + $0x2d8] sm:$0xf0] }
 0x207   : > { %4246 = vmatpush.bf16.msrb.mxu0 %v5176_v40  ;;  %4272 = vmatpush.bf16.msrb.mxu2 %v5180_v41  ;;  %v5569_v40 = vld [vmem:[%s7836_s27 + $0x5d8] sm:$0xf0]  ;;  %v6719_v41 = vld [vmem:[%s7836_s27 + $0xe58] sm:$0xf]  ;;  %v5188_v29 = vor.u32 %v6995_v20, %v5185_v21 }
 0x208   : > { %v6720_v49 = vor.u32 %v7395_v42, %v6719_v41  ;;  %v7011_v16 = vld [vmem:[%s7836_s27 + $0x2d4] sm:$0xf0]  ;;  %v6209_v41 = vld [vmem:[%s7836_s27 + $0xad8] sm:$0xf0] }
 0x209   : > { %v5184_v28 = vor.u32 %v7011_v16, %v5183_v15  ;;  %v7428_v15 = vld [vmem:[%s7836_s27 + $0xfdc] sm:$0xf0]  ;;  %v7412_v16 = vld [vmem:[%s7836_s27 + $0xf64] sm:$0xf] }
 0x20a   : > { %4258 = vmatpush.bf16.msrb.mxu1 %v6328_v45  ;;  %4284 = vmatpush.bf16.msrb.mxu3 %v6332_v46  ;;  %v5568_v45 = vor.u32 %v7107_v36, %v5567_v35  ;;  %v5572_v46 = vor.u32 %v7091_v39, %v5569_v40  ;;  %v6963_v35 = vld [vmem:[%s7836_s27 + $0x15c] sm:$0xf]  ;;  %v7267_v39 = vld [vmem:[%s7836_s27 + $0xad4] sm:$0xf0] }
 0x20b   : > { %4247 = vmatpush.bf16.msrb.mxu0 %v5048_v57  ;;  %4273 = vmatpush.bf16.msrb.mxu2 %v5052_v58  ;;  %v7347_v57 = vld [vmem:[%s7836_s27 + $0xd5c] sm:$0xf] }
 0x20c   : > { %v6593_v58 = vld [vmem:[%s7836_s27 + $0xdd8] sm:$0xf0] }
 0x20d   : > { %v5057_v36 = vld [vmem:[%s7836_s27 + $0x1d8] sm:$0xf0] }
 0x20e   : > { %4259 = vmatpush.bf16.msrb.mxu1 %v6200_v0  ;;  %4285 = vmatpush.bf16.msrb.mxu3 %v6204_v26  ;;  %v6592_v0 = vor.u32 %v7363_v56, %v6591_v54  ;;  %v6596_v26 = vor.u32 %v7347_v57, %v6593_v58  ;;  %v7251_v40 = vld [vmem:[%s7836_s27 + $0xa5c] sm:$0xf]  ;;  %v5831_v54 = vld [vmem:[%s7836_s27 + $0x760] sm:$0xf]  ;;  %v7156_v56 = vld [vmem:[%s7836_s27 + $0x764] sm:$0xf] }
 0x20f   : > { %4248 = vmatpush.bf16.msrb.mxu0 %v4920_v10  ;;  %4274 = vmatpush.bf16.msrb.mxu2 %v4924_v11  ;;  %v5316_v10 = vor.u32 %v7027_v1, %v5313_v2  ;;  %v6212_v53 = vor.u32 %v7251_v40, %v6209_v41  ;;  %v5833_v57 = vld [vmem:[%s7836_s27 + $0x7e0] sm:$0xf0]  ;;  %v6079_v58 = vld [vmem:[%s7836_s27 + $0x958] sm:$0xf]  ;;  %v5703_v1 = vld [vmem:[%s7836_s27 + $0x660] sm:$0xf] }
 0x210   : > { %v7140_v2 = vld [vmem:[%s7836_s27 + $0x6dc] sm:$0xf0]  ;;  %v5449_v40 = vld [vmem:[%s7836_s27 + $0x4e0] sm:$0xf0] }
 0x211   : > { %v4042_v55 = vpop.f32.mrf.mxu0  ;;  %v6599_v41 = vld [vmem:[%s7836_s27 + $0xd60] sm:$0xf] }
 0x212   : > { %4260 = vmatpush.bf16.msrb.mxu1 %v6072_v18  ;;  %4286 = vmatpush.bf16.msrb.mxu3 %v6076_v19  ;;  %v4043_v8 = vadd.f32 %v4042_v55, %v1109_v59  ;;  %v6464_v18 = vor.u32 %v7331_v4, %v6463_v3  ;;  %v6468_v19 = vor.u32 %v7315_v5, %v6465_v6  ;;  %v7172_v55 = vld [vmem:[%s7836_s27 + $0x7dc] sm:$0xf0]  ;;  %v7235_v59 = vld [vmem:[%s7836_s27 + $0x9d4] sm:$0xf0]  ;;  %v7124_v3 = vld [vmem:[%s7836_s27 + $0x664] sm:$0xf] }
 0x213   : > { %4293 = vmatpush.bf16.msra.mxu0 %v5824_v12  ;;  %4319 = vmatpush.bf16.msra.mxu2 %v5828_v14  ;;  %v1110_v12 = vperm.slane %v8525_v7, 5  ;;  %v6080_v4 = vor.u32 %v7235_v59, %v6079_v58  ;;  %v7316_v58 = vld [vmem:[%s7836_s27 + $0xc64] sm:$0xf] }
 0x214   : > { %4249 = vmatmul.bf16.vlgmr.msrb.gmra.mxu0 %v7978_v52  ;;  %4275 = vmatmul.bf16.vlgmr.msrb.gmra.mxu2 %v7978_v52  ;;  %v6473_v59 = vld [vmem:[%s7836_s27 + $0xce0] sm:$0xf0] }
 0x216   : > { %4261 = vmatpush.bf16.msrb.mxu1 %v5944_v33  ;;  %4287 = vmatpush.bf16.msrb.mxu3 %v5948_v34  ;;  %v4055_v11 = vpop.f32.mrf.mxu1  ;;  %v6336_v33 = vor.u32 %v7299_v24, %v6335_v22  ;;  %v6340_v34 = vor.u32 %v7283_v25, %v6337_v27  ;;  %v5575_v22 = vld [vmem:[%s7836_s27 + $0x560] sm:$0xf]  ;;  %v7092_v27 = vld [vmem:[%s7836_s27 + $0x564] sm:$0xf] }
 0x217   : > { %4294 = vmatpush.bf16.msra.mxu0 %v5696_v31  ;;  %4320 = vmatpush.bf16.msra.mxu2 %v5700_v32  ;;  %v4068_v14 = vpop.f32.mrf.mxu2  ;;  %v4056_v17 = vadd.f32 %v4055_v11, %v4043_v8  ;;  %v6979_v31 = vld [vmem:[%s7836_s27 + $0x1d4] sm:$0xf0]  ;;  %v5705_v8 = vld [vmem:[%s7836_s27 + $0x6e0] sm:$0xf0]  ;;  %v7187_v11 = vld [vmem:[%s7836_s27 + $0x85c] sm:$0xf] }
 0x218   : > { %v4069_v32 = vadd.f32 %v4068_v14, %v1110_v12  ;;  %v5056_v44 = vor.u32 %v6979_v31, %v5055_v30  ;;  %v5953_v12 = vld [vmem:[%s7836_s27 + $0x8d8] sm:$0xf0]  ;;  %v6855_v14 = vld [vmem:[%s7836_s27 + $0xf60] sm:$0xf]  ;;  %v7380_v31 = vld [vmem:[%s7836_s27 + $0xe64] sm:$0xf] }
 0x219   : > { %4262 = vmatmul.bf16.vlgmr.msrb.gmra.mxu1 %v7995_v13  ;;  %4288 = vmatmul.bf16.vlgmr.msrb.gmra.mxu3 %v7995_v13  ;;  %v4044_v23 = vpop.f32.mrf.mxu0  ;;  %4565 = vst [vmem:[%s8322_s24 + $0x60] sm:$0xff] %v4056_v17  ;;  %v6857_v17 = vld [vmem:[%s7836_s27 + $0xfe0] sm:$0xf0]  ;;  %v5956_v21 = vor.u32 %v7187_v11, %v5953_v12  ;;  %v6856_v24 = vor.u32 %v7428_v15, %v6855_v14  ;;  %v7396_v30 = vld [vmem:[%s7836_s27 + $0xedc] sm:$0xf0] }
 0x21a   : > { %4306 = vmatpush.bf16.msra.mxu1 %v6848_v37  ;;  %4332 = vmatpush.bf16.msra.mxu3 %v6852_v38  ;;  %v6207_v37 = vld [vmem:[%s7836_s27 + $0xa58] sm:$0xf]  ;;  %v7108_v23 = vld [vmem:[%s7836_s27 + $0x5dc] sm:$0xf0]  ;;  %v6860_v25 = vor.u32 %v7412_v16, %v6857_v17  ;;  %v7284_v12 = vld [vmem:[%s7836_s27 + $0xb64] sm:$0xf] }
 0x21b   : > { %4295 = vmatpush.bf16.msra.mxu0 %v5568_v45  ;;  %4321 = vmatpush.bf16.msra.mxu2 %v5572_v46  ;;  %v5060_v45 = vor.u32 %v6963_v35, %v5057_v36  ;;  %v6208_v51 = vor.u32 %v7267_v39, %v6207_v37  ;;  %v5447_v35 = vld [vmem:[%s7836_s27 + $0x460] sm:$0xf]  ;;  %v7060_v39 = vld [vmem:[%s7836_s27 + $0x464] sm:$0xf] }
 0x21c   : > { %v4081_v38 = vpop.f32.mrf.mxu3  ;;  %v7076_v36 = vld [vmem:[%s7836_s27 + $0x4dc] sm:$0xf0]  ;;  %v5452_v48 = vor.u32 %v7060_v39, %v5449_v40  ;;  %v5839_v40 = vld [vmem:[%s7836_s27 + $0x768] sm:$0xf] }
 0x21d   : > { %v4082_v42 = vadd.f32 %v4081_v38, %v4069_v32  ;;  %v6729_v32 = vld [vmem:[%s7836_s27 + $0xee0] sm:$0xf0]  ;;  %v7300_v11 = vld [vmem:[%s7836_s27 + $0xbdc] sm:$0xf0] }
 0x21e   : > { %4307 = vmatpush.bf16.msra.mxu1 %v6720_v49  ;;  %4333 = vmatpush.bf16.msra.mxu3 %v6724_v50  ;;  %v4057_v46 = vpop.f32.mrf.mxu1  ;;  %v6931_v49 = vld [vmem:[%s7836_s27 + $0x5c] sm:$0xf]  ;;  %v6732_v38 = vor.u32 %v7380_v31, %v6729_v32  ;;  %v5063_v16 = vld [vmem:[%s7836_s27 + $0x160] sm:$0xf] }
 0x21f   : > { %4296 = vmatpush.bf16.msra.mxu0 %v5440_v60  ;;  %4322 = vmatpush.bf16.msra.mxu2 %v5444_v61  ;;  %v4070_v47 = vpop.f32.mrf.mxu2  ;;  %v4929_v50 = vld [vmem:[%s7836_s27 + $0xd8] sm:$0xf0]  ;;  %4566 = vst [vmem:[%s8322_s24 + $0x68] sm:$0xff] %v4082_v42  ;;  %v1111_v46 = vperm.slane %v8525_v7, 6  ;;  %v6980_v17 = vld [vmem:[%s7836_s27 + $0x1dc] sm:$0xf0] }
 0x220   : > { %v7219_v60 = vld [vmem:[%s7836_s27 + $0x95c] sm:$0xf]  ;;  %v4932_v63 = vor.u32 %v6931_v49, %v4929_v50  ;;  %v5448_v47 = vor.u32 %v7076_v36, %v5447_v35  ;;  %v5319_v49 = vld [vmem:[%s7836_s27 + $0x360] sm:$0xf]  ;;  %v5064_v31 = vor.u32 %v6980_v17, %v5063_v16  ;;  %v6932_v36 = vld [vmem:[%s7836_s27 + $0x64] sm:$0xf] }
 0x221   : > { %v6081_v61 = vld [vmem:[%s7836_s27 + $0x9d8] sm:$0xf0]  ;;  %v7044_v50 = vld [vmem:[%s7836_s27 + $0x3dc] sm:$0xf0]  ;;  %v7381_v16 = vld [vmem:[%s7836_s27 + $0xe6c] sm:$0xf] }
 0x222   : > { %4308 = vmatpush.bf16.msra.mxu1 %v6592_v0  ;;  %4334 = vmatpush.bf16.msra.mxu3 %v6596_v26  ;;  %v5832_v0 = vor.u32 %v7172_v55, %v5831_v54  ;;  %v5836_v26 = vor.u32 %v7156_v56, %v5833_v57  ;;  %v6084_v5 = vor.u32 %v7219_v60, %v6081_v61  ;;  %v7028_v54 = vld [vmem:[%s7836_s27 + $0x364] sm:$0xf]  ;;  %v6471_v56 = vld [vmem:[%s7836_s27 + $0xc60] sm:$0xf]  ;;  %v6737_v17 = vld [vmem:[%s7836_s27 + $0xee8] sm:$0xf0] }
 0x223   : > { %4297 = vmatpush.bf16.msra.mxu0 %v5312_v9  ;;  %4323 = vmatpush.bf16.msra.mxu2 %v5316_v10  ;;  %v5951_v9 = vld [vmem:[%s7836_s27 + $0x858] sm:$0xf]  ;;  %v5321_v55 = vld [vmem:[%s7836_s27 + $0x3e0] sm:$0xf0]  ;;  %v7332_v57 = vld [vmem:[%s7836_s27 + $0xcdc] sm:$0xf0]  ;;  %v5320_v61 = vor.u32 %v7044_v50, %v5319_v49 }
 0x224   : > { %v4083_v6 = vpop.f32.mrf.mxu3  ;;  %v7203_v10 = vld [vmem:[%s7836_s27 + $0x8d4] sm:$0xf0]  ;;  %v6948_v35 = vld [vmem:[%s7836_s27 + $0xdc] sm:$0xf0] }
 0x225   : > { %v5952_v20 = vor.u32 %v7203_v10, %v5951_v9  ;;  %v6996_v6 = vld [vmem:[%s7836_s27 + $0x264] sm:$0xf]  ;;  %v6343_v9 = vld [vmem:[%s7836_s27 + $0xb60] sm:$0xf] }
 0x226   : > { %4309 = vmatpush.bf16.msra.mxu1 %v6464_v18  ;;  %4335 = vmatpush.bf16.msra.mxu3 %v6468_v19  ;;  %v5704_v18 = vor.u32 %v7140_v2, %v5703_v1  ;;  %v5708_v19 = vor.u32 %v7124_v3, %v5705_v8  ;;  %v5191_v1 = vld [vmem:[%s7836_s27 + $0x260] sm:$0xf]  ;;  %v5193_v8 = vld [vmem:[%s7836_s27 + $0x2e0] sm:$0xf0] }
 0x227   : > { %4298 = vmatpush.bf16.msra.mxu0 %v5184_v28  ;;  %4324 = vmatpush.bf16.msra.mxu2 %v5188_v29  ;;  %v5577_v28 = vld [vmem:[%s7836_s27 + $0x5e0] sm:$0xf0]  ;;  %v6727_v29 = vld [vmem:[%s7836_s27 + $0xe60] sm:$0xf]  ;;  %v5196_v15 = vor.u32 %v6996_v6, %v5193_v8  ;;  %v5583_v8 = vld [vmem:[%s7836_s27 + $0x568] sm:$0xf] }
 0x228   : > { %v6728_v37 = vor.u32 %v7396_v30, %v6727_v29  ;;  %v7012_v2 = vld [vmem:[%s7836_s27 + $0x2dc] sm:$0xf0] }
 0x229   : > { %v5192_v14 = vor.u32 %v7012_v2, %v5191_v1  ;;  %v4935_v30 = vld [vmem:[%s7836_s27 + $0x60] sm:$0xf]  ;;  %v7413_v1 = vld [vmem:[%s7836_s27 + $0xf6c] sm:$0xf] }
 0x22a   : > { %4310 = vmatpush.bf16.msra.mxu1 %v6336_v33  ;;  %4336 = vmatpush.bf16.msra.mxu3 %v6340_v34  ;;  %v5576_v33 = vor.u32 %v7108_v23, %v5575_v22  ;;  %v5580_v34 = vor.u32 %v7092_v27, %v5577_v28  ;;  %v5065_v22 = vld [vmem:[%s7836_s27 + $0x1e0] sm:$0xf0]  ;;  %v6215_v23 = vld [vmem:[%s7836_s27 + $0xa60] sm:$0xf]  ;;  %v6865_v2 = vld [vmem:[%s7836_s27 + $0xfe8] sm:$0xf0] }
 0x22b   : > { %4299 = vmatpush.bf16.msra.mxu0 %v5056_v44  ;;  %4325 = vmatpush.bf16.msra.mxu2 %v5060_v45  ;;  %v7348_v44 = vld [vmem:[%s7836_s27 + $0xd64] sm:$0xf] }
 0x22c   : > { %v6601_v45 = vld [vmem:[%s7836_s27 + $0xde0] sm:$0xf0] }
 0x22d   : > { %v7252_v27 = vld [vmem:[%s7836_s27 + $0xa64] sm:$0xf] }
 0x22e   : > { %4311 = vmatpush.bf16.msra.mxu1 %v6208_v51  ;;  %4337 = vmatpush.bf16.msra.mxu3 %v6212_v53  ;;  %v6600_v51 = vor.u32 %v7364_v43, %v6599_v41  ;;  %v6604_v53 = vor.u32 %v7348_v44, %v6601_v45  ;;  %v6217_v28 = vld [vmem:[%s7836_s27 + $0xae0] sm:$0xf0]  ;;  %v7173_v41 = vld [vmem:[%s7836_s27 + $0x7e4] sm:$0xf0]  ;;  %v5841_v43 = vld [vmem:[%s7836_s27 + $0x7e8] sm:$0xf0] }
 0x22f   : > { %4300 = vmatpush.bf16.msra.mxu0 %v4928_v62  ;;  %4326 = vmatpush.bf16.msra.mxu2 %v4932_v63  ;;  %v5324_v62 = vor.u32 %v7028_v54, %v5321_v55  ;;  %v6220_v39 = vor.u32 %v7252_v27, %v6217_v28  ;;  %v6087_v44 = vld [vmem:[%s7836_s27 + $0x960] sm:$0xf]  ;;  %v5840_v50 = vor.u32 %v7173_v41, %v5839_v40  ;;  %v7141_v54 = vld [vmem:[%s7836_s27 + $0x6e4] sm:$0xf0]  ;;  %v7125_v55 = vld [vmem:[%s7836_s27 + $0x66c] sm:$0xf] }
 0x230   : > { %v7236_v45 = vld [vmem:[%s7836_s27 + $0x9dc] sm:$0xf0]  ;;  %v5457_v27 = vld [vmem:[%s7836_s27 + $0x4e8] sm:$0xf0]  ;;  %v6607_v28 = vld [vmem:[%s7836_s27 + $0xd68] sm:$0xf] }
 0x231   : > { %v4094_v42 = vpop.f32.mrf.mxu0  ;;  %v7029_v40 = vld [vmem:[%s7836_s27 + $0x36c] sm:$0xf] }
 0x232   : > { %4312 = vmatpush.bf16.msra.mxu1 %v6080_v4  ;;  %4338 = vmatpush.bf16.msra.mxu3 %v6084_v5  ;;  %v4095_v60 = vadd.f32 %v4094_v42, %v1111_v46  ;;  %v6472_v4 = vor.u32 %v7332_v57, %v6471_v56  ;;  %v6476_v5 = vor.u32 %v7316_v58, %v6473_v59  ;;  %v7157_v42 = vld [vmem:[%s7836_s27 + $0x76c] sm:$0xf]  ;;  %v7220_v46 = vld [vmem:[%s7836_s27 + $0x964] sm:$0xf] }
 0x233   : > { %4345 = vmatpush.bf16.msrb.mxu0 %v5832_v0  ;;  %4371 = vmatpush.bf16.msrb.mxu2 %v5836_v26  ;;  %v1112_v0 = vperm.slane %v8525_v7, 7  ;;  %v6345_v7 = vld [vmem:[%s7836_s27 + $0xbe0] sm:$0xf0]  ;;  %v6088_v56 = vor.u32 %v7236_v45, %v6087_v44  ;;  %v5713_v59 = vld [vmem:[%s7836_s27 + $0x6e8] sm:$0xf0] }
 0x234   : > { %4301 = vmatmul.bf16.vlgmr.msra.gmra.mxu0 %v7978_v52  ;;  %4327 = vmatmul.bf16.vlgmr.msra.gmra.mxu2 %v7978_v52  ;;  %v5329_v41 = vld [vmem:[%s7836_s27 + $0x3e8] sm:$0xf0] }
 0x235   : > { %v7317_v44 = vld [vmem:[%s7836_s27 + $0xc6c] sm:$0xf] }
 0x236   : > { %4313 = vmatpush.bf16.msra.mxu1 %v5952_v20  ;;  %4339 = vmatpush.bf16.msra.mxu3 %v5956_v21  ;;  %v4107_v63 = vpop.f32.mrf.mxu1  ;;  %v6348_v20 = vor.u32 %v7284_v12, %v6345_v7  ;;  %v6964_v21 = vld [vmem:[%s7836_s27 + $0x164] sm:$0xf]  ;;  %v7093_v12 = vld [vmem:[%s7836_s27 + $0x56c] sm:$0xf] }
 0x237   : > { %4346 = vmatpush.bf16.msrb.mxu0 %v5704_v18  ;;  %4372 = vmatpush.bf16.msrb.mxu2 %v5708_v19  ;;  %v4120_v26 = vpop.f32.mrf.mxu2  ;;  %v4108_v3 = vadd.f32 %v4107_v63, %v4095_v60  ;;  %v6344_v19 = vor.u32 %v7300_v11, %v6343_v9  ;;  %v5068_v32 = vor.u32 %v6964_v21, %v5065_v22  ;;  %v5959_v60 = vld [vmem:[%s7836_s27 + $0x860] sm:$0xf]  ;;  %v5961_v63 = vld [vmem:[%s7836_s27 + $0x8e0] sm:$0xf0]  ;;  %v7109_v9 = vld [vmem:[%s7836_s27 + $0x5e4] sm:$0xf0] }
 0x238   : > { %v4121_v18 = vadd.f32 %v4120_v26, %v1112_v0  ;;  %v6863_v0 = vld [vmem:[%s7836_s27 + $0xf68] sm:$0xf]  ;;  %v6868_v11 = vor.u32 %v7413_v1, %v6865_v2  ;;  %v5585_v7 = vld [vmem:[%s7836_s27 + $0x5e8] sm:$0xf0] }
 0x239   : > { %4314 = vmatmul.bf16.vlgmr.msra.gmra.mxu1 %v7995_v13  ;;  %4340 = vmatmul.bf16.vlgmr.msra.gmra.mxu3 %v7995_v13  ;;  %v4096_v10 = vpop.f32.mrf.mxu0  ;;  %4567 = vst [vmem:[%s8322_s24 + $0x70] sm:$0xff] %v4108_v3  ;;  %v7429_v26 = vld [vmem:[%s7836_s27 + $0xfe4] sm:$0xf0]  ;;  %v6481_v45 = vld [vmem:[%s7836_s27 + $0xce8] sm:$0xf0] }
 0x23a   : > { %4358 = vmatpush.bf16.msrb.mxu1 %v6856_v24  ;;  %4384 = vmatpush.bf16.msrb.mxu3 %v6860_v25  ;;  %v7268_v25 = vld [vmem:[%s7836_s27 + $0xadc] sm:$0xf0]  ;;  %v6864_v10 = vor.u32 %v7429_v26, %v6863_v0  ;;  %v5455_v21 = vld [vmem:[%s7836_s27 + $0x468] sm:$0xf]  ;;  %v6353_v0 = vld [vmem:[%s7836_s27 + $0xbe8] sm:$0xf0] }
 0x23b   : > { %4347 = vmatpush.bf16.msrb.mxu0 %v5576_v33  ;;  %4373 = vmatpush.bf16.msrb.mxu2 %v5580_v34  ;;  %v7077_v22 = vld [vmem:[%s7836_s27 + $0x4e4] sm:$0xf0] }
 0x23c   : > { %v4133_v24 = vpop.f32.mrf.mxu3  ;;  %v5071_v2 = vld [vmem:[%s7836_s27 + $0x168] sm:$0xf] }
 0x23d   : > { %v4134_v29 = vadd.f32 %v4133_v24, %v4121_v18  ;;  %v5584_v18 = vor.u32 %v7109_v9, %v5583_v8  ;;  %v6740_v24 = vor.u32 %v7381_v16, %v6737_v17  ;;  %v6965_v8 = vld [vmem:[%s7836_s27 + $0x16c] sm:$0xf]  ;;  %v4943_v16 = vld [vmem:[%s7836_s27 + $0x68] sm:$0xf] }
 0x23e   : > { %4359 = vmatpush.bf16.msrb.mxu1 %v6728_v37  ;;  %4385 = vmatpush.bf16.msrb.mxu3 %v6732_v38  ;;  %v4109_v33 = vpop.f32.mrf.mxu1  ;;  %v4937_v37 = vld [vmem:[%s7836_s27 + $0xe0] sm:$0xf0]  ;;  %v6216_v38 = vor.u32 %v7268_v25, %v6215_v23  ;;  %v7061_v25 = vld [vmem:[%s7836_s27 + $0x46c] sm:$0xf] }
 0x23f   : > { %4348 = vmatpush.bf16.msrb.mxu0 %v5448_v47  ;;  %4374 = vmatpush.bf16.msrb.mxu2 %v5452_v48  ;;  %v4122_v34 = vpop.f32.mrf.mxu2  ;;  %4568 = vst [vmem:[%s8322_s24 + $0x78] sm:$0xff] %v4134_v29  ;;  %v6089_v47 = vld [vmem:[%s7836_s27 + $0x9e0] sm:$0xf0]  ;;  %v4936_v48 = vor.u32 %v6948_v35, %v4935_v30  ;;  %v4940_v49 = vor.u32 %v6932_v36, %v4937_v37  ;;  %v7365_v30 = vld [vmem:[%s7836_s27 + $0xde4] sm:$0xf0] }
 0x240   : > { %v6092_v57 = vor.u32 %v7220_v46, %v6089_v47  ;;  %v5456_v34 = vor.u32 %v7077_v22, %v5455_v21  ;;  %v5460_v35 = vor.u32 %v7061_v25, %v5457_v27  ;;  %v5327_v36 = vld [vmem:[%s7836_s27 + $0x368] sm:$0xf]  ;;  %v5073_v9 = vld [vmem:[%s7836_s27 + $0x1e8] sm:$0xf0] }
 0x241   : > { %v7045_v37 = vld [vmem:[%s7836_s27 + $0x3e4] sm:$0xf0] }
 0x242   : > { %4360 = vmatpush.bf16.msrb.mxu1 %v6600_v51  ;;  %4386 = vmatpush.bf16.msrb.mxu3 %v6604_v53  ;;  %v5844_v51 = vor.u32 %v7157_v42, %v5841_v43  ;;  %v5711_v53 = vld [vmem:[%s7836_s27 + $0x668] sm:$0xf]  ;;  %v5328_v47 = vor.u32 %v7045_v37, %v5327_v36 }
 0x243   : > { %4349 = vmatpush.bf16.msrb.mxu0 %v5320_v61  ;;  %4375 = vmatpush.bf16.msrb.mxu2 %v5324_v62  ;;  %v7204_v61 = vld [vmem:[%s7836_s27 + $0x8dc] sm:$0xf0]  ;;  %v7188_v62 = vld [vmem:[%s7836_s27 + $0x864] sm:$0xf]  ;;  %v5712_v3 = vor.u32 %v7141_v54, %v5711_v53  ;;  %v6479_v42 = vld [vmem:[%s7836_s27 + $0xc68] sm:$0xf] }
 0x244   : > { %v4135_v58 = vpop.f32.mrf.mxu3  ;;  %v5964_v6 = vor.u32 %v7188_v62, %v5961_v63  ;;  %v7333_v43 = vld [vmem:[%s7836_s27 + $0xce4] sm:$0xf0]  ;;  %v7285_v63 = vld [vmem:[%s7836_s27 + $0xb6c] sm:$0xf] }
 0x245   : > { %v5199_v53 = vld [vmem:[%s7836_s27 + $0x268] sm:$0xf]  ;;  %v6997_v58 = vld [vmem:[%s7836_s27 + $0x26c] sm:$0xf] }
 0x246   : > { %4361 = vmatpush.bf16.msrb.mxu1 %v6472_v4  ;;  %4387 = vmatpush.bf16.msrb.mxu3 %v6476_v5  ;;  %v5716_v4 = vor.u32 %v7125_v55, %v5713_v59  ;;  %v5960_v5 = vor.u32 %v7204_v61, %v5959_v60  ;;  %v7013_v54 = vld [vmem:[%s7836_s27 + $0x2e4] sm:$0xf0]  ;;  %v5201_v59 = vld [vmem:[%s7836_s27 + $0x2e8] sm:$0xf0] }
 0x247   : > { %4350 = vmatpush.bf16.msrb.mxu0 %v5192_v14  ;;  %4376 = vmatpush.bf16.msrb.mxu2 %v5196_v15  ;;  %v6735_v14 = vld [vmem:[%s7836_s27 + $0xe68] sm:$0xf]  ;;  %v5200_v26 = vor.u32 %v7013_v54, %v5199_v53  ;;  %v5204_v1 = vor.u32 %v6997_v58, %v5201_v59  ;;  %v7430_v53 = vld [vmem:[%s7836_s27 + $0xfec] sm:$0xf0]  ;;  %v7414_v54 = vld [vmem:[%s7836_s27 + $0xf74] sm:$0xf] }
 0x248   : > { %v7397_v15 = vld [vmem:[%s7836_s27 + $0xee4] sm:$0xf0] }
 0x249   : > { %v6736_v23 = vor.u32 %v7397_v15, %v6735_v14  ;;  %v6351_v60 = vld [vmem:[%s7836_s27 + $0xb68] sm:$0xf]  ;;  %v6225_v14 = vld [vmem:[%s7836_s27 + $0xae8] sm:$0xf0] }
 0x24a   : > { %4362 = vmatpush.bf16.msrb.mxu1 %v6344_v19  ;;  %4388 = vmatpush.bf16.msrb.mxu3 %v6348_v20  ;;  %v5588_v19 = vor.u32 %v7093_v12, %v5585_v7  ;;  %v8816_v20 = vld [vmem:[%s8283_s9 + $0x10] sm:$0xff]  ;;  %v7301_v62 = vld [vmem:[%s7836_s27 + $0xbe4] sm:$0xf0]  ;;  %v7253_v7 = vld [vmem:[%s7836_s27 + $0xa6c] sm:$0xf] }
 0x24b   : > { %4351 = vmatpush.bf16.msrb.mxu0 %v5064_v31  ;;  %4377 = vmatpush.bf16.msrb.mxu2 %v5068_v32  ;;  %v7349_v31 = vld [vmem:[%s7836_s27 + $0xd6c] sm:$0xf]  ;;  %v1113_v33 = vperm.slane %v8816_v20, 0  ;;  %v7269_v12 = vld [vmem:[%s7836_s27 + $0xae4] sm:$0xf0]  ;;  %v6228_v27 = vor.u32 %v7253_v7, %v6225_v14 }
 0x24c   : > { %v6609_v32 = vld [vmem:[%s7836_s27 + $0xde8] sm:$0xf0]  ;;  %v6949_v22 = vld [vmem:[%s7836_s27 + $0xe4] sm:$0xf0]  ;;  %v5465_v7 = vld [vmem:[%s7836_s27 + $0x4f0] sm:$0xf0] }
 0x24d   : > { %v4944_v36 = vor.u32 %v6949_v22, %v4943_v16  ;;  %v6615_v14 = vld [vmem:[%s7836_s27 + $0xd70] sm:$0xf] }
 0x24e   : > { %4363 = vmatpush.bf16.msrb.mxu1 %v6216_v38  ;;  %4389 = vmatpush.bf16.msrb.mxu3 %v6220_v39  ;;  %v6608_v38 = vor.u32 %v7365_v30, %v6607_v28  ;;  %v6612_v39 = vor.u32 %v7349_v31, %v6609_v32  ;;  %v5847_v28 = vld [vmem:[%s7836_s27 + $0x770] sm:$0xf]  ;;  %v7158_v30 = vld [vmem:[%s7836_s27 + $0x774] sm:$0xf]  ;;  %v6095_v32 = vld [vmem:[%s7836_s27 + $0x968] sm:$0xf] }
 0x24f   : > { %4352 = vmatpush.bf16.msrb.mxu0 %v4936_v48  ;;  %4378 = vmatpush.bf16.msrb.mxu2 %v4940_v49  ;;  %v5332_v48 = vor.u32 %v7029_v40, %v5329_v41  ;;  %v5849_v31 = vld [vmem:[%s7836_s27 + $0x7f0] sm:$0xf0]  ;;  %v5719_v40 = vld [vmem:[%s7836_s27 + $0x670] sm:$0xf] }
 0x250   : > { %v7142_v41 = vld [vmem:[%s7836_s27 + $0x6ec] sm:$0xf0] }
 0x251   : > { %v4146_v29 = vpop.f32.mrf.mxu0  ;;  %v7366_v16 = vld [vmem:[%s7836_s27 + $0xdec] sm:$0xf0] }
 0x252   : > { %4364 = vmatpush.bf16.msrb.mxu1 %v6088_v56  ;;  %4390 = vmatpush.bf16.msrb.mxu3 %v6092_v57  ;;  %v4147_v46 = vadd.f32 %v4146_v29, %v1113_v33  ;;  %v6480_v56 = vor.u32 %v7333_v43, %v6479_v42  ;;  %v6484_v57 = vor.u32 %v7317_v44, %v6481_v45  ;;  %v7174_v29 = vld [vmem:[%s7836_s27 + $0x7ec] sm:$0xf0]  ;;  %v7237_v33 = vld [vmem:[%s7836_s27 + $0x9e4] sm:$0xf0]  ;;  %v7126_v42 = vld [vmem:[%s7836_s27 + $0x674] sm:$0xf] }
 0x253   : > { %4397 = vmatpush.bf16.msra.mxu0 %v5840_v50  ;;  %4423 = vmatpush.bf16.msra.mxu2 %v5844_v51  ;;  %v1114_v50 = vperm.slane %v8816_v20, 1  ;;  %v6096_v43 = vor.u32 %v7237_v33, %v6095_v32  ;;  %v7318_v32 = vld [vmem:[%s7836_s27 + $0xc74] sm:$0xf] }
 0x254   : > { %4353 = vmatmul.bf16.vlgmr.msrb.gmra.mxu0 %v7978_v52  ;;  %4379 = vmatmul.bf16.vlgmr.msrb.gmra.mxu2 %v7978_v52  ;;  %v6489_v33 = vld [vmem:[%s7836_s27 + $0xcf0] sm:$0xf0] }
 0x256   : > { %4365 = vmatpush.bf16.msrb.mxu1 %v5960_v5  ;;  %4391 = vmatpush.bf16.msrb.mxu3 %v5964_v6  ;;  %v4159_v49 = vpop.f32.mrf.mxu1  ;;  %v6352_v5 = vor.u32 %v7301_v62, %v6351_v60  ;;  %v6356_v6 = vor.u32 %v7285_v63, %v6353_v0  ;;  %v5591_v60 = vld [vmem:[%s7836_s27 + $0x570] sm:$0xf]  ;;  %v7094_v0 = vld [vmem:[%s7836_s27 + $0x574] sm:$0xf] }
 0x257   : > { %4398 = vmatpush.bf16.msra.mxu0 %v5712_v3  ;;  %4424 = vmatpush.bf16.msra.mxu2 %v5716_v4  ;;  %v4172_v51 = vpop.f32.mrf.mxu2  ;;  %v4160_v55 = vadd.f32 %v4159_v49, %v4147_v46  ;;  %v6981_v3 = vld [vmem:[%s7836_s27 + $0x1e4] sm:$0xf0]  ;;  %v5721_v46 = vld [vmem:[%s7836_s27 + $0x6f0] sm:$0xf0]  ;;  %v7189_v49 = vld [vmem:[%s7836_s27 + $0x86c] sm:$0xf] }
 0x258   : > { %v4173_v4 = vadd.f32 %v4172_v51, %v1114_v50  ;;  %v5072_v17 = vor.u32 %v6981_v3, %v5071_v2  ;;  %v5969_v50 = vld [vmem:[%s7836_s27 + $0x8e8] sm:$0xf0]  ;;  %v6871_v51 = vld [vmem:[%s7836_s27 + $0xf70] sm:$0xf]  ;;  %v7382_v3 = vld [vmem:[%s7836_s27 + $0xe74] sm:$0xf] }
 0x259   : > { %4366 = vmatmul.bf16.vlgmr.msrb.gmra.mxu1 %v7995_v13  ;;  %4392 = vmatmul.bf16.vlgmr.msrb.gmra.mxu3 %v7995_v13  ;;  %v4148_v61 = vpop.f32.mrf.mxu0  ;;  %4569 = vst [vmem:[%s8322_s24 + $0x80] sm:$0xff] %v4160_v55  ;;  %v6873_v55 = vld [vmem:[%s7836_s27 + $0xff0] sm:$0xf0]  ;;  %v5972_v59 = vor.u32 %v7189_v49, %v5969_v50  ;;  %v6872_v62 = vor.u32 %v7430_v53, %v6871_v51  ;;  %v7398_v2 = vld [vmem:[%s7836_s27 + $0xeec] sm:$0xf0] }
 0x25a   : > { %4410 = vmatpush.bf16.msra.mxu1 %v6864_v10  ;;  %4436 = vmatpush.bf16.msra.mxu3 %v6868_v11  ;;  %v6223_v10 = vld [vmem:[%s7836_s27 + $0xa68] sm:$0xf]  ;;  %v7110_v61 = vld [vmem:[%s7836_s27 + $0x5ec] sm:$0xf0]  ;;  %v6876_v63 = vor.u32 %v7414_v54, %v6873_v55  ;;  %v7286_v50 = vld [vmem:[%s7836_s27 + $0xb74] sm:$0xf] }
 0x25b   : > { %4399 = vmatpush.bf16.msra.mxu0 %v5584_v18  ;;  %4425 = vmatpush.bf16.msra.mxu2 %v5588_v19  ;;  %v5076_v18 = vor.u32 %v6965_v8, %v5073_v9  ;;  %v6224_v25 = vor.u32 %v7269_v12, %v6223_v10  ;;  %v5463_v8 = vld [vmem:[%s7836_s27 + $0x470] sm:$0xf]  ;;  %v7062_v12 = vld [vmem:[%s7836_s27 + $0x474] sm:$0xf] }
 0x25c   : > { %v4185_v11 = vpop.f32.mrf.mxu3  ;;  %v7078_v9 = vld [vmem:[%s7836_s27 + $0x4ec] sm:$0xf0]  ;;  %v5468_v22 = vor.u32 %v7062_v12, %v5465_v7  ;;  %v6361_v51 = vld [vmem:[%s7836_s27 + $0xbf0] sm:$0xf0] }
 0x25d   : > { %v4186_v15 = vadd.f32 %v4185_v11, %v4173_v4  ;;  %v6745_v4 = vld [vmem:[%s7836_s27 + $0xef0] sm:$0xf0]  ;;  %v7302_v49 = vld [vmem:[%s7836_s27 + $0xbec] sm:$0xf0] }
 0x25e   : > { %4411 = vmatpush.bf16.msra.mxu1 %v6736_v23  ;;  %4437 = vmatpush.bf16.msra.mxu3 %v6740_v24  ;;  %v4161_v19 = vpop.f32.mrf.mxu1  ;;  %v6933_v23 = vld [vmem:[%s7836_s27 + $0x6c] sm:$0xf]  ;;  %v6748_v11 = vor.u32 %v7382_v3, %v6745_v4  ;;  %v5079_v55 = vld [vmem:[%s7836_s27 + $0x170] sm:$0xf] }
 0x25f   : > { %4400 = vmatpush.bf16.msra.mxu0 %v5456_v34  ;;  %4426 = vmatpush.bf16.msra.mxu2 %v5460_v35  ;;  %v4174_v21 = vpop.f32.mrf.mxu2  ;;  %v4945_v24 = vld [vmem:[%s7836_s27 + $0xe8] sm:$0xf0]  ;;  %4570 = vst [vmem:[%s8322_s24 + $0x88] sm:$0xff] %v4186_v15  ;;  %v1115_v19 = vperm.slane %v8816_v20, 2  ;;  %v4951_v3 = vld [vmem:[%s7836_s27 + $0x70] sm:$0xf] }
 0x260   : > { %v7221_v34 = vld [vmem:[%s7836_s27 + $0x96c] sm:$0xf]  ;;  %v4948_v37 = vor.u32 %v6933_v23, %v4945_v24  ;;  %v5464_v21 = vor.u32 %v7078_v9, %v5463_v8  ;;  %v5335_v23 = vld [vmem:[%s7836_s27 + $0x370] sm:$0xf] }
 0x261   : > { %v6097_v35 = vld [vmem:[%s7836_s27 + $0x9e8] sm:$0xf0]  ;;  %v7046_v24 = vld [vmem:[%s7836_s27 + $0x3ec] sm:$0xf0] }
 0x262   : > { %4412 = vmatpush.bf16.msra.mxu1 %v6608_v38  ;;  %4438 = vmatpush.bf16.msra.mxu3 %v6612_v39  ;;  %v5848_v38 = vor.u32 %v7174_v29, %v5847_v28  ;;  %v5852_v39 = vor.u32 %v7158_v30, %v5849_v31  ;;  %v6100_v44 = vor.u32 %v7221_v34, %v6097_v35  ;;  %v7030_v28 = vld [vmem:[%s7836_s27 + $0x374] sm:$0xf]  ;;  %v6487_v30 = vld [vmem:[%s7836_s27 + $0xc70] sm:$0xf] }
 0x263   : > { %4401 = vmatpush.bf16.msra.mxu0 %v5328_v47  ;;  %4427 = vmatpush.bf16.msra.mxu2 %v5332_v48  ;;  %v5967_v47 = vld [vmem:[%s7836_s27 + $0x868] sm:$0xf]  ;;  %v5337_v29 = vld [vmem:[%s7836_s27 + $0x3f0] sm:$0xf0]  ;;  %v7334_v31 = vld [vmem:[%s7836_s27 + $0xcec] sm:$0xf0]  ;;  %v5336_v35 = vor.u32 %v7046_v24, %v5335_v23 }
 0x264   : > { %v4187_v45 = vpop.f32.mrf.mxu3  ;;  %v7205_v48 = vld [vmem:[%s7836_s27 + $0x8e4] sm:$0xf0]  ;;  %v6950_v9 = vld [vmem:[%s7836_s27 + $0xec] sm:$0xf0] }
 0x265   : > { %v5968_v58 = vor.u32 %v7205_v48, %v5967_v47  ;;  %v6998_v45 = vld [vmem:[%s7836_s27 + $0x274] sm:$0xf]  ;;  %v6359_v47 = vld [vmem:[%s7836_s27 + $0xb70] sm:$0xf]  ;;  %v4952_v23 = vor.u32 %v6950_v9, %v4951_v3  ;;  %v7367_v3 = vld [vmem:[%s7836_s27 + $0xdf4] sm:$0xf0] }
 0x266   : > { %4413 = vmatpush.bf16.msra.mxu1 %v6480_v56  ;;  %4439 = vmatpush.bf16.msra.mxu3 %v6484_v57  ;;  %v5720_v56 = vor.u32 %v7142_v41, %v5719_v40  ;;  %v5724_v57 = vor.u32 %v7126_v42, %v5721_v46  ;;  %v5207_v40 = vld [vmem:[%s7836_s27 + $0x270] sm:$0xf]  ;;  %v5209_v46 = vld [vmem:[%s7836_s27 + $0x2f0] sm:$0xf0] }
 0x267   : > { %4402 = vmatpush.bf16.msra.mxu0 %v5200_v26  ;;  %4428 = vmatpush.bf16.msra.mxu2 %v5204_v1  ;;  %v5593_v26 = vld [vmem:[%s7836_s27 + $0x5f0] sm:$0xf0]  ;;  %v6743_v1 = vld [vmem:[%s7836_s27 + $0xe70] sm:$0xf]  ;;  %v5212_v54 = vor.u32 %v6998_v45, %v5209_v46 }
 0x268   : > { %v6744_v10 = vor.u32 %v7398_v2, %v6743_v1  ;;  %v7014_v41 = vld [vmem:[%s7836_s27 + $0x2ec] sm:$0xf0]  ;;  %v6233_v1 = vld [vmem:[%s7836_s27 + $0xaf0] sm:$0xf0] }
 0x269   : > { %v5208_v53 = vor.u32 %v7014_v41, %v5207_v40  ;;  %v7431_v40 = vld [vmem:[%s7836_s27 + $0xff4] sm:$0xf0]  ;;  %v7415_v41 = vld [vmem:[%s7836_s27 + $0xf7c] sm:$0xf] }
 0x26a   : > { %4414 = vmatpush.bf16.msra.mxu1 %v6352_v5  ;;  %4440 = vmatpush.bf16.msra.mxu3 %v6356_v6  ;;  %v5592_v5 = vor.u32 %v7110_v61, %v5591_v60  ;;  %v5596_v6 = vor.u32 %v7094_v0, %v5593_v26  ;;  %v6966_v60 = vld [vmem:[%s7836_s27 + $0x174] sm:$0xf]  ;;  %v7270_v0 = vld [vmem:[%s7836_s27 + $0xaec] sm:$0xf0] }
 0x26b   : > { %4403 = vmatpush.bf16.msra.mxu0 %v5072_v17  ;;  %4429 = vmatpush.bf16.msra.mxu2 %v5076_v18  ;;  %v7350_v17 = vld [vmem:[%s7836_s27 + $0xd74] sm:$0xf] }
 0x26c   : > { %v6617_v18 = vld [vmem:[%s7836_s27 + $0xdf0] sm:$0xf0] }
 0x26d   : > { %v5081_v61 = vld [vmem:[%s7836_s27 + $0x1f0] sm:$0xf0] }
 0x26e   : > { %4415 = vmatpush.bf16.msra.mxu1 %v6224_v25  ;;  %4441 = vmatpush.bf16.msra.mxu3 %v6228_v27  ;;  %v6616_v25 = vor.u32 %v7366_v16, %v6615_v14  ;;  %v6620_v27 = vor.u32 %v7350_v17, %v6617_v18  ;;  %v7254_v26 = vld [vmem:[%s7836_s27 + $0xa74] sm:$0xf]  ;;  %v5855_v14 = vld [vmem:[%s7836_s27 + $0x778] sm:$0xf]  ;;  %v7159_v16 = vld [vmem:[%s7836_s27 + $0x77c] sm:$0xf] }
 0x26f   : > { %4404 = vmatpush.bf16.msra.mxu0 %v4944_v36  ;;  %4430 = vmatpush.bf16.msra.mxu2 %v4948_v37  ;;  %v5340_v36 = vor.u32 %v7030_v28, %v5337_v29  ;;  %v6236_v7 = vor.u32 %v7254_v26, %v6233_v1  ;;  %v5857_v17 = vld [vmem:[%s7836_s27 + $0x7f8] sm:$0xf0]  ;;  %v6103_v18 = vld [vmem:[%s7836_s27 + $0x970] sm:$0xf]  ;;  %v5727_v28 = vld [vmem:[%s7836_s27 + $0x678] sm:$0xf] }
 0x270   : > { %v7143_v29 = vld [vmem:[%s7836_s27 + $0x6f4] sm:$0xf0]  ;;  %v5473_v26 = vld [vmem:[%s7836_s27 + $0x4f8] sm:$0xf0] }
 0x271   : > { %v4198_v15 = vpop.f32.mrf.mxu0  ;;  %v6623_v1 = vld [vmem:[%s7836_s27 + $0xd78] sm:$0xf] }
 0x272   : > { %4416 = vmatpush.bf16.msra.mxu1 %v6096_v43  ;;  %4442 = vmatpush.bf16.msra.mxu3 %v6100_v44  ;;  %v4199_v34 = vadd.f32 %v4198_v15, %v1115_v19  ;;  %v6488_v43 = vor.u32 %v7334_v31, %v6487_v30  ;;  %v6492_v44 = vor.u32 %v7318_v32, %v6489_v33  ;;  %v7175_v15 = vld [vmem:[%s7836_s27 + $0x7f4] sm:$0xf0]  ;;  %v7238_v19 = vld [vmem:[%s7836_s27 + $0x9ec] sm:$0xf0]  ;;  %v7127_v30 = vld [vmem:[%s7836_s27 + $0x67c] sm:$0xf] }
 0x273   : > { %4449 = vmatpush.bf16.msrb.mxu0 %v5848_v38  ;;  %4475 = vmatpush.bf16.msrb.mxu2 %v5852_v39  ;;  %v1116_v38 = vperm.slane %v8816_v20, 3  ;;  %v6104_v31 = vor.u32 %v7238_v19, %v6103_v18  ;;  %v7319_v18 = vld [vmem:[%s7836_s27 + $0xc7c] sm:$0xf] }
 0x274   : > { %4405 = vmatmul.bf16.vlgmr.msra.gmra.mxu0 %v7978_v52  ;;  %4431 = vmatmul.bf16.vlgmr.msra.gmra.mxu2 %v7978_v52  ;;  %v6497_v19 = vld [vmem:[%s7836_s27 + $0xcf8] sm:$0xf0] }
 0x276   : > { %4417 = vmatpush.bf16.msra.mxu1 %v5968_v58  ;;  %4443 = vmatpush.bf16.msra.mxu3 %v5972_v59  ;;  %v4211_v37 = vpop.f32.mrf.mxu1  ;;  %v6360_v58 = vor.u32 %v7302_v49, %v6359_v47  ;;  %v6364_v59 = vor.u32 %v7286_v50, %v6361_v51  ;;  %v5599_v47 = vld [vmem:[%s7836_s27 + $0x578] sm:$0xf]  ;;  %v7095_v51 = vld [vmem:[%s7836_s27 + $0x57c] sm:$0xf] }
 0x277   : > { %4450 = vmatpush.bf16.msrb.mxu0 %v5720_v56  ;;  %4476 = vmatpush.bf16.msrb.mxu2 %v5724_v57  ;;  %v4224_v39 = vpop.f32.mrf.mxu2  ;;  %v4212_v42 = vadd.f32 %v4211_v37, %v4199_v34  ;;  %v6982_v56 = vld [vmem:[%s7836_s27 + $0x1ec] sm:$0xf0]  ;;  %v5729_v34 = vld [vmem:[%s7836_s27 + $0x6f8] sm:$0xf0]  ;;  %v7190_v37 = vld [vmem:[%s7836_s27 + $0x874] sm:$0xf] }
 0x278   : > { %v4225_v57 = vadd.f32 %v4224_v39, %v1116_v38  ;;  %v5080_v4 = vor.u32 %v6982_v56, %v5079_v55  ;;  %v5977_v38 = vld [vmem:[%s7836_s27 + $0x8f0] sm:$0xf0]  ;;  %v6879_v39 = vld [vmem:[%s7836_s27 + $0xf78] sm:$0xf]  ;;  %v7383_v56 = vld [vmem:[%s7836_s27 + $0xe7c] sm:$0xf] }
 0x279   : > { %4418 = vmatmul.bf16.vlgmr.msra.gmra.mxu1 %v7995_v13  ;;  %4444 = vmatmul.bf16.vlgmr.msra.gmra.mxu3 %v7995_v13  ;;  %v4200_v48 = vpop.f32.mrf.mxu0  ;;  %4571 = vst [vmem:[%s8322_s24 + $0x90] sm:$0xff] %v4212_v42  ;;  %v6881_v42 = vld [vmem:[%s7836_s27 + $0xff8] sm:$0xf0]  ;;  %v5980_v46 = vor.u32 %v7190_v37, %v5977_v38  ;;  %v6880_v49 = vor.u32 %v7431_v40, %v6879_v39  ;;  %v7399_v55 = vld [vmem:[%s7836_s27 + $0xef4] sm:$0xf0] }
 0x27a   : > { %4462 = vmatpush.bf16.msrb.mxu1 %v6872_v62  ;;  %4488 = vmatpush.bf16.msrb.mxu3 %v6876_v63  ;;  %v6231_v62 = vld [vmem:[%s7836_s27 + $0xa70] sm:$0xf]  ;;  %v7111_v48 = vld [vmem:[%s7836_s27 + $0x5f4] sm:$0xf0]  ;;  %v6884_v50 = vor.u32 %v7415_v41, %v6881_v42  ;;  %v7287_v38 = vld [vmem:[%s7836_s27 + $0xb7c] sm:$0xf] }
 0x27b   : > { %4451 = vmatpush.bf16.msrb.mxu0 %v5592_v5  ;;  %4477 = vmatpush.bf16.msrb.mxu2 %v5596_v6  ;;  %v5084_v5 = vor.u32 %v6966_v60, %v5081_v61  ;;  %v6232_v12 = vor.u32 %v7270_v0, %v6231_v62  ;;  %v5471_v60 = vld [vmem:[%s7836_s27 + $0x478] sm:$0xf]  ;;  %v7063_v0 = vld [vmem:[%s7836_s27 + $0x47c] sm:$0xf] }
 0x27c   : > { %v4237_v63 = vpop.f32.mrf.mxu3  ;;  %v7079_v61 = vld [vmem:[%s7836_s27 + $0x4f4] sm:$0xf0]  ;;  %v5476_v9 = vor.u32 %v7063_v0, %v5473_v26  ;;  %v6369_v39 = vld [vmem:[%s7836_s27 + $0xbf8] sm:$0xf0] }
 0x27d   : > { %v4238_v2 = vadd.f32 %v4237_v63, %v4225_v57  ;;  %v6753_v57 = vld [vmem:[%s7836_s27 + $0xef8] sm:$0xf0]  ;;  %v7303_v37 = vld [vmem:[%s7836_s27 + $0xbf4] sm:$0xf0] }
 0x27e   : > { %4463 = vmatpush.bf16.msrb.mxu1 %v6744_v10  ;;  %4489 = vmatpush.bf16.msrb.mxu3 %v6748_v11  ;;  %v4213_v6 = vpop.f32.mrf.mxu1  ;;  %v6934_v10 = vld [vmem:[%s7836_s27 + $0x74] sm:$0xf]  ;;  %v6756_v63 = vor.u32 %v7383_v56, %v6753_v57  ;;  %v5087_v42 = vld [vmem:[%s7836_s27 + $0x178] sm:$0xf]  ;;  %v4961_v26 = vld [vmem:[%s7836_s27 + $0xf8] sm:$0xf0] }
 0x27f   : > { %4452 = vmatpush.bf16.msrb.mxu0 %v5464_v21  ;;  %4478 = vmatpush.bf16.msrb.mxu2 %v5468_v22  ;;  %v4226_v8 = vpop.f32.mrf.mxu2  ;;  %v4953_v11 = vld [vmem:[%s7836_s27 + $0xf0] sm:$0xf0]  ;;  %4572 = vst [vmem:[%s8322_s24 + $0x98] sm:$0xff] %v4238_v2  ;;  %v1117_v6 = vperm.slane %v8816_v20, 4 }
 0x280   : > { %v7222_v21 = vld [vmem:[%s7836_s27 + $0x974] sm:$0xf]  ;;  %v4956_v24 = vor.u32 %v6934_v10, %v4953_v11  ;;  %v5472_v8 = vor.u32 %v7079_v61, %v5471_v60  ;;  %v5343_v10 = vld [vmem:[%s7836_s27 + $0x378] sm:$0xf] }
 0x281   : > { %v6105_v22 = vld [vmem:[%s7836_s27 + $0x9f0] sm:$0xf0]  ;;  %v7047_v11 = vld [vmem:[%s7836_s27 + $0x3f4] sm:$0xf0] }
 0x282   : > { %4464 = vmatpush.bf16.msrb.mxu1 %v6616_v25  ;;  %4490 = vmatpush.bf16.msrb.mxu3 %v6620_v27  ;;  %v5856_v25 = vor.u32 %v7175_v15, %v5855_v14  ;;  %v5860_v27 = vor.u32 %v7159_v16, %v5857_v17  ;;  %v6108_v32 = vor.u32 %v7222_v21, %v6105_v22  ;;  %v7031_v14 = vld [vmem:[%s7836_s27 + $0x37c] sm:$0xf]  ;;  %v6495_v16 = vld [vmem:[%s7836_s27 + $0xc78] sm:$0xf] }
 0x283   : > { %4453 = vmatpush.bf16.msrb.mxu0 %v5336_v35  ;;  %4479 = vmatpush.bf16.msrb.mxu2 %v5340_v36  ;;  %v5975_v35 = vld [vmem:[%s7836_s27 + $0x870] sm:$0xf]  ;;  %v5345_v15 = vld [vmem:[%s7836_s27 + $0x3f8] sm:$0xf0]  ;;  %v7335_v17 = vld [vmem:[%s7836_s27 + $0xcf4] sm:$0xf0]  ;;  %v5344_v22 = vor.u32 %v7047_v11, %v5343_v10 }
 0x284   : > { %v4239_v33 = vpop.f32.mrf.mxu3  ;;  %v7206_v36 = vld [vmem:[%s7836_s27 + $0x8ec] sm:$0xf0]  ;;  %v4959_v60 = vld [vmem:[%s7836_s27 + $0x78] sm:$0xf] }
 0x285   : > { %v5976_v45 = vor.u32 %v7206_v36, %v5975_v35  ;;  %v6999_v33 = vld [vmem:[%s7836_s27 + $0x27c] sm:$0xf]  ;;  %v6367_v35 = vld [vmem:[%s7836_s27 + $0xb78] sm:$0xf] }
 0x286   : > { %4465 = vmatpush.bf16.msrb.mxu1 %v6488_v43  ;;  %4491 = vmatpush.bf16.msrb.mxu3 %v6492_v44  ;;  %v5728_v43 = vor.u32 %v7143_v29, %v5727_v28  ;;  %v5732_v44 = vor.u32 %v7127_v30, %v5729_v34  ;;  %v5215_v28 = vld [vmem:[%s7836_s27 + $0x278] sm:$0xf]  ;;  %v5217_v34 = vld [vmem:[%s7836_s27 + $0x2f8] sm:$0xf0] }
 0x287   : > { %4454 = vmatpush.bf16.msrb.mxu0 %v5208_v53  ;;  %4480 = vmatpush.bf16.msrb.mxu2 %v5212_v54  ;;  %v5601_v53 = vld [vmem:[%s7836_s27 + $0x5f8] sm:$0xf0]  ;;  %v6751_v54 = vld [vmem:[%s7836_s27 + $0xe78] sm:$0xf]  ;;  %v5220_v41 = vor.u32 %v6999_v33, %v5217_v34 }
 0x288   : > { %v6752_v62 = vor.u32 %v7399_v55, %v6751_v54  ;;  %v7015_v29 = vld [vmem:[%s7836_s27 + $0x2f4] sm:$0xf0]  ;;  %v6241_v54 = vld [vmem:[%s7836_s27 + $0xaf8] sm:$0xf0] }
 0x289   : > { %v5216_v40 = vor.u32 %v7015_v29, %v5215_v28  ;;  %v6951_v61 = vld [vmem:[%s7836_s27 + $0xf4] sm:$0xf0] }
 0x28a   : > { %4466 = vmatpush.bf16.msrb.mxu1 %v6360_v58  ;;  %4492 = vmatpush.bf16.msrb.mxu3 %v6364_v59  ;;  %v5600_v58 = vor.u32 %v7111_v48, %v5599_v47  ;;  %v5604_v59 = vor.u32 %v7095_v51, %v5601_v53  ;;  %v6967_v47 = vld [vmem:[%s7836_s27 + $0x17c] sm:$0xf]  ;;  %v7271_v51 = vld [vmem:[%s7836_s27 + $0xaf4] sm:$0xf0] }
 0x28b   : > { %4455 = vmatpush.bf16.msrb.mxu0 %v5080_v4  ;;  %4481 = vmatpush.bf16.msrb.mxu2 %v5084_v5  ;;  %v7351_v4 = vld [vmem:[%s7836_s27 + $0xd7c] sm:$0xf]  ;;  %v5983_v10 = vld [vmem:[%s7836_s27 + $0x878] sm:$0xf] }
 0x28c   : > { %v6625_v5 = vld [vmem:[%s7836_s27 + $0xdf8] sm:$0xf0] }
 0x28d   : > { %v5089_v48 = vld [vmem:[%s7836_s27 + $0x1f8] sm:$0xf0] }
 0x28e   : > { %4467 = vmatpush.bf16.msrb.mxu1 %v6232_v12  ;;  %4493 = vmatpush.bf16.msrb.mxu3 %v6236_v7  ;;  %v6624_v12 = vor.u32 %v7367_v3, %v6623_v1  ;;  %v6628_v7 = vor.u32 %v7351_v4, %v6625_v5  ;;  %v7255_v53 = vld [vmem:[%s7836_s27 + $0xa7c] sm:$0xf]  ;;  %v5092_v57 = vor.u32 %v6967_v47, %v5089_v48  ;;  %v6111_v1 = vld [vmem:[%s7836_s27 + $0x978] sm:$0xf] }
 0x28f   : > { %4456 = vmatpush.bf16.msrb.mxu0 %v4952_v23  ;;  %4482 = vmatpush.bf16.msrb.mxu2 %v4956_v24  ;;  %v5348_v23 = vor.u32 %v7031_v14, %v5345_v15  ;;  %v6244_v0 = vor.u32 %v7255_v53, %v6241_v54  ;;  %v7223_v3 = vld [vmem:[%s7836_s27 + $0x97c] sm:$0xf]  ;;  %v4960_v5 = vor.u32 %v6951_v61, %v4959_v60 }
 0x290   : > { %v6113_v4 = vld [vmem:[%s7836_s27 + $0x9f8] sm:$0xf0] }
 0x291   : > { %v4250_v2 = vpop.f32.mrf.mxu0  ;;  %v5985_v14 = vld [vmem:[%s7836_s27 + $0x8f8] sm:$0xf0] }
 0x292   : > { %4468 = vmatpush.bf16.msrb.mxu1 %v6104_v31  ;;  %4494 = vmatpush.bf16.msrb.mxu3 %v6108_v32  ;;  %v4251_v21 = vadd.f32 %v4250_v2, %v1117_v6  ;;  %v6496_v31 = vor.u32 %v7335_v17, %v6495_v16  ;;  %v6500_v32 = vor.u32 %v7319_v18, %v6497_v19  ;;  %v7239_v2 = vld [vmem:[%s7836_s27 + $0x9f4] sm:$0xf0]  ;;  %v1119_v18 = vperm.slane %v8816_v20, 6 }
 0x293   : > { %4501 = vmatpush.bf16.msra.mxu0 %v5856_v25  ;;  %4527 = vmatpush.bf16.msra.mxu2 %v5860_v27  ;;  %v1118_v25 = vperm.slane %v8816_v20, 5 }
 0x294   : > { %4457 = vmatmul.bf16.vlgmr.msrb.gmra.mxu0 %v7978_v52  ;;  %4483 = vmatmul.bf16.vlgmr.msrb.gmra.mxu2 %v7978_v52 }
 0x296   : > { %4469 = vmatpush.bf16.msrb.mxu1 %v5976_v45  ;;  %4495 = vmatpush.bf16.msrb.mxu3 %v5980_v46  ;;  %v4263_v24 = vpop.f32.mrf.mxu1  ;;  %v6368_v45 = vor.u32 %v7303_v37, %v6367_v35  ;;  %v6372_v46 = vor.u32 %v7287_v38, %v6369_v39 }
 0x297   : > { %4502 = vmatpush.bf16.msra.mxu0 %v5728_v43  ;;  %4528 = vmatpush.bf16.msra.mxu2 %v5732_v44  ;;  %v4276_v27 = vpop.f32.mrf.mxu2  ;;  %v4264_v30 = vadd.f32 %v4263_v24, %v4251_v21  ;;  %v6983_v43 = vld [vmem:[%s7836_s27 + $0x1f4] sm:$0xf0]  ;;  %v1120_v24 = vperm.slane %v8816_v20, 7 }
 0x298   : > { %v4277_v44 = vadd.f32 %v4276_v27, %v1118_v25  ;;  %v5088_v56 = vor.u32 %v6983_v43, %v5087_v42 }
 0x299   : > { %4470 = vmatmul.bf16.vlgmr.msrb.gmra.mxu1 %v7995_v13  ;;  %4496 = vmatmul.bf16.vlgmr.msrb.gmra.mxu3 %v7995_v13  ;;  %v4252_v36 = vpop.f32.mrf.mxu0  ;;  %4573 = vst [vmem:[%s8322_s24 + $0xa0] sm:$0xff] %v4264_v30 }
 0x29a   : > { %4514 = vmatpush.bf16.msra.mxu1 %v6880_v49  ;;  %4540 = vmatpush.bf16.msra.mxu3 %v6884_v50  ;;  %v6239_v49 = vld [vmem:[%s7836_s27 + $0xa78] sm:$0xf] }
 0x29b   : > { %4503 = vmatpush.bf16.msra.mxu0 %v5600_v58  ;;  %4529 = vmatpush.bf16.msra.mxu2 %v5604_v59 }
 0x29c   : > { %v4289_v50 = vpop.f32.mrf.mxu3 }
 0x29d   : > { %v4290_v55 = vadd.f32 %v4289_v50, %v4277_v44 }
 0x29e   : > { %4515 = vmatpush.bf16.msra.mxu1 %v6752_v62  ;;  %4541 = vmatpush.bf16.msra.mxu3 %v6756_v63  ;;  %v4265_v58 = vpop.f32.mrf.mxu1  ;;  %v6935_v62 = vld [vmem:[%s7836_s27 + $0x7c] sm:$0xf]  ;;  %v6240_v63 = vor.u32 %v7271_v51, %v6239_v49 }
 0x29f   : > { %4504 = vmatpush.bf16.msra.mxu0 %v5472_v8  ;;  %4530 = vmatpush.bf16.msra.mxu2 %v5476_v9  ;;  %v4278_v59 = vpop.f32.mrf.mxu2  ;;  %4574 = vst [vmem:[%s8322_s24 + $0xa8] sm:$0xff] %v4290_v55  ;;  %v4964_v6 = vor.u32 %v6935_v62, %v4961_v26  ;;  %v6112_v8 = vor.u32 %v7239_v2, %v6111_v1 }
 0x2a0   : > { %v6116_v9 = vor.u32 %v7223_v3, %v6113_v4 }
 0x2a2   : > { %4516 = vmatpush.bf16.msra.mxu1 %v6624_v12  ;;  %4542 = vmatpush.bf16.msra.mxu3 %v6628_v7  ;;  %v7207_v12 = vld [vmem:[%s7836_s27 + $0x8f4] sm:$0xf0]  ;;  %v7191_v7 = vld [vmem:[%s7836_s27 + $0x87c] sm:$0xf] }
 0x2a3   : > { %4505 = vmatpush.bf16.msra.mxu0 %v5344_v22  ;;  %4531 = vmatpush.bf16.msra.mxu2 %v5348_v23  ;;  %v5984_v15 = vor.u32 %v7207_v12, %v5983_v10  ;;  %v5988_v16 = vor.u32 %v7191_v7, %v5985_v14 }
 0x2a4   : > { %v4291_v11 = vpop.f32.mrf.mxu3 }
 0x2a6   : > { %4517 = vmatpush.bf16.msra.mxu1 %v6496_v31  ;;  %4543 = vmatpush.bf16.msra.mxu3 %v6500_v32  ;;  %v1092_v31 = vld [vmem:[%s8283_s9 + $0x18] sm:$0xff] }
 0x2a7   : > { %4506 = vmatpush.bf16.msra.mxu0 %v5216_v40  ;;  %4532 = vmatpush.bf16.msra.mxu2 %v5220_v41  ;;  %v1121_v33 = vperm.slane %v1092_v31, 0  ;;  %v1122_v38 = vperm.slane %v1092_v31, 1  ;;  %v1124_v51 = vperm.slane %v1092_v31, 3  ;;  %v1125_v61 = vperm.slane %v1092_v31, 4 }
 0x2a8   : > { %v1126_v1 = vperm.slane %v1092_v31, 5  ;;  %v1127_v10 = vperm.slane %v1092_v31, 6 }
 0x2aa   : > { %4518 = vmatpush.bf16.msra.mxu1 %v6368_v45  ;;  %4544 = vmatpush.bf16.msra.mxu3 %v6372_v46  ;;  %v1123_v46 = vperm.slane %v1092_v31, 2 }
 0x2ab   : > { %4507 = vmatpush.bf16.msra.mxu0 %v5088_v56  ;;  %4533 = vmatpush.bf16.msra.mxu2 %v5092_v57 }
 0x2ae   : > { %4519 = vmatpush.bf16.msra.mxu1 %v6240_v63  ;;  %4545 = vmatpush.bf16.msra.mxu3 %v6244_v0 }
 0x2af   : > { %4508 = vmatpush.bf16.msra.mxu0 %v4960_v5  ;;  %4534 = vmatpush.bf16.msra.mxu2 %v4964_v6 }
 0x2b1   : > { %v4302_v17 = vpop.f32.mrf.mxu0 }
 0x2b2   : > { %4520 = vmatpush.bf16.msra.mxu1 %v6112_v8  ;;  %4546 = vmatpush.bf16.msra.mxu3 %v6116_v9  ;;  %v4303_v19 = vadd.f32 %v4302_v17, %v1119_v18 }
 0x2b3   : > { %4509 = vmatmul.bf16.vlgmr.msra.gmra.mxu0 %v7978_v52  ;;  %4535 = vmatmul.bf16.vlgmr.msra.gmra.mxu2 %v7978_v52 }
 0x2b6   : > { %4521 = vmatpush.bf16.msra.mxu1 %v5984_v15  ;;  %4547 = vmatpush.bf16.msra.mxu3 %v5988_v16  ;;  %v4315_v21 = vpop.f32.mrf.mxu1  ;;  %v1128_v15 = vperm.slane %v1092_v31, 7 }
 0x2b7   : > { %v4328_v22 = vpop.f32.mrf.mxu2  ;;  %v4316_v23 = vadd.f32 %v4315_v21, %v4303_v19 }
 0x2b8   : > { %v4329_v52 = vadd.f32 %v4328_v22, %v1120_v24 }
 0x2b9   : > { %4522 = vmatmul.bf16.vlgmr.msra.gmra.mxu1 %v7995_v13  ;;  %4548 = vmatmul.bf16.vlgmr.msra.gmra.mxu3 %v7995_v13  ;;  %v4304_v25 = vpop.f32.mrf.mxu0  ;;  %4575 = vst [vmem:[%s8322_s24 + $0xb0] sm:$0xff] %v4316_v23 }
 0x2bc   : > { %v4341_v27 = vpop.f32.mrf.mxu3 }
 0x2bd   : > { %v4342_v28 = vadd.f32 %v4341_v27, %v4329_v52 }
 0x2be   : > { %v4317_v29 = vpop.f32.mrf.mxu1 }
 0x2bf   : > { %v4330_v30 = vpop.f32.mrf.mxu2  ;;  %4576 = vst [vmem:[%s8322_s24 + $0xb8] sm:$0xff] %v4342_v28 }
 0x2c4   : > { %v4343_v13 = vpop.f32.mrf.mxu3 }
 0x2d1   : > { %v4354_v32 = vpop.f32.mrf.mxu0 }
 0x2d2   : > { %v4355_v34 = vadd.f32 %v4354_v32, %v1121_v33 }
 0x2d6   : > { %v4367_v35 = vpop.f32.mrf.mxu1 }
 0x2d7   : > { %v4380_v36 = vpop.f32.mrf.mxu2  ;;  %v4368_v37 = vadd.f32 %v4367_v35, %v4355_v34 }
 0x2d8   : > { %v4381_v39 = vadd.f32 %v4380_v36, %v1122_v38 }
 0x2d9   : > { %v4356_v20 = vpop.f32.mrf.mxu0  ;;  %4577 = vst [vmem:[%s8322_s24 + $0xc0] sm:$0xff] %v4368_v37 }
 0x2dc   : > { %v4393_v40 = vpop.f32.mrf.mxu3 }
 0x2dd   : > { %v4394_v41 = vadd.f32 %v4393_v40, %v4381_v39 }
 0x2de   : > { %v4369_v42 = vpop.f32.mrf.mxu1 }
 0x2df   : > { %v4382_v43 = vpop.f32.mrf.mxu2  ;;  %4578 = vst [vmem:[%s8322_s24 + $0xc8] sm:$0xff] %v4394_v41 }
 0x2e4   : > { %v4395_v44 = vpop.f32.mrf.mxu3 }
 0x2f1   : > { %v4406_v45 = vpop.f32.mrf.mxu0 }
 0x2f2   : > { %v4407_v47 = vadd.f32 %v4406_v45, %v1123_v46 }
 0x2f6   : > { %v4419_v48 = vpop.f32.mrf.mxu1 }
 0x2f7   : > { %v4432_v49 = vpop.f32.mrf.mxu2  ;;  %v4420_v50 = vadd.f32 %v4419_v48, %v4407_v47 }
 0x2f8   : > { %v4433_v54 = vadd.f32 %v4432_v49, %v1124_v51 }
 0x2f9   : > { %v4408_v53 = vpop.f32.mrf.mxu0  ;;  %4579 = vst [vmem:[%s8322_s24 + $0xd0] sm:$0xff] %v4420_v50 }
 0x2fc   : > { %v4445_v55 = vpop.f32.mrf.mxu3 }
 0x2fd   : > { %v4446_v56 = vadd.f32 %v4445_v55, %v4433_v54 }
 0x2fe   : > { %v4421_v57 = vpop.f32.mrf.mxu1 }
 0x2ff   : > { %v4434_v58 = vpop.f32.mrf.mxu2  ;;  %4580 = vst [vmem:[%s8322_s24 + $0xd8] sm:$0xff] %v4446_v56 }
 0x304   : > { %v4447_v59 = vpop.f32.mrf.mxu3 }
 0x311   : > { %v4458_v60 = vpop.f32.mrf.mxu0 }
 0x312   : > { %v4459_v62 = vadd.f32 %v4458_v60, %v1125_v61 }
 0x316   : > { %v4471_v63 = vpop.f32.mrf.mxu1 }
 0x317   : > { %v4484_v0 = vpop.f32.mrf.mxu2  ;;  %v4472_v26 = vadd.f32 %v4471_v63, %v4459_v62 }
 0x318   : > { %v4485_v3 = vadd.f32 %v4484_v0, %v1126_v1 }
 0x319   : > { %v4460_v2 = vpop.f32.mrf.mxu0  ;;  %4581 = vst [vmem:[%s8322_s24 + $0xe0] sm:$0xff] %v4472_v26 }
 0x31c   : > { %v4497_v4 = vpop.f32.mrf.mxu3 }
 0x31d   : > { %v4498_v5 = vadd.f32 %v4497_v4, %v4485_v3 }
 0x31e   : > { %v4473_v6 = vpop.f32.mrf.mxu1 }
 0x31f   : > { %v4486_v8 = vpop.f32.mrf.mxu2  ;;  %4582 = vst [vmem:[%s8322_s24 + $0xe8] sm:$0xff] %v4498_v5 }
 0x324   : > { %v4499_v9 = vpop.f32.mrf.mxu3 }
 0x330   : > { %v4510_v11 = vpop.f32.mrf.mxu0 }
 0x331   : > { %v4511_v12 = vadd.f32 %v4510_v11, %v1127_v10 }
 0x336   : > { %v4523_v7 = vpop.f32.mrf.mxu1  ;;  %v4536_v16 = vpop.f32.mrf.mxu2 }
 0x337   : > { %v4524_v14 = vadd.f32 %v4523_v7, %v4511_v12  ;;  %v4537_v18 = vadd.f32 %v4536_v16, %v1128_v15 }
 0x338   : > { %v4512_v17 = vpop.f32.mrf.mxu0 }
 0x339   : > { %4583 = vst [vmem:[%s8322_s24 + $0xf0] sm:$0xff] %v4524_v14 }
 0x33c   : > { %v4549_v19 = vpop.f32.mrf.mxu3 }
 0x33d   : > { %v4550_v21 = vadd.f32 %v4549_v19, %v4537_v18 }
 0x33e   : > { %v4525_v22 = vpop.f32.mrf.mxu1  ;;  %v4538_v23 = vpop.f32.mrf.mxu2 }
 0x33f   : > { %4584 = vst [vmem:[%s8322_s24 + $0xf8] sm:$0xff] %v4550_v21 }
 0x344   : > { %v4551_v24 = vpop.f32.mrf.mxu3 }
 0x345 PF: > { %s9059_s12 = sld [smem:[#allocation11_spill]]  ;;  %p14_p8 = scmp.ge.s32.totalorder %s7723_s23, 4  }
 0x346   : > { %s9060_s18 = smov %s7655_s19  ;;  %s9061_s19 = smov %s7659_s20 }
 0x347   : > { %s9063_s21 = smov %s7723_s23  ;;  %16 = sbr.rel (!%p14_p8) target bundleno = 6 (0x6), region = 98 }
 0x34b   : > { %s9062_s20 = smov %s9059_s12 }
 0x34c   :  { %4607 = vsyncpa [#allocation3], 1 }
 0x34d   :  { %4609 = vsyncpa [#allocation3 + $0x1], 1 }
 0x34e   :  { %4610 = vsyncpa [#allocation5], 1 }

</bundles_post_ra>
